<compile_context>
chip_gen: v7x
topology: tpu7x:2x2x1
jax: 0.10.0
libtpu: 0.0.40
codegen_flags: <defaults>
</compile_context>

<pallas_src>
import math

import jax
import jax.numpy as jnp
from jax.experimental import pallas as pl
from jax.experimental.pallas import tpu as pltpu

# ---------------------------------------------------------------------------
# Model dimensions.  Real module dims: DenseNet121 norm5.num_features = 1024,
# TinyBERT hidden_size = 312, FC = 512.  Stand-in dims are kept small but the
# compute graph is exact.  All sub-128 dims are padded to 128 lanes at init.
# ---------------------------------------------------------------------------
D_IMG = 128          # stand-in for densenet121 norm5.num_features (1024)
D_TXT = 64           # stand-in for TinyBERT hidden_size (312)
D_TXT_PAD = 128      # lane-padded text hidden dim
D_FC = 512           # matches nn.Linear(..., 512)
NUM_CLASSES = 5
C_PAD = 128          # lane-dense padded classifier output width
PATCH = 4            # patch size for the image-backbone stub
PD = 3 * PATCH * PATCH          # 48 raw patch features
PD_PAD = 128                    # lane-padded patch dim
VOCAB = 100
B_TILE = 8           # batch rows per grid step (fills f32 sublanes)
NEG_INF = -1e9


# ---------------------------------------------------------------------------
# Small helpers (glue, outside kernels).
# ---------------------------------------------------------------------------
def _pad_last(x, target):
    pad = target - x.shape[-1]
    if pad <= 0:
        return x
    cfg = [(0, 0)] * (x.ndim - 1) + [(0, pad)]
    return jnp.pad(x, cfg)


def _pad_axis0(x, target):
    pad = target - x.shape[0]
    if pad <= 0:
        return x
    cfg = [(0, pad)] + [(0, 0)] * (x.ndim - 1)
    return jnp.pad(x, cfg)


def patchify(images, patch):
    # images: NCHW (like PyTorch).  Returns (B, num_patches, C*patch*patch).
    B, C, H, W = images.shape
    x = images.reshape(B, C, H // patch, patch, W // patch, patch)
    x = x.transpose(0, 2, 4, 1, 3, 5)
    return x.reshape(B, (H // patch) * (W // patch), C * patch * patch)


# ---------------------------------------------------------------------------
# Fused kernel: image backbone stub + text backbone stub + SelfAttention heads
# + mean(dim=1) + FC projections + concat-classifier, per batch tile.
# ---------------------------------------------------------------------------
def _softmax_last(s):
    m = jnp.max(s, axis=-1, keepdims=True)
    e = jnp.exp(s - m)
    # EUP reciprocal instead of a VPU divide sequence.
    return e * pl.reciprocal(jnp.sum(e, axis=-1, keepdims=True), approx=True)


def _fold_dot(x3, w, b):
    # Shared-weight matmul with batch folded into rows:
    # (B, S, D) -> (B*S, D) @ (D, E) + b -> (B, S, E), f32 accumulation.
    B, S, D = x3.shape
    y = jnp.dot(x3.reshape(B * S, D), w,
                preferred_element_type=jnp.float32) + b
    return y.reshape(B, S, -1)


def _fused_kernel(patch_ref, emb_ref, mask_ref,
                  img_w, img_b,
                  bqw, bkw, bvw, bqb, bkb, bvb,
                  tqw, tkw, tvw, tqb, tkb, tvb,
                  iav_w, iav_b,
                  fci_w, fci_b, fct_w, fct_b,
                  cwi, cwt, cb,
                  out_ref):
    f32 = jnp.float32
    bf16 = jnp.bfloat16
    bt, P, pdp = patch_ref.shape

    # ---- image backbone stub: patch-embed matmul + ReLU + global avg pool --
    # TODO(synk): stands in for the frozen pretrained DenseNet121 feature
    # extractor (features -> relu -> adaptive_avg_pool2d -> flatten).
    x2 = patch_ref[...].astype(bf16).reshape(bt * P, pdp)           # (BT*P, 128)
    h = jnp.dot(x2, img_w[...], preferred_element_type=f32) + img_b[...]
    h = jnp.maximum(h, 0.0).reshape(bt, P, D_IMG)
    img_feat = jnp.mean(h, axis=1)                                  # (BT, D_IMG)

    # ---- image SelfAttention over a length-1 sequence -----------------------
    # softmax of a 1x1 score is exactly 1, so attention == x @ Wv + bv and the
    # subsequent mean(dim=1) is a no-op (bit-identical to the full path).
    img_attn = jnp.dot(img_feat.astype(bf16), iav_w[...],
                       preferred_element_type=f32) + iav_b[...]     # (BT, D_IMG)
    img_proj = jnp.dot(img_attn.astype(bf16), fci_w[...],
                       preferred_element_type=f32) + fci_b[...]     # (BT, 512)

    # ---- text backbone stub: one masked self-attention layer ----------------
    # TODO(synk): stands in for the 4-layer pretrained TinyBERT encoder.
    emb = emb_ref[...].astype(bf16)                                 # (BT, L, 128)
    q = _fold_dot(emb, bqw[...], bqb[...])
    k = _fold_dot(emb, bkw[...], bkb[...])
    v = _fold_dot(emb, bvw[...], bvb[...])
    scale = 1.0 / math.sqrt(D_TXT)
    s = jnp.einsum('bqd,bkd->bqk', q.astype(bf16), k.astype(bf16),
                   preferred_element_type=f32) * scale              # (BT, L, L)
    bias = jnp.where(mask_ref[...] > 0, 0.0, NEG_INF)               # (BT, L)
    s = s + bias[:, None, :]
    p = _softmax_last(s)
    hidden = jnp.einsum('bqk,bkd->bqd', p.astype(bf16), v.astype(bf16),
                        preferred_element_type=f32)                 # (BT, L, 128)

    # ---- text SelfAttention head (unmasked) + mean(dim=1) -------------------
    # TODO(synk): SelfAttention is not defined in the provided source; assumed
    # single-head scaled-dot-product QKV attention (Linear q/k/v).
    hb = hidden.astype(bf16)
    q2 = _fold_dot(hb, tqw[...], tqb[...])
    k2 = _fold_dot(hb, tkw[...], tkb[...])
    v2 = _fold_dot(hb, tvw[...], tvb[...])
    s2 = jnp.einsum('bqd,bkd->bqk', q2.astype(bf16), k2.astype(bf16),
                    preferred_element_type=f32) * scale
    p2 = _softmax_last(s2)
    a2 = jnp.einsum('bqk,bkd->bqd', p2.astype(bf16), v2.astype(bf16),
                    preferred_element_type=f32)                     # (BT, L, 128)
    txt_vec = jnp.mean(a2, axis=1)                                  # (BT, 128)
    txt_proj = jnp.dot(txt_vec.astype(bf16), fct_w[...],
                       preferred_element_type=f32) + fct_b[...]     # (BT, 512)

    # ---- classifier: split-weight matmul == torch.cat(dim=1) @ W_cls.T + b --
    # Output is lane-dense: 128 padded columns (extras are zero weights/bias).
    logits = (jnp.dot(img_proj.astype(bf16), cwi[...], preferred_element_type=f32)
              + jnp.dot(txt_proj.astype(bf16), cwt[...], preferred_element_type=f32)
              + cb[...])                                            # (BT, 128)
    out_ref[...] = logits.astype(out_ref.dtype)


def fused_forward(patches, emb, mask, p):
    Bp, P, pdp = patches.shape
    L = emb.shape[1]

    weights = [
        p["img_bb_w"], p["img_bb_b"],
        p["bb_wq"], p["bb_wk"], p["bb_wv"], p["bb_bq"], p["bb_bk"], p["bb_bv"],
        p["ta_wq"], p["ta_wk"], p["ta_wv"], p["ta_bq"], p["ta_bk"], p["ta_bv"],
        p["ia_wv"], p["ia_bv"],
        p["fc_img_w"], p["fc_img_b"], p["fc_txt_w"], p["fc_txt_b"],
        p["cls_w_img"], p["cls_w_txt"], p["cls_b"],
    ]
    # Constant index maps -> weights stay resident in VMEM across grid steps.
    w_specs = [pl.BlockSpec(w.shape, lambda i: (0, 0)) for w in weights]

    return pl.pallas_call(
        _fused_kernel,
        out_shape=jax.ShapeDtypeStruct((Bp, C_PAD), jnp.float32),
        grid=(Bp // B_TILE,),
        in_specs=[
            pl.BlockSpec((B_TILE, P, pdp), lambda i: (i, 0, 0)),
            pl.BlockSpec((B_TILE, L, D_TXT_PAD), lambda i: (i, 0, 0)),
            pl.BlockSpec((B_TILE, L), lambda i: (i, 0)),
        ] + w_specs,
        out_specs=pl.BlockSpec((B_TILE, C_PAD), lambda i: (i, 0)),
        # Single batch-tile axis; "parallel" lets v7x shard batch tiles across
        # its 2 TensorCores once B > B_TILE.  At real model dims (D_IMG=1024)
        # also set vmem_limit_bytes and keep weights bf16 to fit v5e/v7x VMEM.
        compiler_params=pltpu.CompilerParams(
            dimension_semantics=("parallel",)),
    )(patches, emb, mask, *weights)


# ---------------------------------------------------------------------------
# Parameter init: logical-size weights zero-padded to 128-lane shapes (exact),
# matmul weights stored in bfloat16, biases in f32.
# ---------------------------------------------------------------------------
def init_params(key):
    ks = jax.random.split(key, 16)

    def dense(k, shape, scale=0.05):
        return (scale * jax.random.normal(k, shape)).astype(jnp.float32)

    def padded_w(k, shape, padded_shape, scale=0.05):
        w = dense(k, shape, scale)
        full = jnp.zeros(padded_shape, jnp.float32).at[:shape[0], :shape[1]].set(w)
        return full.astype(jnp.bfloat16)

    fzeros = lambda n: jnp.zeros((1, n), jnp.float32)

    p = {
        # image backbone stub ("frozen DenseNet121")
        "img_bb_w": padded_w(ks[0], (PD, D_IMG), (PD_PAD, D_IMG)),
        "img_bb_b": fzeros(D_IMG),
        # text backbone stub ("frozen TinyBERT"): token embedding used by glue
        "tok_emb": _pad_last(dense(ks[1], (VOCAB, D_TXT), scale=0.5), D_TXT_PAD),
        "bb_wq": padded_w(ks[2], (D_TXT, D_TXT), (D_TXT_PAD, D_TXT_PAD)),
        "bb_wk": padded_w(ks[3], (D_TXT, D_TXT), (D_TXT_PAD, D_TXT_PAD)),
        "bb_wv": padded_w(ks[4], (D_TXT, D_TXT), (D_TXT_PAD, D_TXT_PAD)),
        "bb_bq": fzeros(D_TXT_PAD), "bb_bk": fzeros(D_TXT_PAD), "bb_bv": fzeros(D_TXT_PAD),
        # text SelfAttention head
        "ta_wq": padded_w(ks[5], (D_TXT, D_TXT), (D_TXT_PAD, D_TXT_PAD)),
        "ta_wk": padded_w(ks[6], (D_TXT, D_TXT), (D_TXT_PAD, D_TXT_PAD)),
        "ta_wv": padded_w(ks[7], (D_TXT, D_TXT), (D_TXT_PAD, D_TXT_PAD)),
        "ta_bq": fzeros(D_TXT_PAD), "ta_bk": fzeros(D_TXT_PAD), "ta_bv": fzeros(D_TXT_PAD),
        # image SelfAttention head: length-1 sequence => only Wv/bv are needed
        "ia_wv": padded_w(ks[8], (D_IMG, D_IMG), (D_IMG, D_IMG)),
        "ia_bv": fzeros(D_IMG),
        # img_featrs_fc / text_features_fc
        "fc_img_w": padded_w(ks[9], (D_IMG, D_FC), (D_IMG, D_FC)),
        "fc_img_b": fzeros(D_FC),
        "fc_txt_w": padded_w(ks[10], (D_TXT, D_FC), (D_TXT_PAD, D_FC)),
        "fc_txt_b": fzeros(D_FC),
        # classifier (split weight == concat-then-matmul), padded to 128 lanes
        "cls_w_img": padded_w(ks[11], (D_FC, NUM_CLASSES), (D_FC, C_PAD)),
        "cls_w_txt": padded_w(ks[12], (D_FC, NUM_CLASSES), (D_FC, C_PAD)),
        "cls_b": fzeros(C_PAD),
    }
    return p


# ---------------------------------------------------------------------------
# Full forward (glue: patchify, embedding gather, batch/lane padding, slice).
# ---------------------------------------------------------------------------
def mo_density_bert_forward(params, images, input_ids, attention_mask):
    B = images.shape[0]
    B_pad = ((B + B_TILE - 1) // B_TILE) * B_TILE

    # image_features = self.img_featrs(images) -> per-sample pooled feature
    patches = _pad_axis0(_pad_last(patchify(images, PATCH), PD_PAD), B_pad)

    # text_features = self.txt_featrs(input_ids, attention_mask)[0]
    # TODO(synk): embedding gather stays in plain JAX (no clean small-Pallas
    # equivalent for a row gather of this size).
    emb = jnp.take(params["tok_emb"], input_ids, axis=0)      # (B, L, 128)
    emb = _pad_axis0(emb, B_pad)
    mask = _pad_axis0(attention_mask.astype(jnp.int32), B_pad)

    logits = fused_forward(patches, emb, mask, params)        # (B_pad, 128)
    return logits[:B, :NUM_CLASSES]


if __name__ == "__main__":
    key = jax.random.PRNGKey(0)
    k_img, k_ids = jax.random.split(key)

    B, L = 2, 8
    images = jax.random.normal(k_img, (B, 3, 16, 16), dtype=jnp.float32)   # NCHW
    input_ids = jax.random.randint(k_ids, (B, L), 0, VOCAB, dtype=jnp.int32)
    attention_mask = jnp.array([[1, 1, 1, 1, 1, 1, 1, 1],
                                [1, 1, 1, 1, 1, 0, 0, 0]], dtype=jnp.int32)

    params = init_params(jax.random.PRNGKey(42))

    logits = mo_density_bert_forward(params, images, input_ids, attention_mask)
    logits = jax.block_until_ready(logits)
    assert logits.shape == (B, NUM_CLASSES) and logits.dtype == jnp.float32
    assert bool(jnp.all(jnp.isfinite(logits)))
    print("KERNEL_OK")
</pallas_src>

<mosaic_0001>
module attributes {stable_mosaic.version = 11 : i64} {
  func.func @_fused_kernel(%arg0: i32, %arg1: memref<8x16x128xf32, #tpu.memory_space<vmem>>, %arg2: memref<8x8x128xf32, #tpu.memory_space<vmem>>, %arg3: memref<8x8xi32, #tpu.memory_space<vmem>>, %arg4: memref<128x128xbf16, #tpu.memory_space<vmem>>, %arg5: memref<1x128xf32, #tpu.memory_space<vmem>>, %arg6: memref<128x128xbf16, #tpu.memory_space<vmem>>, %arg7: memref<128x128xbf16, #tpu.memory_space<vmem>>, %arg8: memref<128x128xbf16, #tpu.memory_space<vmem>>, %arg9: memref<1x128xf32, #tpu.memory_space<vmem>>, %arg10: memref<1x128xf32, #tpu.memory_space<vmem>>, %arg11: memref<1x128xf32, #tpu.memory_space<vmem>>, %arg12: memref<128x128xbf16, #tpu.memory_space<vmem>>, %arg13: memref<128x128xbf16, #tpu.memory_space<vmem>>, %arg14: memref<128x128xbf16, #tpu.memory_space<vmem>>, %arg15: memref<1x128xf32, #tpu.memory_space<vmem>>, %arg16: memref<1x128xf32, #tpu.memory_space<vmem>>, %arg17: memref<1x128xf32, #tpu.memory_space<vmem>>, %arg18: memref<128x128xbf16, #tpu.memory_space<vmem>>, %arg19: memref<1x128xf32, #tpu.memory_space<vmem>>, %arg20: memref<128x512xbf16, #tpu.memory_space<vmem>>, %arg21: memref<1x512xf32, #tpu.memory_space<vmem>>, %arg22: memref<128x512xbf16, #tpu.memory_space<vmem>>, %arg23: memref<1x512xf32, #tpu.memory_space<vmem>>, %arg24: memref<512x128xbf16, #tpu.memory_space<vmem>>, %arg25: memref<512x128xbf16, #tpu.memory_space<vmem>>, %arg26: memref<1x128xf32, #tpu.memory_space<vmem>>, %arg27: memref<8x128xf32, #tpu.memory_space<vmem>>) attributes {dimension_semantics = [#tpu.dimension_semantics<parallel>], iteration_bounds = array<i64: 1>, scalar_prefetch = 0 : i64, scratch_operands = 0 : i64, tpu.core_type = #tpu.core_type<tc>, window_params = [{transform_indices = @transform_0, window_bounds = array<i64: 8, 16, 128>}, {transform_indices = @transform_1, window_bounds = array<i64: 8, 8, 128>}, {transform_indices = @transform_2, window_bounds = array<i64: 8, 8>}, {pipeline_mode = #tpu.pipeline_mode<synchronous>, transform_indices = @transform_3, window_bounds = array<i64: 128, 128>}, {pipeline_mode = #tpu.pipeline_mode<synchronous>, transform_indices = @transform_4, window_bounds = array<i64: 1, 128>}, {pipeline_mode = #tpu.pipeline_mode<synchronous>, transform_indices = @transform_5, window_bounds = array<i64: 128, 128>}, {pipeline_mode = #tpu.pipeline_mode<synchronous>, transform_indices = @transform_6, window_bounds = array<i64: 128, 128>}, {pipeline_mode = #tpu.pipeline_mode<synchronous>, transform_indices = @transform_7, window_bounds = array<i64: 128, 128>}, {pipeline_mode = #tpu.pipeline_mode<synchronous>, transform_indices = @transform_8, window_bounds = array<i64: 1, 128>}, {pipeline_mode = #tpu.pipeline_mode<synchronous>, transform_indices = @transform_9, window_bounds = array<i64: 1, 128>}, {pipeline_mode = #tpu.pipeline_mode<synchronous>, transform_indices = @transform_10, window_bounds = array<i64: 1, 128>}, {pipeline_mode = #tpu.pipeline_mode<synchronous>, transform_indices = @transform_11, window_bounds = array<i64: 128, 128>}, {pipeline_mode = #tpu.pipeline_mode<synchronous>, transform_indices = @transform_12, window_bounds = array<i64: 128, 128>}, {pipeline_mode = #tpu.pipeline_mode<synchronous>, transform_indices = @transform_13, window_bounds = array<i64: 128, 128>}, {pipeline_mode = #tpu.pipeline_mode<synchronous>, transform_indices = @transform_14, window_bounds = array<i64: 1, 128>}, {pipeline_mode = #tpu.pipeline_mode<synchronous>, transform_indices = @transform_15, window_bounds = array<i64: 1, 128>}, {pipeline_mode = #tpu.pipeline_mode<synchronous>, transform_indices = @transform_16, window_bounds = array<i64: 1, 128>}, {pipeline_mode = #tpu.pipeline_mode<synchronous>, transform_indices = @transform_17, window_bounds = array<i64: 128, 128>}, {pipeline_mode = #tpu.pipeline_mode<synchronous>, transform_indices = @transform_18, window_bounds = array<i64: 1, 128>}, {pipeline_mode = #tpu.pipeline_mode<synchronous>, transform_indices = @transform_19, window_bounds = array<i64: 128, 512>}, {pipeline_mode = #tpu.pipeline_mode<synchronous>, transform_indices = @transform_20, window_bounds = array<i64: 1, 512>}, {pipeline_mode = #tpu.pipeline_mode<synchronous>, transform_indices = @transform_21, window_bounds = array<i64: 128, 512>}, {pipeline_mode = #tpu.pipeline_mode<synchronous>, transform_indices = @transform_22, window_bounds = array<i64: 1, 512>}, {pipeline_mode = #tpu.pipeline_mode<synchronous>, transform_indices = @transform_23, window_bounds = array<i64: 512, 128>}, {pipeline_mode = #tpu.pipeline_mode<synchronous>, transform_indices = @transform_24, window_bounds = array<i64: 512, 128>}, {pipeline_mode = #tpu.pipeline_mode<synchronous>, transform_indices = @transform_25, window_bounds = array<i64: 1, 128>}, {transform_indices = @transform_26, window_bounds = array<i64: 8, 128>}]} {
    %c0 = arith.constant 0 : index
    %c0_0 = arith.constant 0 : index
    %c0_1 = arith.constant 0 : index
    %0 = vector.load %arg1[%c0, %c0_0, %c0_1] : memref<8x16x128xf32, #tpu.memory_space<vmem>>, vector<8x16x128xf32>
    %1 = arith.truncf %0 : vector<8x16x128xf32> to vector<8x16x128xbf16>
    %2 = vector.shape_cast %1 : vector<8x16x128xbf16> to vector<128x128xbf16>
    %c0_2 = arith.constant 0 : index
    %c0_3 = arith.constant 0 : index
    %3 = vector.load %arg4[%c0_2, %c0_3] : memref<128x128xbf16, #tpu.memory_space<vmem>>, vector<128x128xbf16>
    %cst = arith.constant dense<0.000000e+00> : vector<128x128xf32>
    %4 = tpu.matmul %2, %3, %cst {dimension_numbers = #tpu.dot_dimension_numbers<[1], [0], [0], [1], [0, 0, 1, 1], [], []>} : vector<128x128xbf16>, vector<128x128xbf16>, vector<128x128xf32> -> vector<128x128xf32>
    %c0_4 = arith.constant 0 : index
    %c0_5 = arith.constant 0 : index
    %5 = vector.load %arg5[%c0_4, %c0_5] : memref<1x128xf32, #tpu.memory_space<vmem>>, vector<1x128xf32>
    %6 = vector.broadcast %5 : vector<1x128xf32> to vector<128x128xf32>
    %7 = arith.addf %4, %6 : vector<128x128xf32>
    %cst_6 = arith.constant 0.000000e+00 : f32
    %8 = vector.broadcast %cst_6 : f32 to vector<128x128xf32>
    %9 = arith.maximumf %7, %8 : vector<128x128xf32>
    %10 = vector.shape_cast %9 : vector<128x128xf32> to vector<8x16x128xf32>
    %cst_7 = arith.constant dense<0.000000e+00> : vector<8x128xf32>
    %11 = vector.multi_reduction <add>, %10, %cst_7 [1] : vector<8x16x128xf32> to vector<8x128xf32>
    %cst_8 = arith.constant 1.600000e+01 : f32
    %12 = vector.broadcast %cst_8 : f32 to vector<8x128xf32>
    %13 = arith.divf %11, %12 : vector<8x128xf32>
    %14 = arith.truncf %13 : vector<8x128xf32> to vector<8x128xbf16>
    %c0_9 = arith.constant 0 : index
    %c0_10 = arith.constant 0 : index
    %15 = vector.load %arg18[%c0_9, %c0_10] : memref<128x128xbf16, #tpu.memory_space<vmem>>, vector<128x128xbf16>
    %cst_11 = arith.constant dense<0.000000e+00> : vector<8x128xf32>
    %16 = tpu.matmul %14, %15, %cst_11 {dimension_numbers = #tpu.dot_dimension_numbers<[1], [0], [0], [1], [0, 0, 1, 1], [], []>} : vector<8x128xbf16>, vector<128x128xbf16>, vector<8x128xf32> -> vector<8x128xf32>
    %c0_12 = arith.constant 0 : index
    %c0_13 = arith.constant 0 : index
    %17 = vector.load %arg19[%c0_12, %c0_13] : memref<1x128xf32, #tpu.memory_space<vmem>>, vector<1x128xf32>
    %18 = vector.broadcast %17 : vector<1x128xf32> to vector<8x128xf32>
    %19 = arith.addf %16, %18 : vector<8x128xf32>
    %20 = arith.truncf %19 : vector<8x128xf32> to vector<8x128xbf16>
    %c0_14 = arith.constant 0 : index
    %c0_15 = arith.constant 0 : index
    %21 = vector.load %arg20[%c0_14, %c0_15] : memref<128x512xbf16, #tpu.memory_space<vmem>>, vector<128x512xbf16>
    %cst_16 = arith.constant dense<0.000000e+00> : vector<8x512xf32>
    %22 = tpu.matmul %20, %21, %cst_16 {dimension_numbers = #tpu.dot_dimension_numbers<[1], [0], [0], [1], [0, 0, 1, 1], [], []>} : vector<8x128xbf16>, vector<128x512xbf16>, vector<8x512xf32> -> vector<8x512xf32>
    %c0_17 = arith.constant 0 : index
    %c0_18 = arith.constant 0 : index
    %23 = vector.load %arg21[%c0_17, %c0_18] : memref<1x512xf32, #tpu.memory_space<vmem>>, vector<1x512xf32>
    %24 = vector.broadcast %23 : vector<1x512xf32> to vector<8x512xf32>
    %25 = arith.addf %22, %24 : vector<8x512xf32>
    %c0_19 = arith.constant 0 : index
    %c0_20 = arith.constant 0 : index
    %c0_21 = arith.constant 0 : index
    %26 = vector.load %arg2[%c0_19, %c0_20, %c0_21] : memref<8x8x128xf32, #tpu.memory_space<vmem>>, vector<8x8x128xf32>
    %27 = arith.truncf %26 : vector<8x8x128xf32> to vector<8x8x128xbf16>
    %c0_22 = arith.constant 0 : index
    %c0_23 = arith.constant 0 : index
    %28 = vector.load %arg6[%c0_22, %c0_23] : memref<128x128xbf16, #tpu.memory_space<vmem>>, vector<128x128xbf16>
    %c0_24 = arith.constant 0 : index
    %c0_25 = arith.constant 0 : index
    %29 = vector.load %arg9[%c0_24, %c0_25] : memref<1x128xf32, #tpu.memory_space<vmem>>, vector<1x128xf32>
    %30 = vector.shape_cast %27 : vector<8x8x128xbf16> to vector<64x128xbf16>
    %cst_26 = arith.constant dense<0.000000e+00> : vector<64x128xf32>
    %31 = tpu.matmul %30, %28, %cst_26 {dimension_numbers = #tpu.dot_dimension_numbers<[1], [0], [0], [1], [0, 0, 1, 1], [], []>} : vector<64x128xbf16>, vector<128x128xbf16>, vector<64x128xf32> -> vector<64x128xf32>
    %32 = vector.broadcast %29 : vector<1x128xf32> to vector<64x128xf32>
    %33 = arith.addf %31, %32 : vector<64x128xf32>
    %34 = vector.shape_cast %33 : vector<64x128xf32> to vector<8x8x128xf32>
    %c0_27 = arith.constant 0 : index
    %c0_28 = arith.constant 0 : index
    %35 = vector.load %arg7[%c0_27, %c0_28] : memref<128x128xbf16, #tpu.memory_space<vmem>>, vector<128x128xbf16>
    %c0_29 = arith.constant 0 : index
    %c0_30 = arith.constant 0 : index
    %36 = vector.load %arg10[%c0_29, %c0_30] : memref<1x128xf32, #tpu.memory_space<vmem>>, vector<1x128xf32>
    %37 = vector.shape_cast %27 : vector<8x8x128xbf16> to vector<64x128xbf16>
    %cst_31 = arith.constant dense<0.000000e+00> : vector<64x128xf32>
    %38 = tpu.matmul %37, %35, %cst_31 {dimension_numbers = #tpu.dot_dimension_numbers<[1], [0], [0], [1], [0, 0, 1, 1], [], []>} : vector<64x128xbf16>, vector<128x128xbf16>, vector<64x128xf32> -> vector<64x128xf32>
    %39 = vector.broadcast %36 : vector<1x128xf32> to vector<64x128xf32>
    %40 = arith.addf %38, %39 : vector<64x128xf32>
    %41 = vector.shape_cast %40 : vector<64x128xf32> to vector<8x8x128xf32>
    %c0_32 = arith.constant 0 : index
    %c0_33 = arith.constant 0 : index
    %42 = vector.load %arg8[%c0_32, %c0_33] : memref<128x128xbf16, #tpu.memory_space<vmem>>, vector<128x128xbf16>
    %c0_34 = arith.constant 0 : index
    %c0_35 = arith.constant 0 : index
    %43 = vector.load %arg11[%c0_34, %c0_35] : memref<1x128xf32, #tpu.memory_space<vmem>>, vector<1x128xf32>
    %44 = vector.shape_cast %27 : vector<8x8x128xbf16> to vector<64x128xbf16>
    %cst_36 = arith.constant dense<0.000000e+00> : vector<64x128xf32>
    %45 = tpu.matmul %44, %42, %cst_36 {dimension_numbers = #tpu.dot_dimension_numbers<[1], [0], [0], [1], [0, 0, 1, 1], [], []>} : vector<64x128xbf16>, vector<128x128xbf16>, vector<64x128xf32> -> vector<64x128xf32>
    %46 = vector.broadcast %43 : vector<1x128xf32> to vector<64x128xf32>
    %47 = arith.addf %45, %46 : vector<64x128xf32>
    %48 = vector.shape_cast %47 : vector<64x128xf32> to vector<8x8x128xf32>
    %49 = arith.truncf %34 : vector<8x8x128xf32> to vector<8x8x128xbf16>
    %50 = arith.truncf %41 : vector<8x8x128xf32> to vector<8x8x128xbf16>
    "tpu.trace_start"() <{level = 10 : i32, message = "bqd,bkd->bqk"}> : () -> ()
    %cst_37 = arith.constant dense<0.000000e+00> : vector<8x8x8xf32>
    %51 = tpu.matmul %49, %50, %cst_37 {dimension_numbers = #tpu.dot_dimension_numbers<[2], [2], [1], [1], [0, 0, 0, 1, 1, 1], [0], [0]>} : vector<8x8x128xbf16>, vector<8x8x128xbf16>, vector<8x8x8xf32> -> vector<8x8x8xf32>
    "tpu.trace_stop"() : () -> ()
    %cst_38 = arith.constant 1.250000e-01 : f32
    %52 = vector.broadcast %cst_38 : f32 to vector<8x8x8xf32>
    %53 = arith.mulf %51, %52 : vector<8x8x8xf32>
    %c0_39 = arith.constant 0 : index
    %c0_40 = arith.constant 0 : index
    %54 = vector.load %arg3[%c0_39, %c0_40] : memref<8x8xi32, #tpu.memory_space<vmem>>, vector<8x8xi32>
    %c0_i32 = arith.constant 0 : i32
    %55 = vector.broadcast %c0_i32 : i32 to vector<8x8xi32>
    %56 = arith.cmpi sgt, %54, %55 : vector<8x8xi32>
    %cst_41 = arith.constant 0.000000e+00 : f32
    %cst_42 = arith.constant -1.000000e+09 : f32
    %57 = vector.broadcast %cst_41 : f32 to vector<8x8xf32>
    %58 = vector.broadcast %cst_42 : f32 to vector<8x8xf32>
    %59 = arith.select %56, %57, %58 : vector<8x8xi1>, vector<8x8xf32>
    %60 = vector.shape_cast %59 : vector<8x8xf32> to vector<8x1x8xf32>
    %61 = vector.broadcast %60 : vector<8x1x8xf32> to vector<8x8x8xf32>
    %62 = arith.addf %53, %61 : vector<8x8x8xf32>
    %cst_43 = arith.constant dense<0xFF800000> : vector<8x8xf32>
    %63 = vector.multi_reduction <maximumf>, %62, %cst_43 [2] : vector<8x8x8xf32> to vector<8x8xf32>
    %64 = vector.shape_cast %63 : vector<8x8xf32> to vector<8x8x1xf32>
    %65 = vector.broadcast %64 : vector<8x8x1xf32> to vector<8x8x8xf32>
    %66 = arith.subf %62, %65 : vector<8x8x8xf32>
    %67 = math.exp %66 : vector<8x8x8xf32>
    %cst_44 = arith.constant dense<0.000000e+00> : vector<8x8xf32>
    %68 = vector.multi_reduction <add>, %67, %cst_44 [2] : vector<8x8x8xf32> to vector<8x8xf32>
    %69 = vector.shape_cast %68 : vector<8x8xf32> to vector<8x8x1xf32>
    %70 = tpu.reciprocal %69 {approx = true} : vector<8x8x1xf32> -> vector<8x8x1xf32>
    %71 = vector.broadcast %70 : vector<8x8x1xf32> to vector<8x8x8xf32>
    %72 = arith.mulf %67, %71 : vector<8x8x8xf32>
    %73 = arith.truncf %72 : vector<8x8x8xf32> to vector<8x8x8xbf16>
    %74 = arith.truncf %48 : vector<8x8x128xf32> to vector<8x8x128xbf16>
    "tpu.trace_start"() <{level = 10 : i32, message = "bqk,bkd->bqd"}> : () -> ()
    %cst_45 = arith.constant dense<0.000000e+00> : vector<8x8x128xf32>
    %75 = tpu.matmul %73, %74, %cst_45 {dimension_numbers = #tpu.dot_dimension_numbers<[2], [1], [1], [2], [0, 0, 0, 1, 1, 2], [0], [0]>} : vector<8x8x8xbf16>, vector<8x8x128xbf16>, vector<8x8x128xf32> -> vector<8x8x128xf32>
    "tpu.trace_stop"() : () -> ()
    %76 = arith.truncf %75 : vector<8x8x128xf32> to vector<8x8x128xbf16>
    %c0_46 = arith.constant 0 : index
    %c0_47 = arith.constant 0 : index
    %77 = vector.load %arg12[%c0_46, %c0_47] : memref<128x128xbf16, #tpu.memory_space<vmem>>, vector<128x128xbf16>
    %c0_48 = arith.constant 0 : index
    %c0_49 = arith.constant 0 : index
    %78 = vector.load %arg15[%c0_48, %c0_49] : memref<1x128xf32, #tpu.memory_space<vmem>>, vector<1x128xf32>
    %79 = vector.shape_cast %76 : vector<8x8x128xbf16> to vector<64x128xbf16>
    %cst_50 = arith.constant dense<0.000000e+00> : vector<64x128xf32>
    %80 = tpu.matmul %79, %77, %cst_50 {dimension_numbers = #tpu.dot_dimension_numbers<[1], [0], [0], [1], [0, 0, 1, 1], [], []>} : vector<64x128xbf16>, vector<128x128xbf16>, vector<64x128xf32> -> vector<64x128xf32>
    %81 = vector.broadcast %78 : vector<1x128xf32> to vector<64x128xf32>
    %82 = arith.addf %80, %81 : vector<64x128xf32>
    %83 = vector.shape_cast %82 : vector<64x128xf32> to vector<8x8x128xf32>
    %c0_51 = arith.constant 0 : index
    %c0_52 = arith.constant 0 : index
    %84 = vector.load %arg13[%c0_51, %c0_52] : memref<128x128xbf16, #tpu.memory_space<vmem>>, vector<128x128xbf16>
    %c0_53 = arith.constant 0 : index
    %c0_54 = arith.constant 0 : index
    %85 = vector.load %arg16[%c0_53, %c0_54] : memref<1x128xf32, #tpu.memory_space<vmem>>, vector<1x128xf32>
    %86 = vector.shape_cast %76 : vector<8x8x128xbf16> to vector<64x128xbf16>
    %cst_55 = arith.constant dense<0.000000e+00> : vector<64x128xf32>
    %87 = tpu.matmul %86, %84, %cst_55 {dimension_numbers = #tpu.dot_dimension_numbers<[1], [0], [0], [1], [0, 0, 1, 1], [], []>} : vector<64x128xbf16>, vector<128x128xbf16>, vector<64x128xf32> -> vector<64x128xf32>
    %88 = vector.broadcast %85 : vector<1x128xf32> to vector<64x128xf32>
    %89 = arith.addf %87, %88 : vector<64x128xf32>
    %90 = vector.shape_cast %89 : vector<64x128xf32> to vector<8x8x128xf32>
    %c0_56 = arith.constant 0 : index
    %c0_57 = arith.constant 0 : index
    %91 = vector.load %arg14[%c0_56, %c0_57] : memref<128x128xbf16, #tpu.memory_space<vmem>>, vector<128x128xbf16>
    %c0_58 = arith.constant 0 : index
    %c0_59 = arith.constant 0 : index
    %92 = vector.load %arg17[%c0_58, %c0_59] : memref<1x128xf32, #tpu.memory_space<vmem>>, vector<1x128xf32>
    %93 = vector.shape_cast %76 : vector<8x8x128xbf16> to vector<64x128xbf16>
    %cst_60 = arith.constant dense<0.000000e+00> : vector<64x128xf32>
    %94 = tpu.matmul %93, %91, %cst_60 {dimension_numbers = #tpu.dot_dimension_numbers<[1], [0], [0], [1], [0, 0, 1, 1], [], []>} : vector<64x128xbf16>, vector<128x128xbf16>, vector<64x128xf32> -> vector<64x128xf32>
    %95 = vector.broadcast %92 : vector<1x128xf32> to vector<64x128xf32>
    %96 = arith.addf %94, %95 : vector<64x128xf32>
    %97 = vector.shape_cast %96 : vector<64x128xf32> to vector<8x8x128xf32>
    %98 = arith.truncf %83 : vector<8x8x128xf32> to vector<8x8x128xbf16>
    %99 = arith.truncf %90 : vector<8x8x128xf32> to vector<8x8x128xbf16>
    "tpu.trace_start"() <{level = 10 : i32, message = "bqd,bkd->bqk"}> : () -> ()
    %cst_61 = arith.constant dense<0.000000e+00> : vector<8x8x8xf32>
    %100 = tpu.matmul %98, %99, %cst_61 {dimension_numbers = #tpu.dot_dimension_numbers<[2], [2], [1], [1], [0, 0, 0, 1, 1, 1], [0], [0]>} : vector<8x8x128xbf16>, vector<8x8x128xbf16>, vector<8x8x8xf32> -> vector<8x8x8xf32>
    "tpu.trace_stop"() : () -> ()
    %cst_62 = arith.constant 1.250000e-01 : f32
    %101 = vector.broadcast %cst_62 : f32 to vector<8x8x8xf32>
    %102 = arith.mulf %100, %101 : vector<8x8x8xf32>
    %cst_63 = arith.constant dense<0xFF800000> : vector<8x8xf32>
    %103 = vector.multi_reduction <maximumf>, %102, %cst_63 [2] : vector<8x8x8xf32> to vector<8x8xf32>
    %104 = vector.shape_cast %103 : vector<8x8xf32> to vector<8x8x1xf32>
    %105 = vector.broadcast %104 : vector<8x8x1xf32> to vector<8x8x8xf32>
    %106 = arith.subf %102, %105 : vector<8x8x8xf32>
    %107 = math.exp %106 : vector<8x8x8xf32>
    %cst_64 = arith.constant dense<0.000000e+00> : vector<8x8xf32>
    %108 = vector.multi_reduction <add>, %107, %cst_64 [2] : vector<8x8x8xf32> to vector<8x8xf32>
    %109 = vector.shape_cast %108 : vector<8x8xf32> to vector<8x8x1xf32>
    %110 = tpu.reciprocal %109 {approx = true} : vector<8x8x1xf32> -> vector<8x8x1xf32>
    %111 = vector.broadcast %110 : vector<8x8x1xf32> to vector<8x8x8xf32>
    %112 = arith.mulf %107, %111 : vector<8x8x8xf32>
    %113 = arith.truncf %112 : vector<8x8x8xf32> to vector<8x8x8xbf16>
    %114 = arith.truncf %97 : vector<8x8x128xf32> to vector<8x8x128xbf16>
    "tpu.trace_start"() <{level = 10 : i32, message = "bqk,bkd->bqd"}> : () -> ()
    %cst_65 = arith.constant dense<0.000000e+00> : vector<8x8x128xf32>
    %115 = tpu.matmul %113, %114, %cst_65 {dimension_numbers = #tpu.dot_dimension_numbers<[2], [1], [1], [2], [0, 0, 0, 1, 1, 2], [0], [0]>} : vector<8x8x8xbf16>, vector<8x8x128xbf16>, vector<8x8x128xf32> -> vector<8x8x128xf32>
    "tpu.trace_stop"() : () -> ()
    %cst_66 = arith.constant dense<0.000000e+00> : vector<8x128xf32>
    %116 = vector.multi_reduction <add>, %115, %cst_66 [1] : vector<8x8x128xf32> to vector<8x128xf32>
    %cst_67 = arith.constant 8.000000e+00 : f32
    %117 = vector.broadcast %cst_67 : f32 to vector<8x128xf32>
    %118 = arith.divf %116, %117 : vector<8x128xf32>
    %119 = arith.truncf %118 : vector<8x128xf32> to vector<8x128xbf16>
    %c0_68 = arith.constant 0 : index
    %c0_69 = arith.constant 0 : index
    %120 = vector.load %arg22[%c0_68, %c0_69] : memref<128x512xbf16, #tpu.memory_space<vmem>>, vector<128x512xbf16>
    %cst_70 = arith.constant dense<0.000000e+00> : vector<8x512xf32>
    %121 = tpu.matmul %119, %120, %cst_70 {dimension_numbers = #tpu.dot_dimension_numbers<[1], [0], [0], [1], [0, 0, 1, 1], [], []>} : vector<8x128xbf16>, vector<128x512xbf16>, vector<8x512xf32> -> vector<8x512xf32>
    %c0_71 = arith.constant 0 : index
    %c0_72 = arith.constant 0 : index
    %122 = vector.load %arg23[%c0_71, %c0_72] : memref<1x512xf32, #tpu.memory_space<vmem>>, vector<1x512xf32>
    %123 = vector.broadcast %122 : vector<1x512xf32> to vector<8x512xf32>
    %124 = arith.addf %121, %123 : vector<8x512xf32>
    %125 = arith.truncf %25 : vector<8x512xf32> to vector<8x512xbf16>
    %c0_73 = arith.constant 0 : index
    %c0_74 = arith.constant 0 : index
    %126 = vector.load %arg24[%c0_73, %c0_74] : memref<512x128xbf16, #tpu.memory_space<vmem>>, vector<512x128xbf16>
    %cst_75 = arith.constant dense<0.000000e+00> : vector<8x128xf32>
    %127 = tpu.matmul %125, %126, %cst_75 {dimension_numbers = #tpu.dot_dimension_numbers<[1], [0], [0], [1], [0, 0, 1, 1], [], []>} : vector<8x512xbf16>, vector<512x128xbf16>, vector<8x128xf32> -> vector<8x128xf32>
    %128 = arith.truncf %124 : vector<8x512xf32> to vector<8x512xbf16>
    %c0_76 = arith.constant 0 : index
    %c0_77 = arith.constant 0 : index
    %129 = vector.load %arg25[%c0_76, %c0_77] : memref<512x128xbf16, #tpu.memory_space<vmem>>, vector<512x128xbf16>
    %cst_78 = arith.constant dense<0.000000e+00> : vector<8x128xf32>
    %130 = tpu.matmul %128, %129, %cst_78 {dimension_numbers = #tpu.dot_dimension_numbers<[1], [0], [0], [1], [0, 0, 1, 1], [], []>} : vector<8x512xbf16>, vector<512x128xbf16>, vector<8x128xf32> -> vector<8x128xf32>
    %131 = arith.addf %127, %130 : vector<8x128xf32>
    %c0_79 = arith.constant 0 : index
    %c0_80 = arith.constant 0 : index
    %132 = vector.load %arg26[%c0_79, %c0_80] : memref<1x128xf32, #tpu.memory_space<vmem>>, vector<1x128xf32>
    %133 = vector.broadcast %132 : vector<1x128xf32> to vector<8x128xf32>
    %134 = arith.addf %131, %133 : vector<8x128xf32>
    %c0_81 = arith.constant 0 : index
    %c0_82 = arith.constant 0 : index
    %135 = vector.load %arg27[%c0_81, %c0_82] : memref<8x128xf32, #tpu.memory_space<vmem>>, vector<8x128xf32>
    tpu.vector_store %arg27[%c0_81, %c0_82], %134 {strides = array<i32>} : memref<8x128xf32, #tpu.memory_space<vmem>>, vector<8x128xf32>,
    return
  }
  func.func @transform_0(%arg0: i32) -> (i32, i32, i32) {
    %c0_i32 = arith.constant 0 : i32
    %c0_i32_0 = arith.constant 0 : i32
    %c0_i32_1 = arith.constant 0 : i32
    return %arg0, %c0_i32, %c0_i32_0 : i32, i32, i32
  }
  func.func @transform_1(%arg0: i32) -> (i32, i32, i32) {
    %c0_i32 = arith.constant 0 : i32
    %c0_i32_0 = arith.constant 0 : i32
    %c0_i32_1 = arith.constant 0 : i32
    return %arg0, %c0_i32, %c0_i32_0 : i32, i32, i32
  }
  func.func @transform_2(%arg0: i32) -> (i32, i32) {
    %c0_i32 = arith.constant 0 : i32
    %c0_i32_0 = arith.constant 0 : i32
    return %arg0, %c0_i32 : i32, i32
  }
  func.func @transform_3(%arg0: i32) -> (i32, i32) {
    %c0_i32 = arith.constant 0 : i32
    %c0_i32_0 = arith.constant 0 : i32
    %c0_i32_1 = arith.constant 0 : i32
    return %c0_i32, %c0_i32_0 : i32, i32
  }
  func.func @transform_4(%arg0: i32) -> (i32, i32) {
    %c0_i32 = arith.constant 0 : i32
    %c0_i32_0 = arith.constant 0 : i32
    %c0_i32_1 = arith.constant 0 : i32
    return %c0_i32, %c0_i32_0 : i32, i32
  }
  func.func @transform_5(%arg0: i32) -> (i32, i32) {
    %c0_i32 = arith.constant 0 : i32
    %c0_i32_0 = arith.constant 0 : i32
    %c0_i32_1 = arith.constant 0 : i32
    return %c0_i32, %c0_i32_0 : i32, i32
  }
  func.func @transform_6(%arg0: i32) -> (i32, i32) {
    %c0_i32 = arith.constant 0 : i32
    %c0_i32_0 = arith.constant 0 : i32
    %c0_i32_1 = arith.constant 0 : i32
    return %c0_i32, %c0_i32_0 : i32, i32
  }
  func.func @transform_7(%arg0: i32) -> (i32, i32) {
    %c0_i32 = arith.constant 0 : i32
    %c0_i32_0 = arith.constant 0 : i32
    %c0_i32_1 = arith.constant 0 : i32
    return %c0_i32, %c0_i32_0 : i32, i32
  }
  func.func @transform_8(%arg0: i32) -> (i32, i32) {
    %c0_i32 = arith.constant 0 : i32
    %c0_i32_0 = arith.constant 0 : i32
    %c0_i32_1 = arith.constant 0 : i32
    return %c0_i32, %c0_i32_0 : i32, i32
  }
  func.func @transform_9(%arg0: i32) -> (i32, i32) {
    %c0_i32 = arith.constant 0 : i32
    %c0_i32_0 = arith.constant 0 : i32
    %c0_i32_1 = arith.constant 0 : i32
    return %c0_i32, %c0_i32_0 : i32, i32
  }
  func.func @transform_10(%arg0: i32) -> (i32, i32) {
    %c0_i32 = arith.constant 0 : i32
    %c0_i32_0 = arith.constant 0 : i32
    %c0_i32_1 = arith.constant 0 : i32
    return %c0_i32, %c0_i32_0 : i32, i32
  }
  func.func @transform_11(%arg0: i32) -> (i32, i32) {
    %c0_i32 = arith.constant 0 : i32
    %c0_i32_0 = arith.constant 0 : i32
    %c0_i32_1 = arith.constant 0 : i32
    return %c0_i32, %c0_i32_0 : i32, i32
  }
  func.func @transform_12(%arg0: i32) -> (i32, i32) {
    %c0_i32 = arith.constant 0 : i32
    %c0_i32_0 = arith.constant 0 : i32
    %c0_i32_1 = arith.constant 0 : i32
    return %c0_i32, %c0_i32_0 : i32, i32
  }
  func.func @transform_13(%arg0: i32) -> (i32, i32) {
    %c0_i32 = arith.constant 0 : i32
    %c0_i32_0 = arith.constant 0 : i32
    %c0_i32_1 = arith.constant 0 : i32
    return %c0_i32, %c0_i32_0 : i32, i32
  }
  func.func @transform_14(%arg0: i32) -> (i32, i32) {
    %c0_i32 = arith.constant 0 : i32
    %c0_i32_0 = arith.constant 0 : i32
    %c0_i32_1 = arith.constant 0 : i32
    return %c0_i32, %c0_i32_0 : i32, i32
  }
  func.func @transform_15(%arg0: i32) -> (i32, i32) {
    %c0_i32 = arith.constant 0 : i32
    %c0_i32_0 = arith.constant 0 : i32
    %c0_i32_1 = arith.constant 0 : i32
    return %c0_i32, %c0_i32_0 : i32, i32
  }
  func.func @transform_16(%arg0: i32) -> (i32, i32) {
    %c0_i32 = arith.constant 0 : i32
    %c0_i32_0 = arith.constant 0 : i32
    %c0_i32_1 = arith.constant 0 : i32
    return %c0_i32, %c0_i32_0 : i32, i32
  }
  func.func @transform_17(%arg0: i32) -> (i32, i32) {
    %c0_i32 = arith.constant 0 : i32
    %c0_i32_0 = arith.constant 0 : i32
    %c0_i32_1 = arith.constant 0 : i32
    return %c0_i32, %c0_i32_0 : i32, i32
  }
  func.func @transform_18(%arg0: i32) -> (i32, i32) {
    %c0_i32 = arith.constant 0 : i32
    %c0_i32_0 = arith.constant 0 : i32
    %c0_i32_1 = arith.constant 0 : i32
    return %c0_i32, %c0_i32_0 : i32, i32
  }
  func.func @transform_19(%arg0: i32) -> (i32, i32) {
    %c0_i32 = arith.constant 0 : i32
    %c0_i32_0 = arith.constant 0 : i32
    %c0_i32_1 = arith.constant 0 : i32
    return %c0_i32, %c0_i32_0 : i32, i32
  }
  func.func @transform_20(%arg0: i32) -> (i32, i32) {
    %c0_i32 = arith.constant 0 : i32
    %c0_i32_0 = arith.constant 0 : i32
    %c0_i32_1 = arith.constant 0 : i32
    return %c0_i32, %c0_i32_0 : i32, i32
  }
  func.func @transform_21(%arg0: i32) -> (i32, i32) {
    %c0_i32 = arith.constant 0 : i32
    %c0_i32_0 = arith.constant 0 : i32
    %c0_i32_1 = arith.constant 0 : i32
    return %c0_i32, %c0_i32_0 : i32, i32
  }
  func.func @transform_22(%arg0: i32) -> (i32, i32) {
    %c0_i32 = arith.constant 0 : i32
    %c0_i32_0 = arith.constant 0 : i32
    %c0_i32_1 = arith.constant 0 : i32
    return %c0_i32, %c0_i32_0 : i32, i32
  }
  func.func @transform_23(%arg0: i32) -> (i32, i32) {
    %c0_i32 = arith.constant 0 : i32
    %c0_i32_0 = arith.constant 0 : i32
    %c0_i32_1 = arith.constant 0 : i32
    return %c0_i32, %c0_i32_0 : i32, i32
  }
  func.func @transform_24(%arg0: i32) -> (i32, i32) {
    %c0_i32 = arith.constant 0 : i32
    %c0_i32_0 = arith.constant 0 : i32
    %c0_i32_1 = arith.constant 0 : i32
    return %c0_i32, %c0_i32_0 : i32, i32
  }
  func.func @transform_25(%arg0: i32) -> (i32, i32) {
    %c0_i32 = arith.constant 0 : i32
    %c0_i32_0 = arith.constant 0 : i32
    %c0_i32_1 = arith.constant 0 : i32
    return %c0_i32, %c0_i32_0 : i32, i32
  }
  func.func @transform_26(%arg0: i32) -> (i32, i32) {
    %c0_i32 = arith.constant 0 : i32
    %c0_i32_0 = arith.constant 0 : i32
    return %arg0, %c0_i32 : i32, i32
  }
}

</mosaic_0001>

<bundles_post_ra>
// kernel: tpu_custom_call.1
= control target key start
LH: loop header
LB: loop body
LE: loop exit
PB: predicated region body
PF: predicated region fallthrough
CT: control target
= control target key end

     0   :  { %s7458_s0 = inlined_call_operand.hbm [shape: f32[8,16,128], index: 0, kind: input, shape index: {}]   ;;  %s7459_s1 = inlined_call_operand.hbm [shape: f32[8,8,128], index: 1, kind: input, shape index: {}]   ;;  %s7460_s2 = inlined_call_operand.hbm [shape: s32[8,8], index: 2, kind: input, shape index: {}]   ;;  %s7461_s3 = inlined_call_operand.hbm [shape: bf16[128,128], index: 3, kind: input, shape index: {}]   ;;  %s7462_s4 = inlined_call_operand.hbm [shape: f32[1,128], index: 4, kind: input, shape index: {}]   ;;  %s7463_s5 = inlined_call_operand.hbm [shape: bf16[128,128], index: 5, kind: input, shape index: {}]   ;;  %s7464_s6 = inlined_call_operand.hbm [shape: bf16[128,128], index: 6, kind: input, shape index: {}]   ;;  %s7465_s7 = inlined_call_operand.hbm [shape: bf16[128,128], index: 7, kind: input, shape index: {}]   ;;  %s7466_s8 = inlined_call_operand.hbm [shape: f32[1,128], index: 8, kind: input, shape index: {}]   ;;  %s7467_s9 = inlined_call_operand.hbm [shape: f32[1,128], index: 9, kind: input, shape index: {}]   ;;  %s7468_s10 = inlined_call_operand.hbm [shape: f32[1,128], index: 10, kind: input, shape index: {}]   ;;  %s7469_s11 = inlined_call_operand.hbm [shape: bf16[128,128], index: 11, kind: input, shape index: {}]   ;;  %s7470_s12 = inlined_call_operand.hbm [shape: bf16[128,128], index: 12, kind: input, shape index: {}]   ;;  %s7471_s13 = inlined_call_operand.hbm [shape: bf16[128,128], index: 13, kind: input, shape index: {}]   ;;  %s7472_s14 = inlined_call_operand.hbm [shape: f32[1,128], index: 14, kind: input, shape index: {}]   ;;  %s7473_s15 = inlined_call_operand.hbm [shape: f32[1,128], index: 15, kind: input, shape index: {}]   ;;  %s7474_s16 = inlined_call_operand.hbm [shape: f32[1,128], index: 16, kind: input, shape index: {}]   ;;  %s7475_s17 = inlined_call_operand.vmem [shape: bf16[128,128], index: 17, kind: input, shape index: {}]   ;;  %s7476_s18 = inlined_call_operand.hbm [shape: f32[1,128], index: 18, kind: input, shape index: {}]   ;;  %s7477_s19 = inlined_call_operand.hbm [shape: bf16[128,512], index: 19, kind: input, shape index: {}]   ;;  %s7478_s20 = inlined_call_operand.vmem [shape: f32[1,512], index: 20, kind: input, shape index: {}]   ;;  %s7479_s21 = inlined_call_operand.hbm [shape: bf16[128,512], index: 21, kind: input, shape index: {}]   ;;  %s7480_s22 = inlined_call_operand.vmem [shape: f32[1,512], index: 22, kind: input, shape index: {}]   ;;  %s7481_s23 = inlined_call_operand.hbm [shape: bf16[512,128], index: 23, kind: input, shape index: {}]   ;;  %s7482_s24 = inlined_call_operand.hbm [shape: bf16[512,128], index: 24, kind: input, shape index: {}]   ;;  %s7483_s25 = inlined_call_operand.vmem [shape: f32[1,128], index: 25, kind: input, shape index: {}]   ;;  %s7484_s26 = inlined_call_operand.hbm [shape: f32[8,128], index: 26, kind: output, shape index: {}]  }
   0x1   :  { %7499 = sst [smem:[#allocation51_spill]] %s7458_s0 }
   0x2   :  { %7500 = sst [smem:[#allocation52_spill]] %s7459_s1 }
   0x3   :  { %7501 = sst [smem:[#allocation53_spill]] %s7460_s2 }
   0x4   :  { %7502 = sst [smem:[#allocation54_spill]] %s7461_s3 }
   0x5   :  { %7503 = sst [smem:[#allocation55_spill]] %s7462_s4 }
   0x6   :  { %7504 = sst [smem:[#allocation56_spill]] %s7463_s5 }
   0x7   :  { %7505 = sst [smem:[#allocation57_spill]] %s7464_s6 }
   0x8   :  { %7506 = sst [smem:[#allocation58_spill]] %s7465_s7 }
   0x9   :  { %7507 = sst [smem:[#allocation59_spill]] %s7466_s8 }
   0xa   :  { %7508 = sst [smem:[#allocation60_spill]] %s7467_s9 }
   0xb   :  { %7509 = sst [smem:[#allocation61_spill]] %s7468_s10 }
   0xc   :  { %7510 = sst [smem:[#allocation62_spill]] %s7478_s20 }
   0xd   :  { %7511 = sst [smem:[#allocation63_spill]] %s7483_s25 }
   0xe   :  { %7512 = sst [smem:[#allocation64_spill]] %s7484_s26 }
   0xf   :  { %31 = vsyncpa [#allocation3], 0 }
  0x10   :  { %32 = vsyncpa [#allocation6], 0 }
  0x11   :  { %33 = vsyncpa [#allocation9], 0 }
  0x12   :  { %34 = vsyncpa [#allocation12], 0 }
  0x13   :  { %35 = vsyncpa [#allocation15], 0 }
  0x14   :  { %36 = vsyncpa [#allocation18], 0 }
  0x15   :  { %37 = vsyncpa [#allocation21], 0 }
  0x16   :  { %38 = vsyncpa [#allocation24], 0 }
  0x17   :  { %39 = vsyncpa [#allocation27], 0 }
  0x18   :  { %40 = vsyncpa [#allocation30], 0 }
  0x19   :  { %41 = vsyncpa [#allocation33], 0 }
  0x1a   :  { %42 = vsyncpa [#allocation36], 0 }
  0x1b   :  { %43 = vsyncpa [#allocation4], 0  ;;  %s6534_s27 = smov [#allocation5]   ;;  %s6535_s7 = smov [#allocation8]  }
  0x1c   :  { %s61_s3 = sshll.u32 %s6534_s27, 4  ;;  %s83_s28 = sshll.u32 %s6535_s7, 4  ;;  %s62_s3 = int_to_ptr.vmem [resolvable:$true] %s61_s3  ;;  %s6703_s28 = int_to_ptr.vmem [resolvable:$true] %s83_s28 }
  0x1d   :  { %s7513_s29 = sld [smem:[#allocation52_spill]] }
  0x23   :  { %s6002_s0 = scalar_lea.hbm %s7513_s29, 1024 }
  0x24   :  { %p6003_p0 = scmp.ne.s32.totalorder %s7513_s29, %s6002_s0  ;;  %p6006_p1 = scmp.lt.u32.totalorder %s6002_s0, %s7513_s29 }
  0x26   :  { %p6008_p2 = pnand %p6006_p1, %p6003_p0 }
  0x28   :  { %6011 = shalt.err (!%p6008_p2)
}
  0x29   :  { %s6012_s10 = scalar_lea.vmem %s62_s3, 1024  ;;  %p6017_p4 = scmp.lt.s32.totalorder %s62_s3, %s62_s3 }
  0x2a   :  { %p6013_p3 = scmp.ne.s32.totalorder %s62_s3, %s6012_s10  ;;  %p6018_p5 = scmp.lt.s32.totalorder %s6012_s10, %s6012_s10 }
  0x2c   :  { %p6019_p6 = por %p6018_p5, %p6017_p4 }
  0x2e   :  { %p6020_p7 = pnand %p6019_p6, %p6013_p3 }
  0x30   :  { %6023 = shalt.err (!%p6020_p7)
}
  0x31   :  { %s7497_s6 = smov 128   ;;  %s7498_s1 = smov 8  }
  0x32   :  { %67 = dma.hbm_to_vmem [thread:$0]  %s7513_s29, 1024, %s62_s3, [#allocation6], %s7497_s6, %s7497_s6, %s7498_s1  }
  0x33   :  { %s7514_s0 = sld [smem:[#allocation54_spill]] }
  0x39   :  { %s6024_s9 = scalar_lea.hbm %s7514_s0, 1024 }
  0x3a   :  { %p6025_p8 = scmp.ne.s32.totalorder %s7514_s0, %s6024_s9  ;;  %p6028_p9 = scmp.lt.u32.totalorder %s6024_s9, %s7514_s0 }
  0x3c   :  { %p6030_p10 = pnand %p6028_p9, %p6025_p8 }
  0x3e   :  { %6033 = shalt.err (!%p6030_p10)
}
  0x3f   :  { %s6034_s26 = scalar_lea.vmem %s6703_s28, 1024  ;;  %p6039_p12 = scmp.lt.s32.totalorder %s6703_s28, %s6703_s28 }
  0x40   :  { %p6035_p11 = scmp.ne.s32.totalorder %s6703_s28, %s6034_s26  ;;  %p6040_p13 = scmp.lt.s32.totalorder %s6034_s26, %s6034_s26 }
  0x42   :  { %p6041_p0 = por %p6040_p13, %p6039_p12 }
  0x44   :  { %p6042_p1 = pnand %p6041_p0, %p6035_p11 }
  0x46   :  { %6045 = shalt.err (!%p6042_p1)
}
  0x47   :  { %s6538_s3 = smov 64   ;;  %s6539_s29 = smov 4  }
  0x48   :  { %89 = dma.hbm_to_vmem [thread:$0]  %s7514_s0, 1024, %s6703_s28, [#allocation9], %s6538_s3, %s6538_s3, %s6539_s29  }
  0x49   :  { %s6540_s8 = smov [#allocation11]   ;;  %s6541_s9 = smov [#allocation14]  }
  0x4a   :  { %s105_s4 = sshll.u32 %s6540_s8, 4  ;;  %s129_s30 = sshll.u32 %s6541_s9, 4  ;;  %s106_s4 = int_to_ptr.vmem [resolvable:$true] %s105_s4  ;;  %s6740_s30 = int_to_ptr.vmem [resolvable:$true] %s129_s30 }
  0x4b   :  { %s7515_s5 = sld [smem:[#allocation56_spill]] }
  0x51   :  { %s6046_s10 = scalar_lea.hbm %s7515_s5, 1024 }
  0x52   :  { %p6047_p2 = scmp.ne.s32.totalorder %s7515_s5, %s6046_s10  ;;  %p6050_p3 = scmp.lt.u32.totalorder %s6046_s10, %s7515_s5 }
  0x54   :  { %p6052_p4 = pnand %p6050_p3, %p6047_p2 }
  0x56   :  { %6055 = shalt.err (!%p6052_p4)
}
  0x57   :  { %s6056_s28 = scalar_lea.vmem %s106_s4, 1024  ;;  %p6061_p6 = scmp.lt.s32.totalorder %s106_s4, %s106_s4 }
  0x58   :  { %p6057_p5 = scmp.ne.s32.totalorder %s106_s4, %s6056_s28  ;;  %p6062_p7 = scmp.lt.s32.totalorder %s6056_s28, %s6056_s28 }
  0x5a   :  { %p6063_p8 = por %p6062_p7, %p6061_p6 }
  0x5c   :  { %p6064_p9 = pnand %p6063_p8, %p6057_p5 }
  0x5e   :  { %6067 = shalt.err (!%p6064_p9)
}
  0x5f   :  { %111 = dma.hbm_to_vmem [thread:$0]  %s7515_s5, 1024, %s106_s4, [#allocation12], %s6538_s3, %s6538_s3, %s6539_s29  }
  0x60   :  { %s7516_s20 = sld [smem:[#allocation58_spill]] }
  0x66   :  { %s6068_s25 = scalar_lea.hbm %s7516_s20, 1024 }
  0x67   :  { %p6069_p10 = scmp.ne.s32.totalorder %s7516_s20, %s6068_s25  ;;  %p6072_p11 = scmp.lt.u32.totalorder %s6068_s25, %s7516_s20 }
  0x69   :  { %p6074_p12 = pnand %p6072_p11, %p6069_p10 }
  0x6b   :  { %6077 = shalt.err (!%p6074_p12)
}
  0x6c   :  { %s6078_s2 = scalar_lea.vmem %s6740_s30, 1024  ;;  %p6083_p0 = scmp.lt.s32.totalorder %s6740_s30, %s6740_s30 }
  0x6d   :  { %p6079_p13 = scmp.ne.s32.totalorder %s6740_s30, %s6078_s2  ;;  %p6084_p1 = scmp.lt.s32.totalorder %s6078_s2, %s6078_s2 }
  0x6f   :  { %p6085_p2 = por %p6084_p1, %p6083_p0 }
  0x71   :  { %p6086_p3 = pnand %p6085_p2, %p6079_p13 }
  0x73   :  { %6089 = shalt.err (!%p6086_p3)
}
  0x74   :  { %135 = dma.hbm_to_vmem [thread:$0]  %s7516_s20, 1024, %s6740_s30, [#allocation15], %s6538_s3, %s6538_s3, %s6539_s29  }
  0x75   :  { %s6542_s10 = smov [#allocation17]   ;;  %s6543_s0 = smov [#allocation20]  }
  0x76   :  { %s152_s28 = sshll.u32 %s6542_s10, 4  ;;  %s171_s27 = sshll.u32 %s6543_s0, 4  ;;  %s153_s28 = int_to_ptr.vmem [resolvable:$true] %s152_s28  ;;  %s6777_s27 = int_to_ptr.vmem [resolvable:$true] %s171_s27 }
  0x77   :  { %s7517_s25 = sld [smem:[#allocation60_spill]] }
  0x7d   :  { %s6090_s7 = scalar_lea.hbm %s7517_s25, 16 }
  0x7e   :  { %p6091_p4 = scmp.ne.s32.totalorder %s7517_s25, %s6090_s7  ;;  %p6094_p5 = scmp.lt.u32.totalorder %s6090_s7, %s7517_s25 }
  0x80   :  { %p6096_p6 = pnand %p6094_p5, %p6091_p4 }
  0x82   :  { %6099 = shalt.err (!%p6096_p6)
}
  0x83   :  { %s6100_s30 = scalar_lea.vmem %s153_s28, 16  ;;  %s6104_s20 = scalar_lea.vmem %s153_s28, 32 }
  0x84   :  { %p6101_p7 = scmp.ne.s32.totalorder %s153_s28, %s6100_s30  ;;  %p6105_p8 = scmp.lt.s32.totalorder %s153_s28, %s153_s28 }
  0x85   :  { %p6106_p9 = scmp.lt.s32.totalorder %s6104_s20, %s6100_s30 }
  0x87   :  { %p6107_p10 = por %p6106_p9, %p6105_p8 }
  0x89   :  { %p6108_p11 = pnand %p6107_p10, %p6101_p7 }
  0x8b   :  { %6111 = shalt.err (!%p6108_p11)
}
  0x8c   :  { %155 = dma.hbm_to_vmem [thread:$0]  %s7517_s25, 16, %s153_s28, [#allocation18]  }
  0x8d   :  { %s6112_s6 = scalar_lea.hbm %s7469_s11, 1024 }
  0x8e   :  { %p6113_p12 = scmp.ne.s32.totalorder %s7469_s11, %s6112_s6  ;;  %p6116_p13 = scmp.lt.u32.totalorder %s6112_s6, %s7469_s11 }
  0x90   :  { %p6118_p0 = pnand %p6116_p13, %p6113_p12 }
  0x92   :  { %6121 = shalt.err (!%p6118_p0)
}
  0x93   :  { %s6122_s26 = scalar_lea.vmem %s6777_s27, 1024  ;;  %p6127_p2 = scmp.lt.s32.totalorder %s6777_s27, %s6777_s27 }
  0x94   :  { %p6123_p1 = scmp.ne.s32.totalorder %s6777_s27, %s6122_s26  ;;  %p6128_p3 = scmp.lt.s32.totalorder %s6122_s26, %s6122_s26 }
  0x96   :  { %p6129_p4 = por %p6128_p3, %p6127_p2 }
  0x98   :  { %p6130_p5 = pnand %p6129_p4, %p6123_p1 }
  0x9a   :  { %6133 = shalt.err (!%p6130_p5)
}
  0x9b   :  { %177 = dma.hbm_to_vmem [thread:$0]  %s7469_s11, 1024, %s6777_s27, [#allocation21], %s6538_s3, %s6538_s3, %s6539_s29  }
  0x9c   :  { %s6544_s2 = smov [#allocation23]   ;;  %s6545_s20 = smov [#allocation26]  }
  0x9d   :  { %s195_s30 = sshll.u32 %s6544_s2, 4  ;;  %s218_s4 = sshll.u32 %s6545_s20, 4  ;;  %s196_s30 = int_to_ptr.vmem [resolvable:$true] %s195_s30  ;;  %s219_s4 = int_to_ptr.vmem [resolvable:$true] %s218_s4 }
  0x9e   :  { %s6134_s0 = scalar_lea.hbm %s7471_s13, 1024 }
  0x9f   :  { %p6135_p6 = scmp.ne.s32.totalorder %s7471_s13, %s6134_s0  ;;  %p6138_p7 = scmp.lt.u32.totalorder %s6134_s0, %s7471_s13 }
  0xa1   :  { %p6140_p8 = pnand %p6138_p7, %p6135_p6 }
  0xa3   :  { %6143 = shalt.err (!%p6140_p8)
}
  0xa4   :  { %s6144_s11 = scalar_lea.vmem %s196_s30, 1024  ;;  %p6149_p10 = scmp.lt.s32.totalorder %s196_s30, %s196_s30 }
  0xa5   :  { %p6145_p9 = scmp.ne.s32.totalorder %s196_s30, %s6144_s11  ;;  %p6150_p11 = scmp.lt.s32.totalorder %s6144_s11, %s6144_s11 }
  0xa7   :  { %p6151_p12 = por %p6150_p11, %p6149_p10 }
  0xa9   :  { %p6152_p13 = pnand %p6151_p12, %p6145_p9 }
  0xab   :  { %6155 = shalt.err (!%p6152_p13)
}
  0xac   :  { %201 = dma.hbm_to_vmem [thread:$0]  %s7471_s13, 1024, %s196_s30, [#allocation24], %s6538_s3, %s6538_s3, %s6539_s29  }
  0xad   :  { %s6156_s25 = scalar_lea.hbm %s7473_s15, 16 }
  0xae   :  { %p6157_p0 = scmp.ne.s32.totalorder %s7473_s15, %s6156_s25  ;;  %p6160_p1 = scmp.lt.u32.totalorder %s6156_s25, %s7473_s15 }
  0xb0   :  { %p6162_p2 = pnand %p6160_p1, %p6157_p0 }
  0xb2   :  { %6165 = shalt.err (!%p6162_p2)
}
  0xb3   :  { %s6166_s0 = scalar_lea.vmem %s219_s4, 16  ;;  %s6170_s6 = scalar_lea.vmem %s219_s4, 32 }
  0xb4   :  { %p6167_p3 = scmp.ne.s32.totalorder %s219_s4, %s6166_s0  ;;  %p6171_p4 = scmp.lt.s32.totalorder %s219_s4, %s219_s4 }
  0xb5   :  { %p6172_p5 = scmp.lt.s32.totalorder %s6170_s6, %s6166_s0 }
  0xb7   :  { %p6173_p6 = por %p6172_p5, %p6171_p4 }
  0xb9   :  { %p6174_p7 = pnand %p6173_p6, %p6167_p3 }
  0xbb   :  { %6177 = shalt.err (!%p6174_p7)
}
  0xbc   :  { %221 = dma.hbm_to_vmem [thread:$0]  %s7473_s15, 16, %s219_s4, [#allocation27]  }
  0xbd   :  { %s6546_s1 = smov [#allocation29]   ;;  %s6178_s27 = scalar_lea.hbm %s7476_s18, 16 }
  0xbe   :  { %s240_s7 = sshll.u32 %s6546_s1, 4  ;;  %p6179_p8 = scmp.ne.s32.totalorder %s7476_s18, %s6178_s27  ;;  %s241_s7 = int_to_ptr.vmem [resolvable:$true] %s240_s7 }
  0xbf   :  { %p6182_p9 = scmp.lt.u32.totalorder %s6178_s27, %s7476_s18 }
  0xc1   :  { %p6184_p10 = pnand %p6182_p9, %p6179_p8 }
  0xc3   :  { %6187 = shalt.err (!%p6184_p10)
}
  0xc4   :  { %s6188_s2 = scalar_lea.vmem %s241_s7, 16  ;;  %s6192_s15 = scalar_lea.vmem %s241_s7, 32 }
  0xc5   :  { %p6189_p11 = scmp.ne.s32.totalorder %s241_s7, %s6188_s2  ;;  %p6193_p12 = scmp.lt.s32.totalorder %s241_s7, %s241_s7 }
  0xc6   :  { %p6194_p13 = scmp.lt.s32.totalorder %s6192_s15, %s6188_s2 }
  0xc8   :  { %p6195_p0 = por %p6194_p13, %p6193_p12 }
  0xca   :  { %p6196_p1 = pnand %p6195_p0, %p6189_p11 }
  0xcc   :  { %6199 = shalt.err (!%p6196_p1)
}
  0xcd   :  { %243 = dma.hbm_to_vmem [thread:$0]  %s7476_s18, 16, %s241_s7, [#allocation30]  }
  0xce   :  { %s6547_s5 = smov [#allocation32]   ;;  %s6548_s0 = smov [#allocation2]  }
  0xcf   :  { %s263_s10 = sshll.u32 %s6547_s5, 4  ;;  %s49_s6 = sshll.u32 %s6548_s0, 4  ;;  %s264_s10 = int_to_ptr.vmem [resolvable:$true] %s263_s10  ;;  %s50_s6 = int_to_ptr.vmem [resolvable:$true] %s49_s6 }
  0xd0   :  { %s6200_s1 = scalar_lea.hbm %s7479_s21, 4096 }
  0xd1   :  { %p6201_p2 = scmp.ne.s32.totalorder %s7479_s21, %s6200_s1  ;;  %p6204_p3 = scmp.lt.u32.totalorder %s6200_s1, %s7479_s21 }
  0xd3   :  { %p6206_p4 = pnand %p6204_p3, %p6201_p2 }
  0xd5   :  { %6209 = shalt.err (!%p6206_p4)
}
  0xd6   :  { %s6210_s18 = scalar_lea.vmem %s264_s10, 4096  ;;  %p6215_p6 = scmp.lt.s32.totalorder %s264_s10, %s264_s10 }
  0xd7   :  { %p6211_p5 = scmp.ne.s32.totalorder %s264_s10, %s6210_s18  ;;  %p6216_p7 = scmp.lt.s32.totalorder %s6210_s18, %s6210_s18 }
  0xd9   :  { %p6217_p8 = por %p6216_p7, %p6215_p6 }
  0xdb   :  { %p6218_p9 = pnand %p6217_p8, %p6211_p5 }
  0xdd   :  { %6221 = shalt.err (!%p6218_p9)
}
  0xde   :  { %s6549_s7 = smov 256   ;;  %s6550_s26 = smov 16  }
  0xdf   :  { %269 = dma.hbm_to_vmem [thread:$0]  %s7479_s21, 4096, %s264_s10, [#allocation33], %s6549_s7, %s6549_s7, %s6550_s26  }
  0xe0   :  { %s7518_s4 = sld [smem:[#allocation51_spill]] }
  0xe6   :  { %s6222_s20 = scalar_lea.hbm %s7518_s4, 2048 }
  0xe7   :  { %p6223_p10 = scmp.ne.s32.totalorder %s7518_s4, %s6222_s20  ;;  %p6226_p11 = scmp.lt.u32.totalorder %s6222_s20, %s7518_s4 }
  0xe9   :  { %p6228_p12 = pnand %p6226_p11, %p6223_p10 }
  0xeb   :  { %6231 = shalt.err (!%p6228_p12)
}
  0xec   :  { %s6232_s1 = scalar_lea.vmem %s50_s6, 2048  ;;  %p6237_p0 = scmp.lt.s32.totalorder %s50_s6, %s50_s6 }
  0xed   :  { %p6233_p13 = scmp.ne.s32.totalorder %s50_s6, %s6232_s1  ;;  %p6238_p1 = scmp.lt.s32.totalorder %s6232_s1, %s6232_s1 }
  0xef   :  { %p6239_p2 = por %p6238_p1, %p6237_p0 }
  0xf1   :  { %p6240_p3 = pnand %p6239_p2, %p6233_p13 }
  0xf3   :  { %6243 = shalt.err (!%p6240_p3)
}
  0xf4   :  { %s7519_s21 = smov 8   ;;  %s7520_s10 = smov 128  }
  0xf5   :  { %55 = dma.hbm_to_vmem [thread:$0]  %s7518_s4, 2048, %s50_s6, [#allocation3], %s7520_s10, %s7520_s10, %s7519_s21  }
  0xf6   :  { %s6551_s27 = smov [#allocation7]   ;;  %s6552_s18 = smov [#allocation10]  }
  0xf7   :  { %s74_s9 = sshll.u32 %s6551_s27, 4  ;;  %s96_s28 = sshll.u32 %s6552_s18, 4  ;;  %s75_s9 = int_to_ptr.vmem [resolvable:$true] %s74_s9  ;;  %s97_s28 = int_to_ptr.vmem [resolvable:$true] %s96_s28 }
  0xf8   :  { %s7521_s15 = sld [smem:[#allocation53_spill]] }
  0xfe   :  { %s6244_s20 = scalar_lea.hbm %s7521_s15, 128 }
  0xff   :  { %p6245_p4 = scmp.ne.s32.totalorder %s7521_s15, %s6244_s20  ;;  %p6248_p5 = scmp.lt.u32.totalorder %s6244_s20, %s7521_s15 }
 0x101   :  { %p6250_p6 = pnand %p6248_p5, %p6245_p4 }
 0x103   :  { %6253 = shalt.err (!%p6250_p6)
}
 0x104   :  { %s6254_s6 = scalar_lea.vmem %s75_s9, 128  ;;  %p6259_p8 = scmp.lt.s32.totalorder %s75_s9, %s75_s9 }
 0x105   :  { %p6255_p7 = scmp.ne.s32.totalorder %s75_s9, %s6254_s6  ;;  %p6260_p9 = scmp.lt.s32.totalorder %s6254_s6, %s6254_s6 }
 0x107   :  { %p6261_p10 = por %p6260_p9, %p6259_p8 }
 0x109   :  { %p6262_p11 = pnand %p6261_p10, %p6255_p7 }
 0x10b   :  { %6265 = shalt.err (!%p6262_p11)
}
 0x10c   :  { %77 = dma.hbm_to_vmem [thread:$0]  %s7521_s15, 128, %s75_s9, [#allocation6]  }
 0x10d   :  { %s7522_s8 = sld [smem:[#allocation55_spill]] }
 0x113   :  { %s6266_s11 = scalar_lea.hbm %s7522_s8, 16 }
 0x114   :  { %p6267_p12 = scmp.ne.s32.totalorder %s7522_s8, %s6266_s11  ;;  %p6270_p13 = scmp.lt.u32.totalorder %s6266_s11, %s7522_s8 }
 0x116   :  { %p6272_p0 = pnand %p6270_p13, %p6267_p12 }
 0x118   :  { %6275 = shalt.err (!%p6272_p0)
}
 0x119   :  { %s6276_s20 = scalar_lea.vmem %s97_s28, 16  ;;  %s6280_s5 = scalar_lea.vmem %s97_s28, 32 }
 0x11a   :  { %p6277_p1 = scmp.ne.s32.totalorder %s97_s28, %s6276_s20  ;;  %p6281_p2 = scmp.lt.s32.totalorder %s97_s28, %s97_s28 }
 0x11b   :  { %p6282_p3 = scmp.lt.s32.totalorder %s6280_s5, %s6276_s20 }
 0x11d   :  { %p6283_p4 = por %p6282_p3, %p6281_p2 }
 0x11f   :  { %p6284_p5 = pnand %p6283_p4, %p6277_p1 }
 0x121   :  { %6287 = shalt.err (!%p6284_p5)
}
 0x122   :  { %99 = dma.hbm_to_vmem [thread:$0]  %s7522_s8, 16, %s97_s28, [#allocation9]  }
 0x123   :  { %s6553_s0 = smov [#allocation13]   ;;  %s6554_s30 = smov [#allocation16]  }
 0x124   :  { %s117_s13 = sshll.u32 %s6553_s0, 4  ;;  %s142_s6 = sshll.u32 %s6554_s30, 4  ;;  %s118_s13 = int_to_ptr.vmem [resolvable:$true] %s117_s13  ;;  %s143_s6 = int_to_ptr.vmem [resolvable:$true] %s142_s6 }
 0x125   :  { %s7523_s21 = sld [smem:[#allocation57_spill]] }
 0x12b   :  { %s6288_s10 = scalar_lea.hbm %s7523_s21, 1024 }
 0x12c   :  { %p6289_p6 = scmp.ne.s32.totalorder %s7523_s21, %s6288_s10  ;;  %p6292_p7 = scmp.lt.u32.totalorder %s6288_s10, %s7523_s21 }
 0x12e   :  { %p6294_p8 = pnand %p6292_p7, %p6289_p6 }
 0x130   :  { %6297 = shalt.err (!%p6294_p8)
}
 0x131   :  { %s6298_s28 = scalar_lea.vmem %s118_s13, 1024  ;;  %p6303_p10 = scmp.lt.s32.totalorder %s118_s13, %s118_s13 }
 0x132   :  { %p6299_p9 = scmp.ne.s32.totalorder %s118_s13, %s6298_s28  ;;  %p6304_p11 = scmp.lt.s32.totalorder %s6298_s28, %s6298_s28 }
 0x134   :  { %p6305_p12 = por %p6304_p11, %p6303_p10 }
 0x136   :  { %p6306_p13 = pnand %p6305_p12, %p6299_p9 }
 0x138   :  { %6309 = shalt.err (!%p6306_p13)
}
 0x139   :  { %123 = dma.hbm_to_vmem [thread:$0]  %s7523_s21, 1024, %s118_s13, [#allocation12], %s6538_s3, %s6538_s3, %s6539_s29  }
 0x13a   :  { %s7524_s9 = sld [smem:[#allocation59_spill]] }
 0x140   :  { %s6310_s15 = scalar_lea.hbm %s7524_s9, 16 }
 0x141   :  { %p6311_p0 = scmp.ne.s32.totalorder %s7524_s9, %s6310_s15  ;;  %p6314_p1 = scmp.lt.u32.totalorder %s6310_s15, %s7524_s9 }
 0x143   :  { %p6316_p2 = pnand %p6314_p1, %p6311_p0 }
 0x145   :  { %6319 = shalt.err (!%p6316_p2)
}
 0x146   :  { %s6320_s10 = scalar_lea.vmem %s143_s6, 16  ;;  %s6324_s11 = scalar_lea.vmem %s143_s6, 32 }
 0x147   :  { %p6321_p3 = scmp.ne.s32.totalorder %s143_s6, %s6320_s10  ;;  %p6325_p4 = scmp.lt.s32.totalorder %s143_s6, %s143_s6 }
 0x148   :  { %p6326_p5 = scmp.lt.s32.totalorder %s6324_s11, %s6320_s10 }
 0x14a   :  { %p6327_p6 = por %p6326_p5, %p6325_p4 }
 0x14c   :  { %p6328_p7 = pnand %p6327_p6, %p6321_p3 }
 0x14e   :  { %6331 = shalt.err (!%p6328_p7)
}
 0x14f   :  { %145 = dma.hbm_to_vmem [thread:$0]  %s7524_s9, 16, %s143_s6, [#allocation15]  }
 0x150   :  { %s6555_s27 = smov [#allocation19]   ;;  %s6556_s25 = smov [#allocation22]  }
 0x151   :  { %s162_s18 = sshll.u32 %s6555_s27, 4  ;;  %s183_s28 = sshll.u32 %s6556_s25, 4  ;;  %s163_s18 = int_to_ptr.vmem [resolvable:$true] %s162_s18  ;;  %s184_s28 = int_to_ptr.vmem [resolvable:$true] %s183_s28 }
 0x152   :  { %s7525_s20 = sld [smem:[#allocation61_spill]] }
 0x158   :  { %s6332_s5 = scalar_lea.hbm %s7525_s20, 16 }
 0x159   :  { %p6333_p8 = scmp.ne.s32.totalorder %s7525_s20, %s6332_s5  ;;  %p6336_p9 = scmp.lt.u32.totalorder %s6332_s5, %s7525_s20 }
 0x15b   :  { %p6338_p10 = pnand %p6336_p9, %p6333_p8 }
 0x15d   :  { %6341 = shalt.err (!%p6338_p10)
}
 0x15e   :  { %s6342_s6 = scalar_lea.vmem %s163_s18, 16  ;;  %s6346_s9 = scalar_lea.vmem %s163_s18, 32 }
 0x15f   :  { %p6343_p11 = scmp.ne.s32.totalorder %s163_s18, %s6342_s6  ;;  %p6347_p12 = scmp.lt.s32.totalorder %s163_s18, %s163_s18 }
 0x160   :  { %p6348_p13 = scmp.lt.s32.totalorder %s6346_s9, %s6342_s6 }
 0x162   :  { %p6349_p0 = por %p6348_p13, %p6347_p12 }
 0x164   :  { %p6350_p1 = pnand %p6349_p0, %p6343_p11 }
 0x166   :  { %6353 = shalt.err (!%p6350_p1)
}
 0x167   :  { %165 = dma.hbm_to_vmem [thread:$0]  %s7525_s20, 16, %s163_s18, [#allocation18]  }
 0x168   :  { %s6354_s21 = scalar_lea.hbm %s7470_s12, 1024 }
 0x169   :  { %p6355_p2 = scmp.ne.s32.totalorder %s7470_s12, %s6354_s21  ;;  %p6358_p3 = scmp.lt.u32.totalorder %s6354_s21, %s7470_s12 }
 0x16b   :  { %p6360_p4 = pnand %p6358_p3, %p6355_p2 }
 0x16d   :  { %6363 = shalt.err (!%p6360_p4)
}
 0x16e   :  { %s6364_s5 = scalar_lea.vmem %s184_s28, 1024  ;;  %p6369_p6 = scmp.lt.s32.totalorder %s184_s28, %s184_s28 }
 0x16f   :  { %p6365_p5 = scmp.ne.s32.totalorder %s184_s28, %s6364_s5  ;;  %p6370_p7 = scmp.lt.s32.totalorder %s6364_s5, %s6364_s5 }
 0x171   :  { %p6371_p8 = por %p6370_p7, %p6369_p6 }
 0x173   :  { %p6372_p9 = pnand %p6371_p8, %p6365_p5 }
 0x175   :  { %6375 = shalt.err (!%p6372_p9)
}
 0x176   :  { %189 = dma.hbm_to_vmem [thread:$0]  %s7470_s12, 1024, %s184_s28, [#allocation21], %s6538_s3, %s6538_s3, %s6539_s29  }
 0x177   :  { %s6557_s15 = smov [#allocation25]   ;;  %s6558_s30 = smov [#allocation28]  }
 0x178   :  { %s208_s0 = sshll.u32 %s6557_s15, 4  ;;  %s228_s4 = sshll.u32 %s6558_s30, 4  ;;  %s209_s0 = int_to_ptr.vmem [resolvable:$true] %s208_s0  ;;  %s229_s4 = int_to_ptr.vmem [resolvable:$true] %s228_s4 }
 0x179   :  { %s6376_s1 = scalar_lea.hbm %s7472_s14, 16 }
 0x17a   :  { %p6377_p10 = scmp.ne.s32.totalorder %s7472_s14, %s6376_s1  ;;  %p6380_p11 = scmp.lt.u32.totalorder %s6376_s1, %s7472_s14 }
 0x17c   :  { %p6382_p12 = pnand %p6380_p11, %p6377_p10 }
 0x17e   :  { %6385 = shalt.err (!%p6382_p12)
}
 0x17f   :  { %s6386_s12 = scalar_lea.vmem %s209_s0, 16  ;;  %s6390_s28 = scalar_lea.vmem %s209_s0, 32 }
 0x180   :  { %p6387_p13 = scmp.ne.s32.totalorder %s209_s0, %s6386_s12  ;;  %p6391_p0 = scmp.lt.s32.totalorder %s209_s0, %s209_s0 }
 0x181   :  { %p6392_p1 = scmp.lt.s32.totalorder %s6390_s28, %s6386_s12 }
 0x183   :  { %p6393_p2 = por %p6392_p1, %p6391_p0 }
 0x185   :  { %p6394_p3 = pnand %p6393_p2, %p6387_p13 }
 0x187   :  { %6397 = shalt.err (!%p6394_p3)
}
 0x188   :  { %211 = dma.hbm_to_vmem [thread:$0]  %s7472_s14, 16, %s209_s0, [#allocation24]  }
 0x189   :  { %s6398_s5 = scalar_lea.hbm %s7474_s16, 16 }
 0x18a   :  { %p6399_p4 = scmp.ne.s32.totalorder %s7474_s16, %s6398_s5  ;;  %p6402_p5 = scmp.lt.u32.totalorder %s6398_s5, %s7474_s16 }
 0x18c   :  { %p6404_p6 = pnand %p6402_p5, %p6399_p4 }
 0x18e   :  { %6407 = shalt.err (!%p6404_p6)
}
 0x18f   :  { %s6408_s6 = scalar_lea.vmem %s229_s4, 16  ;;  %s6412_s9 = scalar_lea.vmem %s229_s4, 32 }
 0x190   :  { %p6409_p7 = scmp.ne.s32.totalorder %s229_s4, %s6408_s6  ;;  %p6413_p8 = scmp.lt.s32.totalorder %s229_s4, %s229_s4 }
 0x191   :  { %p6414_p9 = scmp.lt.s32.totalorder %s6412_s9, %s6408_s6 }
 0x193   :  { %p6415_p10 = por %p6414_p9, %p6413_p8 }
 0x195   :  { %p6416_p11 = pnand %p6415_p10, %p6409_p7 }
 0x197   :  { %6419 = shalt.err (!%p6416_p11)
}
 0x198   :  { %231 = dma.hbm_to_vmem [thread:$0]  %s7474_s16, 16, %s229_s4, [#allocation27]  }
 0x199   :  { %s6559_s1 = smov [#allocation31]   ;;  %s6560_s11 = smov [#allocation34]  }
 0x19a   :  { %s249_s10 = sshll.u32 %s6559_s1, 4  ;;  %s277_s13 = sshll.u32 %s6560_s11, 4  ;;  %s250_s10 = int_to_ptr.vmem [resolvable:$true] %s249_s10  ;;  %s278_s13 = int_to_ptr.vmem [resolvable:$true] %s277_s13 }
 0x19b   :  { %s6420_s28 = scalar_lea.hbm %s7477_s19, 4096 }
 0x19c   :  { %p6421_p12 = scmp.ne.s32.totalorder %s7477_s19, %s6420_s28  ;;  %p6424_p13 = scmp.lt.u32.totalorder %s6420_s28, %s7477_s19 }
 0x19e   :  { %p6426_p0 = pnand %p6424_p13, %p6421_p12 }
 0x1a0   :  { %6429 = shalt.err (!%p6426_p0)
}
 0x1a1   :  { %s6430_s16 = scalar_lea.vmem %s250_s10, 4096  ;;  %p6435_p2 = scmp.lt.s32.totalorder %s250_s10, %s250_s10 }
 0x1a2   :  { %p6431_p1 = scmp.ne.s32.totalorder %s250_s10, %s6430_s16  ;;  %p6436_p3 = scmp.lt.s32.totalorder %s6430_s16, %s6430_s16 }
 0x1a4   :  { %p6437_p4 = por %p6436_p3, %p6435_p2 }
 0x1a6   :  { %p6438_p5 = pnand %p6437_p4, %p6431_p1 }
 0x1a8   :  { %6441 = shalt.err (!%p6438_p5)
}
 0x1a9   :  { %255 = dma.hbm_to_vmem [thread:$0]  %s7477_s19, 4096, %s250_s10, [#allocation30], %s6549_s7, %s6549_s7, %s6550_s26  }
 0x1aa   :  { %s6442_s15 = scalar_lea.hbm %s7481_s23, 4096 }
 0x1ab   :  { %p6443_p6 = scmp.ne.s32.totalorder %s7481_s23, %s6442_s15  ;;  %p6446_p7 = scmp.lt.u32.totalorder %s6442_s15, %s7481_s23 }
 0x1ad   :  { %p6448_p8 = pnand %p6446_p7, %p6443_p6 }
 0x1af   :  { %6451 = shalt.err (!%p6448_p8)
}
 0x1b0   :  { %s6452_s0 = scalar_lea.vmem %s278_s13, 4096  ;;  %p6457_p10 = scmp.lt.s32.totalorder %s278_s13, %s278_s13 }
 0x1b1   :  { %p6453_p9 = scmp.ne.s32.totalorder %s278_s13, %s6452_s0  ;;  %p6458_p11 = scmp.lt.s32.totalorder %s6452_s0, %s6452_s0 }
 0x1b3   :  { %p6459_p12 = por %p6458_p11, %p6457_p10 }
 0x1b5   :  { %p6460_p13 = pnand %p6459_p12, %p6453_p9 }
 0x1b7   :  { %6463 = shalt.err (!%p6460_p13)
}
 0x1b8   :  { %283 = dma.hbm_to_vmem [thread:$0]  %s7481_s23, 4096, %s278_s13, [#allocation33], %s6538_s3, %s6538_s3, %s6539_s29  }
 0x1b9   :  { %s6561_s26 = smov [#allocation35]   ;;  %s6464_s21 = scalar_lea.hbm %s7482_s24, 4096 }
 0x1ba   :  { %s289_s1 = sshll.u32 %s6561_s26, 4  ;;  %p6465_p0 = scmp.ne.s32.totalorder %s7482_s24, %s6464_s21  ;;  %s290_s1 = int_to_ptr.vmem [resolvable:$true] %s289_s1 }
 0x1bb   :  { %p6468_p1 = scmp.lt.u32.totalorder %s6464_s21, %s7482_s24 }
 0x1bd   :  { %p6470_p2 = pnand %p6468_p1, %p6465_p0 }
 0x1bf   :  { %6473 = shalt.err (!%p6470_p2)
}
 0x1c0   :  { %s6474_s8 = scalar_lea.vmem %s290_s1, 4096  ;;  %p6479_p4 = scmp.lt.s32.totalorder %s290_s1, %s290_s1 }
 0x1c1   :  { %p6475_p3 = scmp.ne.s32.totalorder %s290_s1, %s6474_s8  ;;  %p6480_p5 = scmp.lt.s32.totalorder %s6474_s8, %s6474_s8 }
 0x1c3   :  { %p6481_p6 = por %p6480_p5, %p6479_p4 }
 0x1c5   :  { %p6482_p7 = pnand %p6481_p6, %p6475_p3 }
 0x1c7   :  { %6485 = shalt.err (!%p6482_p7)
}
 0x1c8   :  { %295 = dma.hbm_to_vmem [thread:$0]  %s7482_s24, 4096, %s290_s1, [#allocation36], %s6538_s3, %s6538_s3, %s6539_s29  }
 0x1c9   :  { %6508 = dma.done.wait [#allocation3], 2048  }
 0x1ca   :  { %6509 = vsyncadd [#allocation3], 4294965248 }
 0x1cb   :  { %6510 = dma.done.wait [#allocation6], 1152  }
 0x1cc   :  { %6511 = vsyncadd [#allocation6], 4294966144 }
 0x1cd   :  { %6512 = dma.done.wait [#allocation9], 1040  }
 0x1ce   :  { %6513 = vsyncadd [#allocation9], 4294966256 }
 0x1cf   :  { %6514 = dma.done.wait [#allocation12], 2048  }
 0x1d0   :  { %6515 = vsyncadd [#allocation12], 4294965248 }
 0x1d1   :  { %6516 = dma.done.wait [#allocation15], 1040  }
 0x1d2   :  { %6517 = vsyncadd [#allocation15], 4294966256 }
 0x1d3   :  { %6518 = dma.done.wait [#allocation18], 32  }
 0x1d4   :  { %6519 = vsyncadd [#allocation18], 4294967264 }
 0x1d5   :  { %6520 = dma.done.wait [#allocation21], 2048  }
 0x1d6   :  { %6521 = vsyncadd [#allocation21], 4294965248 }
 0x1d7   :  { %6522 = dma.done.wait [#allocation24], 1040  }
 0x1d8   :  { %6523 = vsyncadd [#allocation24], 4294966256 }
 0x1d9   :  { %6524 = dma.done.wait [#allocation27], 32  }
 0x1da   :  { %6525 = vsyncadd [#allocation27], 4294967264 }
 0x1db   :  { %6526 = dma.done.wait [#allocation30], 4112  }
 0x1dc   :  { %6527 = vsyncadd [#allocation30], 4294963184 }
 0x1dd   :  { %6528 = dma.done.wait [#allocation33], 8192  }
 0x1de   :  { %6529 = vsyncadd [#allocation33], 4294959104 }
 0x1df   :  { %6530 = dma.done.wait [#allocation36], 4096  }
 0x1e0   :  { %6531 = vsyncadd [#allocation36], 4294963200  ;;  %v5714_v0 = vld [vmem:[#allocation8] sm:$0xff]   ;;  %v5715_v1 = vld [vmem:[#allocation8 + $0x8] sm:$0xff]   ;;  %v6562_v33 = vmov 0.0   ;;  %vm6563_vm0 = vmmov 0  }
 0x1e1   :  { %5292 = vmatprep.subr.bf16.mxu0 %v5714_v0  ;;  %v5716_v2 = vld [vmem:[#allocation8 + $0x10] sm:$0xff]   ;;  %v5717_v3 = vld [vmem:[#allocation8 + $0x18] sm:$0xff]   ;;  %v366_v5 = vld [vmem:[#allocation2 + $0x8] sm:$0xff]  ;;  %5324 = vmatprep.subr.bf16.mxu1 %v6562_v33  ;;  %vm685_vm1 = vcmask 1041409   ;;  %vm687_vm2 = vcmask 1042434   ;;  %vm689_vm3 = vcmask 1043459  }
 0x1e2   :  { %5293 = vmatpush3.bf16.msra.mxu0 %v5714_v0  ;;  %v365_v4 = vld [vmem:[#allocation2] sm:$0xff]  ;;  %v5718_v7 = vld [vmem:[#allocation8 + $0x20] sm:$0xff]   ;;  %v5719_v8 = vld [vmem:[#allocation8 + $0x28] sm:$0xff]   ;;  %5340 = vmatprep.mubr.msk.bf16.mxu1 %vm6563_vm0, %v6562_v33  ;;  %vm691_vm4 = vcmask 1044484   ;;  %vm693_vm5 = vcmask 1045509   ;;  %vm695_vm6 = vcmask 1046534  }
 0x1e3   :  { %5294 = vmatprep.subr.bf16.mxu0 %v5715_v1  ;;  %v381_v6 = vpack.c.bf16 %v366_v5, %v365_v4  ;;  %v5720_v9 = vld [vmem:[#allocation8 + $0x30] sm:$0xff]   ;;  %v5721_v10 = vld [vmem:[#allocation8 + $0x38] sm:$0xff]   ;;  %v367_v11 = vld [vmem:[#allocation2 + $0x10] sm:$0xff]  ;;  %vm697_vm7 = vcmask 1047559   ;;  %vm2087_vm8 = vcmask 1043456   ;;  %vm1979_vm10 = vcmask 64512  }
 0x1e4   :  { %v368_v12 = vld [vmem:[#allocation2 + $0x18] sm:$0xff]  ;;  %v369_v13 = vld [vmem:[#allocation2 + $0x20] sm:$0xff]  ;;  %v370_v14 = vld [vmem:[#allocation2 + $0x28] sm:$0xff]  ;;  %s7526_s10 = sld [smem:[#allocation62_spill]]  ;;  %s7527_s21 = sld [smem:[#allocation63_spill]] }
 0x1e5   :  { %5308 = vmatprep.mubr.bf16.mxu0 %v381_v6  ;;  %v382_v15 = vpack.c.bf16 %v368_v12, %v367_v11  ;;  %v383_v16 = vpack.c.bf16 %v370_v14, %v369_v13  ;;  %v371_v17 = vld [vmem:[#allocation2 + $0x30] sm:$0xff]  ;;  %v372_v18 = vld [vmem:[#allocation2 + $0x38] sm:$0xff]  ;;  %v373_v19 = vld [vmem:[#allocation2 + $0x40] sm:$0xff]  ;;  %s6567_s12 = smov [#allocation37]  }
 0x1e6   :  { %5295 = vmatpush3.bf16.msra.mxu0 %v5715_v1  ;;  %v374_v20 = vld [vmem:[#allocation2 + $0x48] sm:$0xff]  ;;  %v384_v21 = vpack.c.bf16 %v372_v18, %v371_v17  ;;  %v375_v23 = vld [vmem:[#allocation2 + $0x50] sm:$0xff]  ;;  %v376_v24 = vld [vmem:[#allocation2 + $0x58] sm:$0xff]  ;;  %s4790_s28 = sshll.u32 %s6567_s12, 4  ;;  %s4791_s28 = int_to_ptr.vmem [resolvable:$true] %s4790_s28 }
 0x1e7   :  { %5296 = vmatprep.subr.bf16.mxu0 %v5716_v2  ;;  %v385_v22 = vpack.c.bf16 %v374_v20, %v373_v19  ;;  %v377_v25 = vld [vmem:[#allocation2 + $0x60] sm:$0xff]  ;;  %v378_v26 = vld [vmem:[#allocation2 + $0x68] sm:$0xff]  ;;  %v386_v27 = vpack.c.bf16 %v376_v24, %v375_v23  ;;  %v379_v29 = vld [vmem:[#allocation2 + $0x70] sm:$0xff]  ;;  %s6486_s27 = scalar_lea.vmem %s4791_s28, 128  ;;  %p6491_p9 = scmp.lt.s32.totalorder %s4791_s28, %s4791_s28 }
 0x1e8   :  { %v387_v28 = vpack.c.bf16 %v378_v26, %v377_v25  ;;  %v380_v30 = vld [vmem:[#allocation2 + $0x78] sm:$0xff]  ;;  %v5722_v32 = vld [vmem:[%s7475_s17] sm:$0xff]   ;;  %v5723_v34 = vld [vmem:[%s7475_s17 + $0x8] sm:$0xff]   ;;  %p6487_p8 = scmp.ne.s32.totalorder %s4791_s28, %s6486_s27  ;;  %p6492_p10 = scmp.lt.s32.totalorder %s6486_s27, %s6486_s27 }
 0x1e9   :  { %v388_v31 = vpack.c.bf16 %v380_v30, %v379_v29  ;;  %5325 = vmatpush3.bf16.msra.mxu1 %v5722_v32  ;;  %v5724_v35 = vld [vmem:[%s7475_s17 + $0x10] sm:$0xff]   ;;  %v5725_v36 = vld [vmem:[%s7475_s17 + $0x18] sm:$0xff]   ;;  %v5726_v37 = vld [vmem:[%s7475_s17 + $0x20] sm:$0xff]  }
 0x1ea   :  { %5297 = vmatpush3.bf16.msra.mxu0 %v5716_v2  ;;  %5326 = vmatprep.subr.bf16.mxu1 %v6562_v33  ;;  %v5727_v38 = vld [vmem:[%s7475_s17 + $0x28] sm:$0xff]   ;;  %v5728_v39 = vld [vmem:[%s7475_s17 + $0x30] sm:$0xff]   ;;  %v5729_v40 = vld [vmem:[%s7475_s17 + $0x38] sm:$0xff]   ;;  %p6493_p11 = por %p6492_p10, %p6491_p9 }
 0x1eb   :  { %5298 = vmatprep.subr.bf16.mxu0 %v5717_v3  ;;  %v5732_v41 = vld [vmem:[#allocation31 + $0xc] ss:$16 sps:$4 sm:$0xff]   ;;  %v5733_v42 = vld [vmem:[#allocation31] ss:$16 sps:$4 sm:$0xff]   ;;  %v5735_v43 = vld [vmem:[#allocation31 + $0x4] ss:$16 sps:$4 sm:$0xff]  }
 0x1ec   :  { %v5741_v44 = vld [vmem:[#allocation31 + $0x24] ss:$16 sps:$4 sm:$0xff]   ;;  %v5739_v45 = vld [vmem:[#allocation31 + $0x20] ss:$16 sps:$4 sm:$0xff]   ;;  %p6494_p12 = pnand %p6493_p11, %p6487_p8 }
 0x1ed   :  { %5327 = vmatpush3.bf16.msra.mxu1 %v5723_v34  ;;  %v5747_v46 = vld [vmem:[#allocation31 + $0x44] ss:$16 sps:$4 sm:$0xff]   ;;  %v5745_v47 = vld [vmem:[#allocation31 + $0x40] ss:$16 sps:$4 sm:$0xff]  }
 0x1ee   :  { %5299 = vmatpush3.bf16.msra.mxu0 %v5717_v3  ;;  %5328 = vmatprep.subr.bf16.mxu1 %v6562_v33  ;;  %v5753_v48 = vld [vmem:[#allocation31 + $0x64] ss:$16 sps:$4 sm:$0xff]   ;;  %v5751_v49 = vld [vmem:[#allocation31 + $0x60] ss:$16 sps:$4 sm:$0xff]  }
 0x1ef   :  { %5300 = vmatprep.subr.bf16.mxu0 %v5718_v7  ;;  %v5759_v50 = vld [vmem:[#allocation31 + $0x84] ss:$16 sps:$4 sm:$0xff]   ;;  %v5757_v51 = vld [vmem:[#allocation31 + $0x80] ss:$16 sps:$4 sm:$0xff]  }
 0x1f0   :  { %v5765_v52 = vld [vmem:[#allocation31 + $0xa4] ss:$16 sps:$4 sm:$0xff]   ;;  %v5763_v53 = vld [vmem:[#allocation31 + $0xa0] ss:$16 sps:$4 sm:$0xff]  }
 0x1f1   :  { %5329 = vmatpush3.bf16.msra.mxu1 %v5724_v35  ;;  %v5771_v54 = vld [vmem:[#allocation31 + $0xc4] ss:$16 sps:$4 sm:$0xff]   ;;  %v5769_v55 = vld [vmem:[#allocation31 + $0xc0] ss:$16 sps:$4 sm:$0xff]  }
 0x1f2   :  { %5301 = vmatpush3.bf16.msra.mxu0 %v5718_v7  ;;  %5330 = vmatprep.subr.bf16.mxu1 %v6562_v33  ;;  %v7061_v56 = vld [vmem:[#allocation10] ss:$0 sm:$0xff] }
 0x1f3   :  { %5302 = vmatprep.subr.bf16.mxu0 %v5719_v8 }
 0x1f5   :  { %5331 = vmatpush3.bf16.msra.mxu1 %v5725_v36 }
 0x1f6   :  { %5303 = vmatpush3.bf16.msra.mxu0 %v5719_v8  ;;  %5332 = vmatprep.subr.bf16.mxu1 %v6562_v33 }
 0x1f7   :  { %5304 = vmatprep.subr.bf16.mxu0 %v5720_v9 }
 0x1f9   :  { %5333 = vmatpush3.bf16.msra.mxu1 %v5726_v37 }
 0x1fa   :  { %5305 = vmatpush3.bf16.msra.mxu0 %v5720_v9  ;;  %5334 = vmatprep.subr.bf16.mxu1 %v6562_v33 }
 0x1fb   :  { %5306 = vmatprep.subr.bf16.mxu0 %v5721_v10 }
 0x1fd   :  { %5335 = vmatpush3.bf16.msra.mxu1 %v5727_v38 }
 0x1fe   :  { %5307 = vmatpush3.bf16.msra.mxu0 %v5721_v10  ;;  %5336 = vmatprep.subr.bf16.mxu1 %v6562_v33 }
 0x1ff   :  { %1004 = vmatprep.subr.bf16.mxu0 %v5735_v43 }
 0x201   :  { %5309 = vmatmul.mubr.bf16.vlgmr.msra.gmra.mrb[0].mxu0 %v382_v15  ;;  %5337 = vmatpush3.bf16.msra.mxu1 %v5728_v39 }
 0x202   :  { %5312 = vmatprep.mubr.bf16.mxu0 %v383_v16  ;;  %5338 = vmatprep.subr.bf16.mxu1 %v6562_v33 }
 0x203   :  { %1005 = vmatpush1.bf16.msra.mxu0 %v5733_v42 }
 0x204   :  { %1006 = vmatprep.subr.bf16.mxu0 %v5741_v44 }
 0x205   :  { %5339 = vmatpush3.bf16.msra.mxu1 %v5729_v40 }
 0x206   :  { %1045 = vmatprep.subr.bf16.mxu1 %v5732_v41 }
 0x207   :  { %1007 = vmatpush1.bf16.msra.mxu0 %v5739_v45 }
 0x208   :  { %1008 = vmatprep.subr.bf16.mxu0 %v5747_v46 }
 0x209   :  { %5313 = vmatmul.mubr.bf16.gmra.mrb[4].mxu0 %v384_v21 }
 0x20a   :  { %5316 = vmatprep.mubr.bf16.mxu0 %v385_v22 }
 0x20b   :  { %1009 = vmatpush1.bf16.msra.mxu0 %v5745_v47 }
 0x20c   :  { %1010 = vmatprep.subr.bf16.mxu0 %v5753_v48 }
 0x20f   :  { %1011 = vmatpush1.bf16.msra.mxu0 %v5751_v49 }
 0x210   :  { %1012 = vmatprep.subr.bf16.mxu0 %v5759_v50 }
 0x211   :  { %5317 = vmatmul.mubr.bf16.gmra.mrb[8].mxu0 %v386_v27 }
 0x212   :  { %5320 = vmatprep.mubr.bf16.mxu0 %v387_v28 }
 0x213   :  { %1013 = vmatpush1.bf16.msra.mxu0 %v5757_v51 }
 0x214   :  { %1014 = vmatprep.subr.bf16.mxu0 %v5765_v52 }
 0x217   :  { %1015 = vmatpush1.bf16.msra.mxu0 %v5763_v53 }
 0x218   :  { %1016 = vmatprep.subr.bf16.mxu0 %v5771_v54 }
 0x219   :  { %5321 = vmatmul.mubr.bf16.gmra.mrb[12].mxu0 %v388_v31 }
 0x21b   :  { %1017 = vmatpush1.bf16.msra.mxu0 %v5769_v55 }
 0x2d4   :  { %v5310_v57 = vpop.f32.mrb[0].mxu0 }
 0x2d5   :  { %v503_v58 = vadd.f32 %v5310_v57, %v7061_v56  ;;  %v494_v59 = vpop.f32.mrb[1].mxu0 }
 0x2d6   :  { %v495_v60 = vadd.f32 %v7061_v56, %v494_v59  ;;  %v5311_v61 = vpop.f32.mrb[2].mxu0 }
 0x2d7   :  { %v506_v62 = vadd.f32 %v5311_v61, %v7061_v56  ;;  %v497_v63 = vpop.f32.mrb[3].mxu0  ;;  %v559_v1 = vmax.f32 %v503_v58, 0.0 }
 0x2d8   :  { %v498_v0 = vadd.f32 %v7061_v56, %v497_v63  ;;  %v557_v3 = vmax.f32 %v495_v60, 0.0 }
 0x2d9   :  { %v560_v2 = vmax.f32 %v506_v62, 0.0 }
 0x2da   :  { %v558_v4 = vmax.f32 %v498_v0, 0.0 }
 0x2db   :  { %v580_v5 = vadd.f32 %v560_v2, %v559_v1 }
 0x2dc   :  { %v573_v6 = vadd.f32 %v558_v4, %v557_v3  ;;  %v5314_v7 = vpop.f32.mrb[4].mxu0 }
 0x2dd   :  { %v581_v8 = vrot.slane %v580_v5, 4  ;;  %v519_v9 = vadd.f32 %v5314_v7, %v7061_v56  ;;  %v510_v10 = vpop.f32.mrb[5].mxu0 }
 0x2de   :  { %v574_v11 = vrot.slane %v573_v6, 4  ;;  %v511_v12 = vadd.f32 %v7061_v56, %v510_v10  ;;  %v5315_v13 = vpop.f32.mrb[6].mxu0 }
 0x2df   :  { %v582_v14 = vadd.f32 %v581_v8, %v580_v5  ;;  %v522_v15 = vadd.f32 %v5315_v13, %v7061_v56  ;;  %v513_v16 = vpop.f32.mrb[7].mxu0  ;;  %v563_v20 = vmax.f32 %v519_v9, 0.0 }
 0x2e0   :  { %v575_v17 = vadd.f32 %v574_v11, %v573_v6  ;;  %v514_v18 = vadd.f32 %v7061_v56, %v513_v16  ;;  %v561_v23 = vmax.f32 %v511_v12, 0.0 }
 0x2e1   :  { %v583_v19 = vrot.slane %v582_v14, 2  ;;  %v564_v21 = vmax.f32 %v522_v15, 0.0 }
 0x2e2   :  { %v576_v22 = vrot.slane %v575_v17, 2  ;;  %v562_v24 = vmax.f32 %v514_v18, 0.0 }
 0x2e3   :  { %v584_v25 = vadd.f32 %v583_v19, %v582_v14  ;;  %v594_v26 = vadd.f32 %v564_v21, %v563_v20 }
 0x2e4   :  { %v577_v27 = vadd.f32 %v576_v22, %v575_v17  ;;  %v587_v28 = vadd.f32 %v562_v24, %v561_v23  ;;  %v5318_v29 = vpop.f32.mrb[8].mxu0 }
 0x2e5   :  { %v585_v30 = vrot.slane %v584_v25, 1  ;;  %v595_v31 = vrot.slane %v594_v26, 4  ;;  %v535_v32 = vadd.f32 %v5318_v29, %v7061_v56  ;;  %v526_v34 = vpop.f32.mrb[9].mxu0 }
 0x2e6   :  { %v578_v35 = vrot.slane %v577_v27, 1  ;;  %v588_v36 = vrot.slane %v587_v28, 4  ;;  %v527_v37 = vadd.f32 %v7061_v56, %v526_v34  ;;  %v5319_v38 = vpop.f32.mrb[10].mxu0 }
 0x2e7   :  { %v586_v39 = vadd.f32 %v585_v30, %v584_v25  ;;  %v596_v40 = vadd.f32 %v595_v31, %v594_v26  ;;  %v538_v41 = vadd.f32 %v5319_v38, %v7061_v56  ;;  %v529_v42 = vpop.f32.mrb[11].mxu0  ;;  %v567_v48 = vmax.f32 %v535_v32, 0.0 }
 0x2e8   :  { %v579_v43 = vadd.f32 %v578_v35, %v577_v27  ;;  %v589_v44 = vadd.f32 %v588_v36, %v587_v28  ;;  %v530_v45 = vadd.f32 %v7061_v56, %v529_v42  ;;  %v565_v52 = vmax.f32 %v527_v37, 0.0 }
 0x2e9   :  { %v631_v46 = vmul.f32 0.0625, %v586_v39  ;;  %v597_v47 = vrot.slane %v596_v40, 2  ;;  %v568_v49 = vmax.f32 %v538_v41, 0.0 }
 0x2ea   :  { %v630_v50 = vmul.f32 0.0625, %v579_v43  ;;  %v590_v51 = vrot.slane %v589_v44, 2  ;;  %v566_v53 = vmax.f32 %v530_v45, 0.0 }
 0x2eb   :  { %v639_v54 = vpack.c.bf16 %v631_v46, %v631_v46  ;;  %v598_v55 = vadd.f32 %v597_v47, %v596_v40  ;;  %v608_v57 = vadd.f32 %v568_v49, %v567_v48 }
 0x2ec   :  { %v638_v58 = vpack.c.bf16 %v630_v50, %v630_v50  ;;  %v591_v59 = vadd.f32 %v590_v51, %v589_v44  ;;  %v601_v60 = vadd.f32 %v566_v53, %v565_v52  ;;  %v5322_v61 = vpop.f32.mrb[12].mxu0 }
 0x2ed   :  { %v678_v62 = vunpack.c.l.b16 %v639_v54  ;;  %v599_v63 = vrot.slane %v598_v55, 1  ;;  %v609_v0 = vrot.slane %v608_v57, 4  ;;  %v551_v1 = vadd.f32 %v5322_v61, %v7061_v56  ;;  %v542_v2 = vpop.f32.mrb[13].mxu0 }
 0x2ee   :  { %v677_v3 = vunpack.c.l.b16 %v638_v58  ;;  %v592_v4 = vrot.slane %v591_v59, 1  ;;  %v602_v5 = vrot.slane %v601_v60, 4  ;;  %v543_v6 = vadd.f32 %v7061_v56, %v542_v2  ;;  %v5323_v7 = vpop.f32.mrb[14].mxu0 }
 0x2ef   :  { %v600_v8 = vadd.f32 %v599_v63, %v598_v55  ;;  %v610_v9 = vadd.f32 %v609_v0, %v608_v57  ;;  %v554_v10 = vadd.f32 %v5323_v7, %v7061_v56  ;;  %v545_v11 = vpop.f32.mrb[15].mxu0  ;;  %v571_v15 = vmax.f32 %v551_v1, 0.0  ;;  %v5744_v7 = vld [vmem:[#allocation31 + $0x4c] ss:$16 sps:$4 sm:$0xff]  }
 0x2f0   :  { %v686_v12 = vsel %vm685_vm1, %v678_v62, %v677_v3  ;;  %v593_v13 = vadd.f32 %v592_v4, %v591_v59  ;;  %v603_v14 = vadd.f32 %v602_v5, %v601_v60  ;;  %v546_v19 = vadd.f32 %v7061_v56, %v545_v11  ;;  %v5730_v3 = vld [vmem:[#allocation31 + $0x8] ss:$16 sps:$4 sm:$0xff]   ;;  %v5738_v5 = vld [vmem:[#allocation31 + $0x2c] ss:$16 sps:$4 sm:$0xff]  }
 0x2f1   :  { %v633_v16 = vmul.f32 0.0625, %v600_v8  ;;  %v611_v17 = vrot.slane %v610_v9, 2  ;;  %v572_v18 = vmax.f32 %v554_v10, 0.0  ;;  %v569_v22 = vmax.f32 %v543_v6, 0.0  ;;  %v5736_v6 = vld [vmem:[#allocation31 + $0x28] ss:$16 sps:$4 sm:$0xff]  }
 0x2f2   :  { %v632_v20 = vmul.f32 0.0625, %v593_v13  ;;  %v604_v21 = vrot.slane %v603_v14, 2  ;;  %v570_v26 = vmax.f32 %v546_v19, 0.0  ;;  %v5742_v8 = vld [vmem:[#allocation31 + $0x48] ss:$16 sps:$4 sm:$0xff]  }
 0x2f3   :  { %v641_v23 = vpack.c.bf16 %v633_v16, %v633_v16  ;;  %v612_v24 = vadd.f32 %v611_v17, %v610_v9  ;;  %v622_v25 = vadd.f32 %v572_v18, %v571_v15  ;;  %v5750_v9 = vld [vmem:[#allocation31 + $0x6c] ss:$16 sps:$4 sm:$0xff]   ;;  %v5748_v10 = vld [vmem:[#allocation31 + $0x68] ss:$16 sps:$4 sm:$0xff]   ;;  %v5777_v19 = vld [vmem:[#allocation31 + $0xe4] ss:$16 sps:$4 sm:$0xff]  }
 0x2f4   :  { %v640_v27 = vpack.c.bf16 %v632_v20, %v632_v20  ;;  %v605_v28 = vadd.f32 %v604_v21, %v603_v14  ;;  %v615_v31 = vadd.f32 %v570_v26, %v569_v22  ;;  %v5756_v11 = vld [vmem:[#allocation31 + $0x8c] ss:$16 sps:$4 sm:$0xff]   ;;  %v5760_v14 = vld [vmem:[#allocation31 + $0xa8] ss:$16 sps:$4 sm:$0xff]   ;;  %v5775_v20 = vld [vmem:[#allocation31 + $0xe0] ss:$16 sps:$4 sm:$0xff]   ;;  %1018 = vmatprep.subr.bf16.mxu0 %v5777_v19 }
 0x2f5   :  { %v613_v29 = vrot.slane %v612_v24, 1  ;;  %v623_v30 = vrot.slane %v622_v25, 4  ;;  %v680_v35 = vunpack.c.l.b16 %v641_v23  ;;  %v5762_v13 = vld [vmem:[#allocation31 + $0xac] ss:$16 sps:$4 sm:$0xff]   ;;  %v5766_v16 = vld [vmem:[#allocation31 + $0xc8] ss:$16 sps:$4 sm:$0xff]   ;;  %1019 = vmatpush1.bf16.msra.mxu0 %v5775_v20 }
 0x2f6   :  { %v679_v32 = vunpack.c.l.b16 %v640_v27  ;;  %v606_v34 = vrot.slane %v605_v28, 1  ;;  %v616_v56 = vrot.slane %v615_v31, 4  ;;  %v5768_v15 = vld [vmem:[#allocation31 + $0xcc] ss:$16 sps:$4 sm:$0xff]   ;;  %v5772_v18 = vld [vmem:[#allocation31 + $0xe8] ss:$16 sps:$4 sm:$0xff]  }
 0x2f7   :  { %v614_v36 = vadd.f32 %v613_v29, %v612_v24  ;;  %v624_v37 = vadd.f32 %v623_v30, %v622_v25  ;;  %v5774_v17 = vld [vmem:[#allocation31 + $0xec] ss:$16 sps:$4 sm:$0xff]   ;;  %v5778_v21 = vld [vmem:[#allocation13] sm:$0xff]   ;;  %v6564_v22 = vmov 0  }
 0x2f8   :  { %v688_v38 = vsel %vm687_vm2, %v679_v32, %v686_v12  ;;  %v607_v39 = vadd.f32 %v606_v34, %v605_v28  ;;  %v617_v42 = vadd.f32 %v616_v56, %v615_v31  ;;  %v5754_v12 = vld [vmem:[#allocation31 + $0x88] ss:$16 sps:$4 sm:$0xff]   ;;  %1036 = vmatprep.mubr.bf16.mxu0 %v6564_v22  ;;  %v4819_v24 = vld [vmem:[#allocation29] ss:$0 sm:$0xff]  ;;  %v1087_v29 = vld [vmem:[#allocation5 + $0x8] sm:$0xff] }
 0x2f9   :  { %v635_v40 = vmul.f32 0.0625, %v614_v36  ;;  %v625_v41 = vrot.slane %v624_v37, 2  ;;  %v690_v43 = vsel %vm689_vm3, %v680_v35, %v688_v38  ;;  %v5779_v23 = vld [vmem:[#allocation11] sm:$0xff]   ;;  %v1086_v28 = vld [vmem:[#allocation5] sm:$0xff]  ;;  %v5780_v34 = vld [vmem:[#allocation13 + $0x8] sm:$0xff]  }
 0x2fa   :  { %v634_v44 = vmul.f32 0.0625, %v607_v39  ;;  %v618_v47 = vrot.slane %v617_v42, 2  ;;  %5344 = vmatprep.subr.bf16.mxu0 %v5779_v23  ;;  %v5781_v35 = vld [vmem:[#allocation11 + $0x8] sm:$0xff]   ;;  %v5035_v36 = vpack.c.bf16 %v1087_v29, %v1086_v28  ;;  %v5783_v56 = vld [vmem:[#allocation11 + $0x10] sm:$0xff]   ;;  %v5784_v38 = vld [vmem:[#allocation13 + $0x18] sm:$0xff]  }
 0x2fb   :  { %v643_v45 = vpack.c.bf16 %v635_v40, %v635_v40  ;;  %v626_v46 = vadd.f32 %v625_v41, %v624_v37  ;;  %v5782_v37 = vld [vmem:[#allocation13 + $0x10] sm:$0xff]   ;;  %v5785_v39 = vld [vmem:[#allocation11 + $0x18] sm:$0xff]   ;;  %v5786_v40 = vld [vmem:[#allocation13 + $0x20] sm:$0xff]  }
 0x2fc   :  { %v642_v48 = vpack.c.bf16 %v634_v44, %v634_v44  ;;  %v619_v50 = vadd.f32 %v618_v47, %v617_v42  ;;  %v5787_v41 = vld [vmem:[#allocation11 + $0x20] sm:$0xff]   ;;  %v5788_v42 = vld [vmem:[#allocation13 + $0x28] sm:$0xff]   ;;  %v5790_v44 = vld [vmem:[#allocation13 + $0x30] sm:$0xff]  }
 0x2fd   :  { %v627_v49 = vrot.slane %v626_v46, 1  ;;  %v682_v52 = vunpack.c.l.b16 %v643_v45  ;;  %v5791_v45 = vld [vmem:[#allocation11 + $0x30] sm:$0xff]   ;;  %v5793_v47 = vld [vmem:[#allocation11 + $0x38] sm:$0xff]  }
 0x2fe   :  { %v681_v51 = vunpack.c.l.b16 %v642_v48  ;;  %v620_v54 = vrot.slane %v619_v50, 1  ;;  %v1088_v48 = vld [vmem:[#allocation5 + $0x10] sm:$0xff] }
 0x2ff   :  { %v628_v53 = vadd.f32 %v627_v49, %v626_v46  ;;  %v5792_v46 = vld [vmem:[#allocation13 + $0x38] sm:$0xff]   ;;  %v1089_v49 = vld [vmem:[#allocation5 + $0x18] sm:$0xff] }
 0x300   :  { %v692_v55 = vsel %vm691_vm4, %v681_v51, %v690_v43  ;;  %v621_v58 = vadd.f32 %v620_v54, %v619_v50  ;;  %v5789_v43 = vld [vmem:[#allocation11 + $0x28] sm:$0xff]   ;;  %v1090_v50 = vld [vmem:[#allocation5 + $0x20] sm:$0xff]  ;;  %v1091_v51 = vld [vmem:[#allocation5 + $0x28] sm:$0xff] }
 0x301   :  { %v637_v57 = vmul.f32 0.0625, %v628_v53  ;;  %v694_v59 = vsel %vm693_vm5, %v682_v52, %v692_v55  ;;  %v5036_v52 = vpack.c.bf16 %v1089_v49, %v1088_v48  ;;  %v5037_v53 = vpack.c.bf16 %v1091_v51, %v1090_v50  ;;  %v1092_v54 = vld [vmem:[#allocation5 + $0x30] sm:$0xff]  ;;  %v1093_v55 = vld [vmem:[#allocation5 + $0x38] sm:$0xff] }
 0x302   :  { %v636_v60 = vmul.f32 0.0625, %v621_v58  ;;  %v5794_v58 = vld [vmem:[#allocation14] sm:$0xff]  }
 0x303   :  { %v645_v61 = vpack.c.bf16 %v637_v57, %v637_v57  ;;  %v5038_v57 = vpack.c.bf16 %v1093_v55, %v1092_v54 }
 0x304   :  { %v644_v62 = vpack.c.bf16 %v636_v60, %v636_v60  ;;  %v5796_v60 = vld [vmem:[#allocation14 + $0x10] sm:$0xff]  }
 0x305   :  { %v684_v0 = vunpack.c.l.b16 %v645_v61  ;;  %v5797_v61 = vld [vmem:[#allocation14 + $0x18] sm:$0xff]  }
 0x306   :  { %v683_v63 = vunpack.c.l.b16 %v644_v62  ;;  %v5798_v62 = vld [vmem:[#allocation14 + $0x20] sm:$0xff]  }
 0x308   :  { %v696_v1 = vsel %vm695_vm6, %v683_v63, %v694_v59  ;;  %v5795_v59 = vld [vmem:[#allocation14 + $0x8] sm:$0xff]  }
 0x309   :  { %v698_v2 = vsel %vm697_vm7, %v684_v0, %v696_v1  ;;  %v5799_v63 = vld [vmem:[#allocation14 + $0x28] sm:$0xff]   ;;  %v5800_v0 = vld [vmem:[#allocation14 + $0x30] sm:$0xff]   ;;  %v5801_v1 = vld [vmem:[#allocation14 + $0x38] sm:$0xff]  }
 0x30a   :  { %v699_v4 = vpack.c.b16 %v698_v2, %v698_v2 }
 0x30c   :  { %5341 = vmatmul.mubr.bf16.vlgmr.msra.gmra.mrb[0].mxu1 %v699_v4 }
 0x30d   :  { %1046 = vmatpush1.bf16.msra.mxu1 %v5730_v3  ;;  %1077 = vmatprep.mubr.bf16.mxu1 %v6564_v22 }
 0x30e   :  { %1047 = vmatprep.subr.bf16.mxu1 %v5738_v5 }
 0x311   :  { %1048 = vmatpush1.bf16.msra.mxu1 %v5736_v6 }
 0x312   :  { %1049 = vmatprep.subr.bf16.mxu1 %v5744_v7 }
 0x315   :  { %1050 = vmatpush1.bf16.msra.mxu1 %v5742_v8 }
 0x316   :  { %1051 = vmatprep.subr.bf16.mxu1 %v5750_v9 }
 0x319   :  { %1052 = vmatpush1.bf16.msra.mxu1 %v5748_v10  ;;  %v7102_v10 = vld [vmem:[#allocation17] ss:$0 sm:$0xff] }
 0x31a   :  { %1053 = vmatprep.subr.bf16.mxu1 %v5756_v11 }
 0x31d   :  { %1054 = vmatpush1.bf16.msra.mxu1 %v5754_v12 }
 0x31e   :  { %1055 = vmatprep.subr.bf16.mxu1 %v5762_v13 }
 0x321   :  { %1056 = vmatpush1.bf16.msra.mxu1 %v5760_v14 }
 0x322   :  { %1057 = vmatprep.subr.bf16.mxu1 %v5768_v15 }
 0x325   :  { %1058 = vmatpush1.bf16.msra.mxu1 %v5766_v16 }
 0x326   :  { %1059 = vmatprep.subr.bf16.mxu1 %v5774_v17  ;;  %v7105_v17 = vld [vmem:[#allocation16] ss:$0 sm:$0xff] }
 0x329   :  { %1060 = vmatpush1.bf16.msra.mxu1 %v5772_v18 }
 0x32a   :  { %5368 = vmatprep.subr.bf16.mxu1 %v5778_v21 }
 0x3df   :  { %v783_v25 = vpop.f32.mrb[0].mxu1 }
 0x3e0   :  { %v784_v26 = vadd.f32 %v4819_v24, %v783_v25  ;;  %v5342_v27 = vpop.f32.mrb[1].mxu1 }
 0x3e1   :  { %v786_v30 = vpop.f32.mrb[2].mxu1 }
 0x3e2   :  { %v789_v31 = vpack.c.bf16 %v784_v26, %v784_v26  ;;  %v5343_v32 = vpop.f32.mrb[3].mxu1 }
 0x3e4   :  { %1037 = vmatmul.mubr.bf16.vlgmr.msra.gmra.mrb[16].mxu0 %v789_v31  ;;  %1078 = vmatmul.mubr.bf16.vlgmr.msra.gmra.mrb[4].mxu1 %v789_v31 }
 0x3e5   :  { %5369 = vmatpush3.bf16.msra.mxu1 %v5778_v21  ;;  %5345 = vmatpush3.bf16.msra.mxu0 %v5779_v23 }
 0x3e6   :  { %5370 = vmatprep.subr.bf16.mxu1 %v5780_v34  ;;  %5346 = vmatprep.subr.bf16.mxu0 %v5781_v35 }
 0x3e7   :  { %5384 = vmatprep.mubr.bf16.mxu1 %v5035_v36  ;;  %5360 = vmatprep.mubr.bf16.mxu0 %v5035_v36 }
 0x3e9   :  { %5371 = vmatpush3.bf16.msra.mxu1 %v5780_v34  ;;  %5347 = vmatpush3.bf16.msra.mxu0 %v5781_v35 }
 0x3ea   :  { %5372 = vmatprep.subr.bf16.mxu1 %v5782_v37  ;;  %5348 = vmatprep.subr.bf16.mxu0 %v5783_v56 }
 0x3ed   :  { %5373 = vmatpush3.bf16.msra.mxu1 %v5782_v37  ;;  %5349 = vmatpush3.bf16.msra.mxu0 %v5783_v56 }
 0x3ee   :  { %5374 = vmatprep.subr.bf16.mxu1 %v5784_v38  ;;  %5350 = vmatprep.subr.bf16.mxu0 %v5785_v39 }
 0x3f1   :  { %5375 = vmatpush3.bf16.msra.mxu1 %v5784_v38  ;;  %5351 = vmatpush3.bf16.msra.mxu0 %v5785_v39 }
 0x3f2   :  { %5376 = vmatprep.subr.bf16.mxu1 %v5786_v40  ;;  %5352 = vmatprep.subr.bf16.mxu0 %v5787_v41 }
 0x3f5   :  { %5377 = vmatpush3.bf16.msra.mxu1 %v5786_v40  ;;  %5353 = vmatpush3.bf16.msra.mxu0 %v5787_v41 }
 0x3f6   :  { %5378 = vmatprep.subr.bf16.mxu1 %v5788_v42  ;;  %5354 = vmatprep.subr.bf16.mxu0 %v5789_v43 }
 0x3f9   :  { %5379 = vmatpush3.bf16.msra.mxu1 %v5788_v42  ;;  %5355 = vmatpush3.bf16.msra.mxu0 %v5789_v43 }
 0x3fa   :  { %5380 = vmatprep.subr.bf16.mxu1 %v5790_v44  ;;  %5356 = vmatprep.subr.bf16.mxu0 %v5791_v45 }
 0x3fd   :  { %5381 = vmatpush3.bf16.msra.mxu1 %v5790_v44  ;;  %5357 = vmatpush3.bf16.msra.mxu0 %v5791_v45 }
 0x3fe   :  { %5382 = vmatprep.subr.bf16.mxu1 %v5792_v46  ;;  %5358 = vmatprep.subr.bf16.mxu0 %v5793_v47 }
 0x401   :  { %5383 = vmatpush3.bf16.msra.mxu1 %v5792_v46  ;;  %5359 = vmatpush3.bf16.msra.mxu0 %v5793_v47 }
 0x402   :  { %5416 = vmatprep.subr.bf16.mxu1 %v6562_v33  ;;  %5392 = vmatprep.subr.bf16.mxu0 %v5794_v58 }
 0x404   :  { %5385 = vmatmul.mubr.bf16.vlgmr.msra.gmra.mrb[8].mxu1 %v5036_v52  ;;  %5361 = vmatmul.mubr.bf16.vlgmr.msra.gmra.mrb[20].mxu0 %v5036_v52 }
 0x405   :  { %5388 = vmatprep.mubr.bf16.mxu1 %v5037_v53  ;;  %5364 = vmatprep.mubr.bf16.mxu0 %v5037_v53 }
 0x406   :  { %5393 = vmatpush3.bf16.msra.mxu0 %v5794_v58 }
 0x407   :  { %5394 = vmatprep.subr.bf16.mxu0 %v5795_v59 }
 0x40a   :  { %5395 = vmatpush3.bf16.msra.mxu0 %v5795_v59 }
 0x40b   :  { %5396 = vmatprep.subr.bf16.mxu0 %v5796_v60 }
 0x40c   :  { %5389 = vmatmul.mubr.bf16.gmra.mrb[12].mxu1 %v5038_v57  ;;  %5365 = vmatmul.mubr.bf16.gmra.mrb[24].mxu0 %v5038_v57 }
 0x40d   :  { %5408 = vmatprep.mubr.bf16.mxu0 %v5035_v36  ;;  %5418 = vmatprep.mubr.msk.bf16.mxu1 %vm6563_vm0, %v6562_v33 }
 0x40e   :  { %5397 = vmatpush3.bf16.msra.mxu0 %v5796_v60 }
 0x40f   :  { %5398 = vmatprep.subr.bf16.mxu0 %v5797_v61 }
 0x412   :  { %5399 = vmatpush3.bf16.msra.mxu0 %v5797_v61 }
 0x413   :  { %5400 = vmatprep.subr.bf16.mxu0 %v5798_v62 }
 0x416   :  { %5401 = vmatpush3.bf16.msra.mxu0 %v5798_v62 }
 0x417   :  { %5402 = vmatprep.subr.bf16.mxu0 %v5799_v63 }
 0x41a   :  { %5403 = vmatpush3.bf16.msra.mxu0 %v5799_v63  ;;  %v4882_v63 = vld [vmem:[#allocation19] ss:$0 sm:$0xff] }
 0x41b   :  { %5404 = vmatprep.subr.bf16.mxu0 %v5800_v0 }
 0x41e   :  { %5405 = vmatpush3.bf16.msra.mxu0 %v5800_v0 }
 0x41f   :  { %5406 = vmatprep.subr.bf16.mxu0 %v5801_v1 }
 0x422   :  { %5407 = vmatpush3.bf16.msra.mxu0 %v5801_v1 }
 0x423   :  { %5440 = vmatprep.subr.bf16.mxu0 %v6562_v33 }
 0x425   :  { %5409 = vmatmul.mubr.bf16.vlgmr.msra.gmra.mrb[28].mxu0 %v5036_v52 }
 0x426   :  { %5412 = vmatprep.mubr.bf16.mxu0 %v5037_v53 }
 0x42d   :  { %5413 = vmatmul.mubr.bf16.gmra.mrb[32].mxu0 %v5038_v57 }
 0x42e   :  { %5442 = vmatprep.mubr.msk.bf16.mxu0 %vm6563_vm0, %v6562_v33 }
 0x4b7   :  { %v7094_v2 = vpop.f32.mrb[16].mxu0  ;;  %v7096_v3 = vpop.f32.mrb[4].mxu1 }
 0x4b8   :  { %v7098_v4 = vpop.f32.mrb[17].mxu0  ;;  %v7100_v5 = vpop.f32.mrb[5].mxu1 }
 0x4b9   :  { %v1042_v6 = vpop.f32.mrb[18].mxu0  ;;  %v1083_v7 = vpop.f32.mrb[6].mxu1 }
 0x4ba   :  { %v1043_v8 = vpop.f32.mrb[19].mxu0  ;;  %v1084_v9 = vpop.f32.mrb[7].mxu1 }
 0x4d7   :  { %v5386_v11 = vpop.f32.mrb[8].mxu1  ;;  %v5362_v12 = vpop.f32.mrb[20].mxu0 }
 0x4d8   :  { %v1367_v13 = vpop.f32.mrb[9].mxu1  ;;  %v1231_v14 = vpop.f32.mrb[21].mxu0  ;;  %v1376_v40 = vadd.f32 %v5386_v11, %v7102_v10  ;;  %v1240_v46 = vadd.f32 %v5362_v12, %v7105_v17 }
 0x4d9   :  { %v1368_v15 = vadd.f32 %v7102_v10, %v1367_v13  ;;  %v5387_v16 = vpop.f32.mrb[10].mxu1  ;;  %v5363_v18 = vpop.f32.mrb[22].mxu0  ;;  %v1232_v23 = vadd.f32 %v7105_v17, %v1231_v14 }
 0x4da   :  { %v1370_v19 = vpop.f32.mrb[11].mxu1  ;;  %v1234_v20 = vpop.f32.mrb[23].mxu0  ;;  %v1544_v44 = vpack.c.bf16 %v1376_v40, %v1376_v40  ;;  %v1379_v47 = vadd.f32 %v5387_v16, %v7102_v10  ;;  %v1536_v49 = vpack.c.bf16 %v1240_v46, %v1240_v46  ;;  %v1243_v52 = vadd.f32 %v5363_v18, %v7105_v17 }
 0x4db   :  { %v1542_v21 = vpack.c.bf16 %v1368_v15, %v1368_v15  ;;  %v1371_v24 = vadd.f32 %v7102_v10, %v1370_v19  ;;  %v1534_v27 = vpack.c.bf16 %v1232_v23, %v1232_v23  ;;  %v1235_v39 = vadd.f32 %v7105_v17, %v1234_v20 }
 0x4dc   :  { %v1545_v50 = vpack.c.bf16 %v1379_v47, %v1379_v47  ;;  %v1537_v54 = vpack.c.bf16 %v1243_v52, %v1243_v52 }
 0x4dd   :  { %5417 = vmatpush3.bf16.xpose.msra.mxu1 %v1542_v21  ;;  %v1543_v36 = vpack.c.bf16 %v1371_v24, %v1371_v24  ;;  %v1535_v43 = vpack.c.bf16 %v1235_v39, %v1235_v39  ;;  %v6565_v24 = vmov 1966171168  }
 0x4de   :  { %5422 = vmatprep.subr.bf16.mxu1 %v6562_v33 }
 0x4df   :  { %v5390_v25 = vpop.f32.mrb[12].mxu1  ;;  %v5366_v26 = vpop.f32.mrb[24].mxu0 }
 0x4e0   :  { %v1383_v28 = vpop.f32.mrb[13].mxu1  ;;  %v1247_v29 = vpop.f32.mrb[25].mxu0  ;;  %v1392_v38 = vadd.f32 %v5390_v25, %v7102_v10  ;;  %v1256_v45 = vadd.f32 %v5366_v26, %v7105_v17  ;;  %v1884_v25 = vunpack.c.l.s4 %v6565_v24  ;;  %v824_v26 = vlaneseq }
 0x4e1   :  { %v1384_v30 = vadd.f32 %v7102_v10, %v1383_v28  ;;  %v5391_v31 = vpop.f32.mrb[14].mxu1  ;;  %v5367_v32 = vpop.f32.mrb[26].mxu0  ;;  %v1248_v56 = vadd.f32 %v7105_v17, %v1247_v29 }
 0x4e2   :  { %v1386_v34 = vpop.f32.mrb[15].mxu1  ;;  %v1250_v35 = vpop.f32.mrb[27].mxu0  ;;  %v1548_v42 = vpack.c.bf16 %v1392_v38, %v1392_v38  ;;  %v1540_v48 = vpack.c.bf16 %v1256_v45, %v1256_v45  ;;  %v1395_v57 = vadd.f32 %v5391_v31, %v7102_v10  ;;  %v1259_v60 = vadd.f32 %v5367_v32, %v7105_v17 }
 0x4e3   :  { %v1546_v37 = vpack.c.bf16 %v1384_v30, %v1384_v30  ;;  %v1538_v41 = vpack.c.bf16 %v1248_v56, %v1248_v56  ;;  %v1387_v51 = vadd.f32 %v7102_v10, %v1386_v34  ;;  %v1251_v55 = vadd.f32 %v7105_v17, %v1250_v35 }
 0x4e4   :  { %5419 = vmatmul.mubr.bf16.vlgmr.msra.gmra.mrb[16].mxu1 %v1534_v27  ;;  %v1549_v59 = vpack.c.bf16 %v1395_v57, %v1395_v57  ;;  %v1541_v61 = vpack.c.bf16 %v1259_v60, %v1259_v60  ;;  %v1878_v27 = vld [vmem:[#allocation7] sm:$0xff]  ;;  %v1885_v28 = vunpack.c.0.s8 %v1884_v25  ;;  %v7162_v29 = vshrl.u32 %v824_v26, 7 }
 0x4e5   :  { %5423 = vmatpush3.bf16.xpose.msra.mxu1 %v1543_v36  ;;  %5441 = vmatpush3.bf16.xpose.msra.mxu0 %v1546_v37  ;;  %v1547_v53 = vpack.c.bf16 %v1387_v51, %v1387_v51  ;;  %v1539_v58 = vpack.c.bf16 %v1251_v55, %v1251_v55  ;;  %vm1879_vm9 = vcmp.gt.s32.totalorder %v1878_v27, 0  ;;  %v6566_v31 = vmov -1e+09  }
 0x4e6   :  { %5424 = vmatprep.mubr.msk.bf16.mxu1 %vm6563_vm0, %v6562_v33  ;;  %5428 = vmatprep.subr.bf16.mxu1 %v6562_v33  ;;  %v7165_v30 = vsub.s32 %v1885_v28, %v7162_v29  ;;  %v1880_v32 = vsel %vm1879_vm9, 0.0, %v6566_v31  ;;  %v7170_v37 = vsub.s32 0, %v7162_v29 }
 0x4e7   :  { %5452 = vmatprep.subr.bf16.mxu0 %v6562_v33  ;;  %v1882_v35 = vcombine.high %v1880_v32, %v1880_v32 }
 0x4e8   :  { %v1889_v34 = vrot.slane %v1880_v32, %v7165_v30 }
 0x4e9   :  { %v1896_v39 = vrot.slane %v1882_v35, %v7165_v30 }
 0x4ea   :  { %v1905_v36 = vrot.slane %v1889_v34, %v7165_v30  ;;  %v1897_v38 = vcombine.high %v1889_v34, %v1889_v34 }
 0x4eb   :  { %v1912_v47 = vrot.slane %v1896_v39, %v7165_v30 }
 0x4ec   :  { %5425 = vmatmul.mubr.bf16.vlgmr.msra.gmra.mrb[20].mxu1 %v1535_v43  ;;  %5443 = vmatmul.mubr.bf16.vlgmr.msra.gmra.mrb[36].mxu0 %v1538_v41  ;;  %v1934_v56 = vrot.slane %v1905_v36, %v7170_v37  ;;  %v1919_v46 = vrot.slane %v1897_v38, %v7165_v30 }
 0x4ed   :  { %5429 = vmatpush3.bf16.xpose.msra.mxu1 %v1544_v44  ;;  %5453 = vmatpush3.bf16.xpose.msra.mxu0 %v1548_v42 }
 0x4ee   :  { %5430 = vmatprep.mubr.msk.bf16.mxu1 %vm6563_vm0, %v6562_v33  ;;  %5454 = vmatprep.mubr.msk.bf16.mxu0 %vm6563_vm0, %v6562_v33  ;;  %v1929_v28 = vcombine.high %v1919_v46, %v1919_v46 }
 0x4ef   :  { %5434 = vmatprep.subr.bf16.mxu1 %v6562_v33  ;;  %5464 = vmatprep.subr.bf16.mxu0 %v6562_v33 }
 0x4f0   :  { %v1946_v35 = vrot.slane %v1929_v28, %v7170_v37 }
 0x4f4   :  { %5431 = vmatmul.mubr.bf16.vlgmr.msra.gmra.mrb[24].mxu1 %v1536_v49  ;;  %5455 = vmatmul.mubr.bf16.vlgmr.msra.gmra.mrb[40].mxu0 %v1540_v48  ;;  %v1938_v49 = vrot.slane %v1919_v46, %v7170_v37 }
 0x4f5   :  { %5435 = vmatpush3.bf16.xpose.msra.mxu1 %v1545_v50  ;;  %5436 = vmatprep.mubr.msk.bf16.mxu1 %vm6563_vm0, %v6562_v33  ;;  %v1950_v50 = vrot.slane %v1912_v47, %v7170_v37 }
 0x4f6   :  { %5446 = vmatprep.subr.bf16.mxu1 %v6562_v33  ;;  %5466 = vmatprep.mubr.msk.bf16.mxu0 %vm6563_vm0, %v6562_v33 }
 0x4f8   :  { %v5410_v62 = vpop.f32.mrb[28].mxu0 }
 0x4f9   :  { %v7146_v0 = vadd.f32 %v5410_v62, %v4882_v63  ;;  %v1503_v1 = vpop.f32.mrb[29].mxu0 }
 0x4fa   :  { %v1504_v6 = vadd.f32 %v4882_v63, %v1503_v1  ;;  %v5411_v7 = vpop.f32.mrb[30].mxu0  ;;  %v1928_v1 = vcombine.high %v1912_v47, %v1912_v47 }
 0x4fb   :  { %v7148_v8 = vadd.f32 %v5411_v7, %v4882_v63  ;;  %v1506_v9 = vpop.f32.mrb[31].mxu0 }
 0x4fc   :  { %5437 = vmatmul.mubr.bf16.vlgmr.msra.gmra.mrb[28].mxu1 %v1537_v54  ;;  %v2076_v10 = vpack.c.bf16 %v1504_v6, %v1504_v6  ;;  %v1507_v11 = vadd.f32 %v4882_v63, %v1506_v9  ;;  %v1927_v6 = vcombine.high %v1905_v36, %v1905_v36  ;;  %v1898_v36 = vcombine.high %v1896_v39, %v1896_v39 }
 0x4fd   :  { %5447 = vmatpush3.bf16.xpose.msra.mxu1 %v1547_v53  ;;  %5448 = vmatprep.mubr.msk.bf16.mxu1 %vm6563_vm0, %v6562_v33 }
 0x4fe   :  { %5458 = vmatprep.subr.bf16.mxu1 %v6562_v33  ;;  %v2089_v14 = vsel %vm2087_vm8, %v2076_v10, 0  ;;  %v2077_v15 = vpack.c.bf16 %v1507_v11, %v1507_v11  ;;  %v1958_v10 = vrot.slane %v1928_v1, %v7170_v37  ;;  %v1942_v11 = vrot.slane %v1927_v6, %v7170_v37 }
 0x4ff   :  { %5465 = vmatpush3.bf16.msra.mxu0 %v2089_v14 }
 0x500   :  { %v5414_v12 = vpop.f32.mrb[32].mxu0  ;;  %v2135_v19 = vsel %vm2087_vm8, %v2077_v15, 0  ;;  %5476 = vmatprep.subr.bf16.mxu0 %v6562_v33 }
 0x501   :  { %v7150_v13 = vadd.f32 %v5414_v12, %v4882_v63  ;;  %v1519_v16 = vpop.f32.mrb[33].mxu0 }
 0x502   :  { %v7153_v17 = vadd.f32 %v4882_v63, %v1519_v16  ;;  %v5415_v18 = vpop.f32.mrb[34].mxu0 }
 0x503   :  { %v7156_v20 = vadd.f32 %v5415_v18, %v4882_v63  ;;  %v1522_v21 = vpop.f32.mrb[35].mxu0 }
 0x504   :  { %5449 = vmatmul.mubr.bf16.vlgmr.msra.gmra.mrb[32].mxu1 %v1539_v58  ;;  %v7159_v23 = vadd.f32 %v4882_v63, %v1522_v21 }
 0x505   :  { %5459 = vmatpush3.bf16.xpose.msra.mxu1 %v1549_v59  ;;  %5460 = vmatprep.mubr.msk.bf16.mxu1 %vm6563_vm0, %v6562_v33 }
 0x506   :  { %5470 = vmatprep.subr.bf16.mxu1 %v6562_v33 }
 0x50c   :  { %5461 = vmatmul.mubr.bf16.vlgmr.msra.gmra.mrb[36].mxu1 %v1541_v61 }
 0x50d   :  { %5472 = vmatprep.mubr.msk.bf16.mxu1 %vm6563_vm0, %v6562_v33  ;;  %5471 = vmatpush3.bf16.msra.mxu1 %v2135_v19 }
 0x50e   :  { %5482 = vmatprep.subr.bf16.mxu1 %v6562_v33 }
 0x5b7   :  { %v1584_v40 = vpop.f32.mrb[16].mxu1 }
 0x5b8   :  { %v1870_v41 = vmul.f32 0.125, %v1584_v40  ;;  %v5420_v42 = vpop.f32.mrb[17].mxu1 }
 0x5b9   :  { %v1587_v43 = vpop.f32.mrb[18].mxu1 }
 0x5ba   :  { %v5421_v44 = vpop.f32.mrb[19].mxu1  ;;  %v7174_v45 = vadd.f32 %v1934_v56, %v1870_v41 }
 0x5bb   :  { %v1926_v44 = vrot.slane %v1898_v36, %v7165_v30 }
 0x5bc   :  { %v1980_v48 = vsel %vm1979_vm10, %v7174_v45, -inf }
 0x5bd   :  { %1981 = vmax.xlane.f32.xlu0 %v1980_v48  ;;  %v1954_v47 = vrot.slane %v1926_v44, %v7170_v37  ;;  %v1930_v39 = vcombine.high %v1926_v44, %v1926_v44 }
 0x5bf   :  { %v1624_v51 = vpop.f32.mrb[20].mxu1  ;;  %v1744_v52 = vpop.f32.mrb[36].mxu0 }
 0x5c0   :  { %v1871_v53 = vmul.f32 0.125, %v1624_v51  ;;  %v5426_v54 = vpop.f32.mrb[21].mxu1  ;;  %v1874_v55 = vmul.f32 0.125, %v1744_v52  ;;  %v5444_v57 = vpop.f32.mrb[37].mxu0 }
 0x5c1   :  { %v1627_v58 = vpop.f32.mrb[22].mxu1  ;;  %v1747_v59 = vpop.f32.mrb[38].mxu0 }
 0x5c2   :  { %v5427_v60 = vpop.f32.mrb[23].mxu1  ;;  %v7182_v61 = vadd.f32 %v1938_v49, %v1871_v53  ;;  %v5445_v62 = vpop.f32.mrb[39].mxu0  ;;  %v7184_v63 = vadd.f32 %v1950_v50, %v1874_v55  ;;  %v1962_v55 = vrot.slane %v1930_v39, %v7170_v37 }
 0x5c4   :  { %v1983_v7 = vsel %vm1979_vm10, %v7182_v61, -inf  ;;  %v1992_v9 = vsel %vm1979_vm10, %v7184_v63, -inf }
 0x5c5   :  { %1984 = vmax.xlane.f32.xlu0 %v1983_v7 }
 0x5c7   :  { %v1664_v12 = vpop.f32.mrb[24].mxu1  ;;  %v1824_v14 = vpop.f32.mrb[40].mxu0 }
 0x5c8   :  { %v1872_v15 = vmul.f32 0.125, %v1664_v12  ;;  %v1876_v16 = vmul.f32 0.125, %v1824_v14  ;;  %v5432_v18 = vpop.f32.mrb[25].mxu1  ;;  %v5456_v19 = vpop.f32.mrb[41].mxu0 }
 0x5c9   :  { %1993 = vmax.xlane.f32.xlu0 %v1992_v9  ;;  %v1667_v21 = vpop.f32.mrb[26].mxu1  ;;  %v1827_v24 = vpop.f32.mrb[42].mxu0 }
 0x5ca   :  { %v5433_v25 = vpop.f32.mrb[27].mxu1  ;;  %v1977_v26 = vadd.f32 %v1958_v10, %v1876_v16  ;;  %v1973_v27 = vadd.f32 %v1942_v11, %v1872_v15  ;;  %v5457_v31 = vpop.f32.mrb[43].mxu0 }
 0x5cc   :  { %v1998_v32 = vsel %vm1979_vm10, %v1977_v26, -inf  ;;  %v1986_v34 = vsel %vm1979_vm10, %v1973_v27, -inf }
 0x5cd   :  { %1999 = vmax.xlane.f32.xlu0 %v1998_v32  ;;  %1987 = vmax.xlane.f32.xlu1 %v1986_v34 }
 0x5cf   :  { %v1704_v56 = vpop.f32.mrb[28].mxu1 }
 0x5d0   :  { %v1873_v38 = vmul.f32 0.125, %v1704_v56  ;;  %v5438_v40 = vpop.f32.mrb[29].mxu1 }
 0x5d1   :  { %v1707_v41 = vpop.f32.mrb[30].mxu1 }
 0x5d2   :  { %v5439_v42 = vpop.f32.mrb[31].mxu1  ;;  %v1974_v43 = vadd.f32 %v1946_v35, %v1873_v38 }
 0x5d4   :  { %v1989_v46 = vsel %vm1979_vm10, %v1974_v43, -inf }
 0x5d5   :  { %1990 = vmax.xlane.f32.xlu1 %v1989_v46 }
 0x5d7   :  { %v1784_v48 = vpop.f32.mrb[32].mxu1 }
 0x5d8   :  { %v1875_v49 = vmul.f32 0.125, %v1784_v48  ;;  %v5450_v50 = vpop.f32.mrb[33].mxu1 }
 0x5d9   :  { %v1787_v51 = vpop.f32.mrb[34].mxu1 }
 0x5da   :  { %v1976_v52 = vadd.f32 %v1954_v47, %v1875_v49  ;;  %v5451_v53 = vpop.f32.mrb[35].mxu1 }
 0x5dc   :  { %v1995_v54 = vsel %vm1979_vm10, %v1976_v52, -inf }
 0x5dd   :  { %1996 = vmax.xlane.f32.xlu1 %v1995_v54 }
 0x5df   :  { %v1864_v57 = vpop.f32.mrb[36].mxu1 }
 0x5e0   :  { %v1877_v58 = vmul.f32 0.125, %v1864_v57  ;;  %v5462_v30 = vpop.f32.mrb[37].mxu1  ;;  %v2078_v57 = vpack.c.bf16 %v7146_v0, %v7146_v0 }
 0x5e1   :  { %v1867_v59 = vpop.f32.mrb[38].mxu1 }
 0x5e2   :  { %v5463_v60 = vpop.f32.mrb[39].mxu1  ;;  %v1978_v62 = vadd.f32 %v1962_v55, %v1877_v58  ;;  %v2181_v59 = vsel %vm2087_vm8, %v2078_v57, 0  ;;  %v5817_v57 = vld [vmem:[#allocation22 + $0x38] sm:$0xff]  }
 0x5e4   :  { %v2001_v1 = vsel %vm1979_vm10, %v1978_v62, -inf }
 0x5e5   :  { %2002 = vmax.xlane.f32.xlu1 %v2001_v1  ;;  %v2079_v1 = vpack.c.bf16 %v7148_v8, %v7148_v8  ;;  %v2080_v8 = vpack.c.bf16 %v7153_v17, %v7153_v17  ;;  %v2081_v17 = vpack.c.bf16 %v7159_v23, %v7159_v23 }
 0x64a   :  { %v1982_v6 = vpop.xlane.xlu0 %1981 }
 0x64b   :  { %v2004_v7 = vsub.f32 %v7174_v45, %v1982_v6 }
 0x64d   :  { %v2012_v9 = vmul.f32 1.442695, %v2004_v7 }
 0x64f   :  { %5938 = vpow2.f32 %v2012_v9  ;;  %v2227_v9 = vsel %vm2087_vm8, %v2079_v1, 0 }
 0x652   :  { %v1985_v10 = vpop.xlane.xlu0 %1984 }
 0x653   :  { %v2005_v11 = vsub.f32 %v7182_v61, %v1985_v10 }
 0x655   :  { %v2014_v12 = vmul.f32 1.442695, %v2005_v11 }
 0x656   :  { %v1994_v14 = vpop.xlane.xlu0 %1993 }
 0x657   :  { %5940 = vpow2.f32 %v2014_v12  ;;  %v2008_v16 = vsub.f32 %v7184_v63, %v1994_v14 }
 0x659   :  { %v5939_v15 = vpop.eup %5938  ;;  %v2020_v28 = vmul.f32 1.442695, %v2008_v16 }
 0x65a   :  { %v1988_v18 = vpop.xlane.xlu1 %1987  ;;  %v2028_v19 = vsel %vm1979_vm10, %v5939_v15, 0.0  ;;  %v2000_v21 = vpop.xlane.xlu0 %1999 }
 0x65b   :  { %v2006_v24 = vsub.f32 %v1973_v27, %v1988_v18  ;;  %2029 = vadd.xlane.f32.xlu0 %v2028_v19  ;;  %v2010_v45 = vsub.f32 %v1977_v26, %v2000_v21  ;;  %v2273_v19 = vsel %vm2087_vm8, %v2080_v8, 0 }
 0x65d   :  { %v2016_v25 = vmul.f32 1.442695, %v2006_v24  ;;  %v2024_v32 = vmul.f32 1.442695, %v2010_v45 }
 0x65f   :  { %5942 = vpow2.f32 %v2016_v25 }
 0x660   :  { %5944 = vpow2.f32 %v2020_v28  ;;  %v2082_v28 = vpack.c.bf16 %v7150_v13, %v7150_v13 }
 0x661   :  { %v5941_v31 = vpop.eup %5940  ;;  %5946 = vpow2.f32 %v2024_v32 }
 0x662   :  { %v1991_v61 = vpop.xlane.xlu1 %1990  ;;  %v2031_v34 = vsel %vm1979_vm10, %v5941_v31, 0.0 }
 0x663   :  { %v2007_v35 = vsub.f32 %v1974_v43, %v1991_v61  ;;  %2032 = vadd.xlane.f32.xlu1 %v2031_v34  ;;  %v2319_v61 = vsel %vm2087_vm8, %v2081_v17, 0 }
 0x665   :  { %v2018_v36 = vmul.f32 1.442695, %v2007_v35  ;;  %v5802_v35 = vld [vmem:[#allocation20] sm:$0xff]  }
 0x667   :  { %5948 = vpow2.f32 %v2018_v36  ;;  %v2365_v36 = vsel %vm2087_vm8, %v2082_v28, 0 }
 0x669   :  { %v5943_v63 = vpop.eup %5942 }
 0x66a   :  { %v1997_v56 = vpop.xlane.xlu1 %1996  ;;  %v2034_v27 = vsel %vm1979_vm10, %v5943_v63, 0.0  ;;  %v7207_v40 = vpop.eup %5944 }
 0x66b   :  { %v2009_v38 = vsub.f32 %v1976_v52, %v1997_v56  ;;  %2035 = vadd.xlane.f32.xlu0 %v2034_v27  ;;  %v2040_v41 = vsel %vm1979_vm10, %v7207_v40, 0.0  ;;  %v7211_v42 = vpop.eup %5946 }
 0x66c   :  { %v2046_v48 = vsel %vm1979_vm10, %v7211_v42, 0.0 }
 0x66d   :  { %v2022_v26 = vmul.f32 1.442695, %v2009_v38 }
 0x66f   :  { %5950 = vpow2.f32 %v2022_v26  ;;  %2041 = vadd.xlane.f32.xlu0 %v2040_v41  ;;  %v5804_v26 = vld [vmem:[#allocation20 + $0x8] sm:$0xff]  }
 0x671   :  { %v5949_v43 = vpop.eup %5948 }
 0x672   :  { %v2003_v44 = vpop.xlane.xlu1 %2002  ;;  %v2037_v46 = vsel %vm1979_vm10, %v5949_v43, 0.0 }
 0x673   :  { %v2011_v47 = vsub.f32 %v1978_v62, %v2003_v44  ;;  %2038 = vadd.xlane.f32.xlu1 %v2037_v46  ;;  %2047 = vadd.xlane.f32.xlu0 %v2046_v48  ;;  %v5805_v44 = vld [vmem:[#allocation22 + $0x8] sm:$0xff]   ;;  %v5806_v46 = vld [vmem:[#allocation20 + $0x10] sm:$0xff]   ;;  %v5808_v48 = vld [vmem:[#allocation20 + $0x18] sm:$0xff]  }
 0x675   :  { %v2026_v49 = vmul.f32 1.442695, %v2011_v47  ;;  %v5807_v47 = vld [vmem:[#allocation22 + $0x10] sm:$0xff]  }
 0x677   :  { %5952 = vpow2.f32 %v2026_v49  ;;  %v5809_v49 = vld [vmem:[#allocation22 + $0x18] sm:$0xff]  }
 0x679   :  { %v7216_v50 = vpop.eup %5950 }
 0x67a   :  { %v2043_v51 = vsel %vm1979_vm10, %v7216_v50, 0.0 }
 0x67b   :  { %2044 = vadd.xlane.f32.xlu1 %v2043_v51  ;;  %v5811_v51 = vld [vmem:[#allocation22 + $0x20] sm:$0xff]  }
 0x681   :  { %v7220_v52 = vpop.eup %5952 }
 0x682   :  { %v2049_v53 = vsel %vm1979_vm10, %v7220_v52, 0.0 }
 0x683   :  { %2050 = vadd.xlane.f32.xlu1 %v2049_v53  ;;  %v5813_v53 = vld [vmem:[#allocation22 + $0x28] sm:$0xff]  }
 0x6e8   :  { %v2030_v39 = vpop.xlane.xlu0 %2029 }
 0x6e9   :  { %5954 = vrcp.f32 %v2030_v39  ;;  %v5814_v39 = vld [vmem:[#allocation20 + $0x30] sm:$0xff]  }
 0x6f0   :  { %v2033_v54 = vpop.xlane.xlu1 %2032 }
 0x6f1   :  { %5956 = vrcp.f32 %v2033_v54  ;;  %v5815_v54 = vld [vmem:[#allocation22 + $0x30] sm:$0xff]  }
 0x6f3   :  { %v5955_v55 = vpop.eup %5954 }
 0x6f4   :  { %v2060_v58 = vmul.f32 %v5955_v55, %v5939_v15  ;;  %v5816_v55 = vld [vmem:[#allocation20 + $0x38] sm:$0xff]  }
 0x6f6   :  { %v2068_v30 = vpack.c.bf16 %v2060_v58, %v2060_v58  ;;  %v5818_v58 = vld [vmem:[#allocation23] sm:$0xff]  }
 0x6f8   :  { %5467 = vmatmul.mubr.msk.bf16.vlgmr.msra.gmra.mrb[44].mxu0 %vm1979_vm10, %v2068_v30  ;;  %v2036_v60 = vpop.xlane.xlu0 %2035 }
 0x6f9   :  { %5477 = vmatpush3.bf16.msra.mxu0 %v2181_v59  ;;  %5478 = vmatprep.mubr.msk.bf16.mxu0 %vm6563_vm0, %v6562_v33  ;;  %5958 = vrcp.f32 %v2036_v60 }
 0x6fa   :  { %5488 = vmatprep.subr.bf16.mxu0 %v6562_v33 }
 0x6fb   :  { %v5957_v62 = vpop.eup %5956 }
 0x6fc   :  { %v2061_v6 = vmul.f32 %v5957_v62, %v5941_v31  ;;  %v2042_v0 = vpop.xlane.xlu0 %2041 }
 0x6fd   :  { %5960 = vrcp.f32 %v2042_v0 }
 0x6fe   :  { %v2069_v7 = vpack.c.bf16 %v2061_v6, %v2061_v6 }
 0x700   :  { %5473 = vmatmul.mubr.msk.bf16.vlgmr.msra.gmra.mrb[40].mxu1 %vm1979_vm10, %v2069_v7  ;;  %v2039_v10 = vpop.xlane.xlu1 %2038  ;;  %v2048_v11 = vpop.xlane.xlu0 %2047 }
 0x701   :  { %5483 = vmatpush3.bf16.msra.mxu1 %v2227_v9  ;;  %5962 = vrcp.f32 %v2039_v10  ;;  %5484 = vmatprep.mubr.msk.bf16.mxu1 %vm6563_vm0, %v6562_v33 }
 0x702   :  { %5494 = vmatprep.subr.bf16.mxu1 %v6562_v33  ;;  %5964 = vrcp.f32 %v2048_v11 }
 0x703   :  { %v5959_v12 = vpop.eup %5958 }
 0x704   :  { %v2062_v14 = vmul.f32 %v5959_v12, %v5943_v63  ;;  %v2083_v63 = vpack.c.bf16 %v7156_v20, %v7156_v20 }
 0x706   :  { %v2070_v15 = vpack.c.bf16 %v2062_v14, %v2062_v14  ;;  %v2411_v41 = vsel %vm2087_vm8, %v2083_v63, 0 }
 0x707   :  { %v5961_v16 = vpop.eup %5960 }
 0x708   :  { %v2045_v18 = vpop.xlane.xlu1 %2044  ;;  %5479 = vmatmul.mubr.msk.bf16.vlgmr.msra.gmra.mrb[48].mxu0 %vm1979_vm10, %v2070_v15  ;;  %v2064_v24 = vmul.f32 %v5961_v16, %v7207_v40  ;;  %v5803_v40 = vld [vmem:[#allocation22] sm:$0xff]  }
 0x709   :  { %5966 = vrcp.f32 %v2045_v18  ;;  %5489 = vmatpush3.bf16.msra.mxu0 %v2273_v19  ;;  %5490 = vmatprep.mubr.msk.bf16.mxu0 %vm6563_vm0, %v6562_v33  ;;  %v5819_v19 = vld [vmem:[#allocation23 + $0x8] sm:$0xff]  }
 0x70a   :  { %5500 = vmatprep.subr.bf16.mxu0 %v6562_v33  ;;  %v2072_v31 = vpack.c.bf16 %v2064_v24, %v2064_v24 }
 0x70b   :  { %v5963_v21 = vpop.eup %5962 }
 0x70c   :  { %v2063_v25 = vmul.f32 %v5963_v21, %v5949_v43  ;;  %v5965_v32 = vpop.eup %5964 }
 0x70d   :  { %v2066_v23 = vmul.f32 %v5965_v32, %v7211_v42 }
 0x70e   :  { %v2071_v45 = vpack.c.bf16 %v2063_v25, %v2063_v25 }
 0x70f   :  { %v2074_v27 = vpack.c.bf16 %v2066_v23, %v2066_v23 }
 0x710   :  { %5485 = vmatmul.mubr.msk.bf16.vlgmr.msra.gmra.mrb[44].mxu1 %vm1979_vm10, %v2071_v45  ;;  %v2051_v34 = vpop.xlane.xlu1 %2050  ;;  %5491 = vmatmul.mubr.msk.bf16.vlgmr.msra.gmra.mrb[52].mxu0 %vm1979_vm10, %v2072_v31  ;;  %v5820_v45 = vld [vmem:[#allocation23 + $0x10] sm:$0xff]  }
 0x711   :  { %5495 = vmatpush3.bf16.msra.mxu1 %v2319_v61  ;;  %5968 = vrcp.f32 %v2051_v34  ;;  %5501 = vmatpush3.bf16.msra.mxu0 %v2365_v36 }
 0x712   :  { %5496 = vmatprep.mubr.msk.bf16.mxu1 %vm6563_vm0, %v6562_v33  ;;  %5502 = vmatprep.mubr.msk.bf16.mxu0 %vm6563_vm0, %v6562_v33 }
 0x713   :  { %v5967_v13 = vpop.eup %5966  ;;  %5506 = vmatprep.subr.bf16.mxu1 %v6562_v33  ;;  %5512 = vmatprep.subr.bf16.mxu0 %v5802_v35 }
 0x714   :  { %v2065_v56 = vmul.f32 %v5967_v13, %v7216_v50  ;;  %v5810_v50 = vld [vmem:[#allocation20 + $0x20] sm:$0xff]  }
 0x716   :  { %v2073_v38 = vpack.c.bf16 %v2065_v56, %v2065_v56 }
 0x718   :  { %5497 = vmatmul.mubr.msk.bf16.vlgmr.msra.gmra.mrb[48].mxu1 %vm1979_vm10, %v2073_v38  ;;  %5503 = vmatmul.mubr.msk.bf16.vlgmr.msra.gmra.mrb[56].mxu0 %vm1979_vm10, %v2074_v27  ;;  %v5822_v38 = vld [vmem:[#allocation23 + $0x20] sm:$0xff]  }
 0x719   :  { %5507 = vmatpush3.bf16.msra.mxu1 %v2411_v41  ;;  %5508 = vmatprep.mubr.msk.bf16.mxu1 %vm6563_vm0, %v6562_v33  ;;  %v5823_v41 = vld [vmem:[#allocation23 + $0x28] sm:$0xff]  }
 0x71a   :  { %5513 = vmatpush3.bf16.msra.mxu0 %v5802_v35  ;;  %5536 = vmatprep.subr.bf16.mxu1 %v5803_v40  ;;  %v5821_v35 = vld [vmem:[#allocation23 + $0x18] sm:$0xff]  }
 0x71b   :  { %v5969_v42 = vpop.eup %5968  ;;  %5514 = vmatprep.subr.bf16.mxu0 %v5804_v26 }
 0x71c   :  { %v2067_v20 = vmul.f32 %v5969_v42, %v7220_v52  ;;  %v5812_v52 = vld [vmem:[#allocation20 + $0x28] sm:$0xff]  }
 0x71e   :  { %v2075_v43 = vpack.c.bf16 %v2067_v20, %v2067_v20  ;;  %5515 = vmatpush3.bf16.msra.mxu0 %v5804_v26 }
 0x71f   :  { %5516 = vmatprep.subr.bf16.mxu0 %v5806_v46 }
 0x720   :  { %5509 = vmatmul.mubr.msk.bf16.vlgmr.msra.gmra.mrb[52].mxu1 %vm1979_vm10, %v2075_v43  ;;  %v5824_v43 = vld [vmem:[#allocation23 + $0x30] sm:$0xff]  }
 0x721   :  { %5537 = vmatpush3.bf16.msra.mxu1 %v5803_v40 }
 0x722   :  { %5538 = vmatprep.subr.bf16.mxu1 %v5805_v44  ;;  %5517 = vmatpush3.bf16.msra.mxu0 %v5806_v46  ;;  %v7276_v46 = vld [vmem:[#allocation26] ss:$0 sm:$0xff] }
 0x723   :  { %5518 = vmatprep.subr.bf16.mxu0 %v5808_v48 }
 0x725   :  { %5539 = vmatpush3.bf16.msra.mxu1 %v5805_v44  ;;  %v5825_v44 = vld [vmem:[#allocation23 + $0x38] sm:$0xff]  }
 0x726   :  { %5540 = vmatprep.subr.bf16.mxu1 %v5807_v47  ;;  %5519 = vmatpush3.bf16.msra.mxu0 %v5808_v48 }
 0x727   :  { %5520 = vmatprep.subr.bf16.mxu0 %v5810_v50 }
 0x729   :  { %5541 = vmatpush3.bf16.msra.mxu1 %v5807_v47 }
 0x72a   :  { %5542 = vmatprep.subr.bf16.mxu1 %v5809_v49  ;;  %5521 = vmatpush3.bf16.msra.mxu0 %v5810_v50 }
 0x72b   :  { %5522 = vmatprep.subr.bf16.mxu0 %v5812_v52 }
 0x72d   :  { %5543 = vmatpush3.bf16.msra.mxu1 %v5809_v49 }
 0x72e   :  { %5544 = vmatprep.subr.bf16.mxu1 %v5811_v51  ;;  %5523 = vmatpush3.bf16.msra.mxu0 %v5812_v52 }
 0x72f   :  { %5524 = vmatprep.subr.bf16.mxu0 %v5814_v39 }
 0x731   :  { %5545 = vmatpush3.bf16.msra.mxu1 %v5811_v51 }
 0x732   :  { %5546 = vmatprep.subr.bf16.mxu1 %v5813_v53  ;;  %5525 = vmatpush3.bf16.msra.mxu0 %v5814_v39 }
 0x733   :  { %5526 = vmatprep.subr.bf16.mxu0 %v5816_v55 }
 0x735   :  { %5547 = vmatpush3.bf16.msra.mxu1 %v5813_v53 }
 0x736   :  { %5548 = vmatprep.subr.bf16.mxu1 %v5815_v54  ;;  %5527 = vmatpush3.bf16.msra.mxu0 %v5816_v55  ;;  %v7279_v55 = vld [vmem:[#allocation25] ss:$0 sm:$0xff] }
 0x737   :  { %5560 = vmatprep.subr.bf16.mxu0 %v5818_v58 }
 0x739   :  { %5549 = vmatpush3.bf16.msra.mxu1 %v5815_v54 }
 0x73a   :  { %5550 = vmatprep.subr.bf16.mxu1 %v5817_v57 }
 0x73d   :  { %5551 = vmatpush3.bf16.msra.mxu1 %v5817_v57 }
 0x73e   :  { %5584 = vmatprep.subr.bf16.mxu1 %v6562_v33 }
 0x7cb   :  { %v2125_v30 = vpop.f32.mrb[44].mxu0 }
 0x7cc   :  { %v5468_v59 = vpop.f32.mrb[45].mxu0 }
 0x7cd   :  { %v2128_v60 = vpop.f32.mrb[46].mxu0 }
 0x7ce   :  { %v5469_v62 = vpop.f32.mrb[47].mxu0 }
 0x7d3   :  { %v2171_v1 = vpop.f32.mrb[40].mxu1 }
 0x7d4   :  { %v5039_v6 = vpack.c.bf16 %v2171_v1, %v2125_v30  ;;  %v5474_v0 = vpop.f32.mrb[41].mxu1 }
 0x7d5   :  { %v2174_v7 = vpop.f32.mrb[42].mxu1 }
 0x7d6   :  { %v5475_v9 = vpop.f32.mrb[43].mxu1  ;;  %5528 = vmatprep.mubr.bf16.mxu0 %v5039_v6  ;;  %5552 = vmatprep.mubr.bf16.mxu1 %v5039_v6 }
 0x7db   :  { %v2217_v10 = vpop.f32.mrb[48].mxu0 }
 0x7dc   :  { %v5480_v11 = vpop.f32.mrb[49].mxu0 }
 0x7dd   :  { %v2220_v12 = vpop.f32.mrb[50].mxu0 }
 0x7de   :  { %v5481_v8 = vpop.f32.mrb[51].mxu0 }
 0x7e3   :  { %v2263_v14 = vpop.f32.mrb[44].mxu1  ;;  %v2309_v16 = vpop.f32.mrb[52].mxu0 }
 0x7e4   :  { %v5040_v15 = vpack.c.bf16 %v2263_v14, %v2217_v10  ;;  %v5486_v18 = vpop.f32.mrb[45].mxu1  ;;  %v5492_v21 = vpop.f32.mrb[53].mxu0 }
 0x7e5   :  { %v2266_v24 = vpop.f32.mrb[46].mxu1  ;;  %v2312_v17 = vpop.f32.mrb[54].mxu0 }
 0x7e6   :  { %v5487_v25 = vpop.f32.mrb[47].mxu1  ;;  %5529 = vmatmul.mubr.bf16.vlgmr.msra.gmra.mrb[60].mxu0 %v5040_v15  ;;  %5553 = vmatmul.mubr.bf16.vlgmr.msra.gmra.mrb[56].mxu1 %v5040_v15  ;;  %v5493_v28 = vpop.f32.mrb[55].mxu0 }
 0x7e7   :  { %5561 = vmatpush3.bf16.msra.mxu0 %v5818_v58 }
 0x7e8   :  { %5562 = vmatprep.subr.bf16.mxu0 %v5819_v19 }
 0x7eb   :  { %5563 = vmatpush3.bf16.msra.mxu0 %v5819_v19  ;;  %v2355_v31 = vpop.f32.mrb[48].mxu1  ;;  %v2401_v61 = vpop.f32.mrb[56].mxu0 }
 0x7ec   :  { %v5041_v32 = vpack.c.bf16 %v2355_v31, %v2309_v16  ;;  %v5498_v34 = vpop.f32.mrb[49].mxu1  ;;  %5564 = vmatprep.subr.bf16.mxu0 %v5820_v45  ;;  %v5504_v36 = vpop.f32.mrb[57].mxu0 }
 0x7ed   :  { %v2358_v13 = vpop.f32.mrb[50].mxu1  ;;  %v2404_v23 = vpop.f32.mrb[58].mxu0 }
 0x7ee   :  { %v5499_v63 = vpop.f32.mrb[51].mxu1  ;;  %5532 = vmatprep.mubr.bf16.mxu0 %v5041_v32  ;;  %5556 = vmatprep.mubr.bf16.mxu1 %v5041_v32  ;;  %v5505_v56 = vpop.f32.mrb[59].mxu0 }
 0x7ef   :  { %5565 = vmatpush3.bf16.msra.mxu0 %v5820_v45 }
 0x7f0   :  { %5566 = vmatprep.subr.bf16.mxu0 %v5821_v35 }
 0x7f3   :  { %5567 = vmatpush3.bf16.msra.mxu0 %v5821_v35  ;;  %v2447_v27 = vpop.f32.mrb[52].mxu1 }
 0x7f4   :  { %v5042_v40 = vpack.c.bf16 %v2447_v27, %v2401_v61  ;;  %v5510_v26 = vpop.f32.mrb[53].mxu1  ;;  %5568 = vmatprep.subr.bf16.mxu0 %v5822_v38 }
 0x7f5   :  { %v2450_v42 = vpop.f32.mrb[54].mxu1 }
 0x7f6   :  { %v5511_v20 = vpop.f32.mrb[55].mxu1  ;;  %5533 = vmatmul.mubr.bf16.gmra.mrb[64].mxu0 %v5042_v40  ;;  %5557 = vmatmul.mubr.bf16.gmra.mrb[60].mxu1 %v5042_v40 }
 0x7f7   :  { %5569 = vmatpush3.bf16.msra.mxu0 %v5822_v38  ;;  %5576 = vmatprep.mubr.bf16.mxu0 %v5039_v6 }
 0x7f8   :  { %5570 = vmatprep.subr.bf16.mxu0 %v5823_v41  ;;  %5586 = vmatprep.mubr.msk.bf16.mxu1 %vm6563_vm0, %v6562_v33 }
 0x7fb   :  { %5571 = vmatpush3.bf16.msra.mxu0 %v5823_v41 }
 0x7fc   :  { %5572 = vmatprep.subr.bf16.mxu0 %v5824_v43 }
 0x7ff   :  { %5573 = vmatpush3.bf16.msra.mxu0 %v5824_v43 }
 0x800   :  { %5574 = vmatprep.subr.bf16.mxu0 %v5825_v44 }
 0x803   :  { %5575 = vmatpush3.bf16.msra.mxu0 %v5825_v44 }
 0x804   :  { %5608 = vmatprep.subr.bf16.mxu0 %v6562_v33 }
 0x806   :  { %5577 = vmatmul.mubr.bf16.vlgmr.msra.gmra.mrb[68].mxu0 %v5040_v15 }
 0x807   :  { %5580 = vmatprep.mubr.bf16.mxu0 %v5041_v32  ;;  %v4921_v32 = vld [vmem:[#allocation28] ss:$0 sm:$0xff] }
 0x80e   :  { %5581 = vmatmul.mubr.bf16.gmra.mrb[72].mxu0 %v5042_v40 }
 0x80f   :  { %5610 = vmatprep.mubr.msk.bf16.mxu0 %vm6563_vm0, %v6562_v33 }
 0x8b9   :  { %v5530_v47 = vpop.f32.mrb[60].mxu0  ;;  %v5554_v48 = vpop.f32.mrb[56].mxu1 }
 0x8ba   :  { %v2590_v49 = vpop.f32.mrb[61].mxu0  ;;  %v2726_v50 = vpop.f32.mrb[57].mxu1  ;;  %v2735_v1 = vadd.f32 %v5554_v48, %v7276_v46  ;;  %v2599_v19 = vadd.f32 %v5530_v47, %v7279_v55 }
 0x8bb   :  { %v2727_v51 = vadd.f32 %v7276_v46, %v2726_v50  ;;  %v5531_v52 = vpop.f32.mrb[62].mxu0  ;;  %v5555_v53 = vpop.f32.mrb[58].mxu1  ;;  %v2591_v58 = vadd.f32 %v7279_v55, %v2590_v49 }
 0x8bc   :  { %v2593_v39 = vpop.f32.mrb[63].mxu0  ;;  %v2729_v54 = vpop.f32.mrb[59].mxu1  ;;  %v2903_v16 = vpack.c.bf16 %v2735_v1, %v2735_v1  ;;  %v2738_v24 = vadd.f32 %v5555_v53, %v7276_v46  ;;  %v2895_v25 = vpack.c.bf16 %v2599_v19, %v2599_v19  ;;  %v2602_v61 = vadd.f32 %v5531_v52, %v7279_v55 }
 0x8bd   :  { %v2901_v57 = vpack.c.bf16 %v2727_v51, %v2727_v51  ;;  %v2730_v30 = vadd.f32 %v7276_v46, %v2729_v54  ;;  %v2893_v59 = vpack.c.bf16 %v2591_v58, %v2591_v58  ;;  %v2594_v62 = vadd.f32 %v7279_v55, %v2593_v39 }
 0x8be   :  { %v2904_v45 = vpack.c.bf16 %v2738_v24, %v2738_v24  ;;  %v2896_v38 = vpack.c.bf16 %v2602_v61, %v2602_v61 }
 0x8bf   :  { %5585 = vmatpush3.bf16.xpose.msra.mxu1 %v2901_v57  ;;  %v2902_v60 = vpack.c.bf16 %v2730_v30, %v2730_v30  ;;  %v2894_v8 = vpack.c.bf16 %v2594_v62, %v2594_v62 }
 0x8c0   :  { %5590 = vmatprep.subr.bf16.mxu1 %v6562_v33 }
 0x8c6   :  { %5587 = vmatmul.mubr.bf16.vlgmr.msra.gmra.mrb[64].mxu1 %v2893_v59 }
 0x8c7   :  { %5591 = vmatpush3.bf16.xpose.msra.mxu1 %v2902_v60  ;;  %5592 = vmatprep.mubr.msk.bf16.mxu1 %vm6563_vm0, %v6562_v33 }
 0x8c8   :  { %5596 = vmatprep.subr.bf16.mxu1 %v6562_v33 }
 0x8c9   :  { %v5534_v6 = vpop.f32.mrb[64].mxu0  ;;  %v5558_v0 = vpop.f32.mrb[60].mxu1 }
 0x8ca   :  { %v2606_v7 = vpop.f32.mrb[65].mxu0  ;;  %v2742_v9 = vpop.f32.mrb[61].mxu1  ;;  %v2751_v17 = vadd.f32 %v5558_v0, %v7276_v46  ;;  %v2615_v34 = vadd.f32 %v5534_v6, %v7279_v55 }
 0x8cb   :  { %v2743_v10 = vadd.f32 %v7276_v46, %v2742_v9  ;;  %v7290_v11 = vpop.f32.mrb[66].mxu0  ;;  %v5559_v12 = vpop.f32.mrb[62].mxu1  ;;  %v2607_v21 = vadd.f32 %v7279_v55, %v2606_v7 }
 0x8cc   :  { %v2609_v14 = vpop.f32.mrb[67].mxu0  ;;  %v2745_v15 = vpop.f32.mrb[63].mxu1  ;;  %v2907_v31 = vpack.c.bf16 %v2751_v17, %v2751_v17  ;;  %v2899_v27 = vpack.c.bf16 %v2615_v34, %v2615_v34  ;;  %v2754_v44 = vadd.f32 %v5559_v12, %v7276_v46  ;;  %v2618_v58 = vadd.f32 %v7290_v11, %v7279_v55 }
 0x8cd   :  { %v2905_v18 = vpack.c.bf16 %v2743_v10, %v2743_v10  ;;  %v2897_v28 = vpack.c.bf16 %v2607_v21, %v2607_v21  ;;  %v2746_v35 = vadd.f32 %v7276_v46, %v2745_v15  ;;  %v2610_v43 = vadd.f32 %v7279_v55, %v2609_v14 }
 0x8ce   :  { %5593 = vmatmul.mubr.bf16.vlgmr.msra.gmra.mrb[68].mxu1 %v2894_v8  ;;  %v2908_v54 = vpack.c.bf16 %v2754_v44, %v2754_v44  ;;  %v2900_v59 = vpack.c.bf16 %v2618_v58, %v2618_v58 }
 0x8cf   :  { %5597 = vmatpush3.bf16.xpose.msra.mxu1 %v2903_v16  ;;  %5609 = vmatpush3.bf16.xpose.msra.mxu0 %v2905_v18  ;;  %v2906_v41 = vpack.c.bf16 %v2746_v35, %v2746_v35  ;;  %v2898_v52 = vpack.c.bf16 %v2610_v43, %v2610_v43 }
 0x8d0   :  { %5598 = vmatprep.mubr.msk.bf16.mxu1 %vm6563_vm0, %v6562_v33  ;;  %5602 = vmatprep.subr.bf16.mxu1 %v6562_v33 }
 0x8d1   :  { %5620 = vmatprep.subr.bf16.mxu0 %v6562_v33 }
 0x8d6   :  { %5599 = vmatmul.mubr.bf16.vlgmr.msra.gmra.mrb[72].mxu1 %v2895_v25  ;;  %5611 = vmatmul.mubr.bf16.vlgmr.msra.gmra.mrb[76].mxu0 %v2897_v28 }
 0x8d7   :  { %5603 = vmatpush3.bf16.xpose.msra.mxu1 %v2904_v45  ;;  %5621 = vmatpush3.bf16.xpose.msra.mxu0 %v2907_v31 }
 0x8d8   :  { %5604 = vmatprep.mubr.msk.bf16.mxu1 %vm6563_vm0, %v6562_v33  ;;  %5622 = vmatprep.mubr.msk.bf16.mxu0 %vm6563_vm0, %v6562_v33 }
 0x8d9   :  { %v5578_v36 = vpop.f32.mrb[68].mxu0  ;;  %5614 = vmatprep.subr.bf16.mxu1 %v6562_v33  ;;  %5632 = vmatprep.subr.bf16.mxu0 %v6562_v33 }
 0x8da   :  { %v7309_v13 = vadd.f32 %v5578_v36, %v4921_v32  ;;  %v2862_v23 = vpop.f32.mrb[69].mxu0 }
 0x8db   :  { %v2863_v63 = vadd.f32 %v4921_v32, %v2862_v23  ;;  %v5579_v56 = vpop.f32.mrb[70].mxu0 }
 0x8dc   :  { %v7311_v40 = vadd.f32 %v5579_v56, %v4921_v32  ;;  %v2865_v26 = vpop.f32.mrb[71].mxu0 }
 0x8dd   :  { %v3333_v42 = vpack.c.bf16 %v2863_v63, %v2863_v63  ;;  %v2866_v46 = vadd.f32 %v4921_v32, %v2865_v26 }
 0x8de   :  { %5605 = vmatmul.mubr.bf16.vlgmr.msra.gmra.mrb[76].mxu1 %v2896_v38  ;;  %5623 = vmatmul.mubr.bf16.vlgmr.msra.gmra.mrb[80].mxu0 %v2899_v27 }
 0x8df   :  { %v3345_v20 = vsel %vm2087_vm8, %v3333_v42, 0  ;;  %5615 = vmatpush3.bf16.xpose.msra.mxu1 %v2906_v41  ;;  %5616 = vmatprep.mubr.msk.bf16.mxu1 %vm6563_vm0, %v6562_v33  ;;  %v3334_v30 = vpack.c.bf16 %v2866_v46, %v2866_v46 }
 0x8e0   :  { %5633 = vmatpush3.bf16.msra.mxu0 %v3345_v20  ;;  %5626 = vmatprep.subr.bf16.mxu1 %v6562_v33 }
 0x8e1   :  { %v5582_v47 = vpop.f32.mrb[72].mxu0  ;;  %5634 = vmatprep.mubr.msk.bf16.mxu0 %vm6563_vm0, %v6562_v33  ;;  %5644 = vmatprep.subr.bf16.mxu0 %v6562_v33  ;;  %v3391_v60 = vsel %vm2087_vm8, %v3334_v30, 0 }
 0x8e2   :  { %v7322_v48 = vadd.f32 %v5582_v47, %v4921_v32  ;;  %v2878_v49 = vpop.f32.mrb[73].mxu0 }
 0x8e3   :  { %v7324_v50 = vadd.f32 %v4921_v32, %v2878_v49  ;;  %v5583_v51 = vpop.f32.mrb[74].mxu0 }
 0x8e4   :  { %v7326_v53 = vadd.f32 %v5583_v51, %v4921_v32  ;;  %v2881_v39 = vpop.f32.mrb[75].mxu0 }
 0x8e5   :  { %v7328_v57 = vadd.f32 %v4921_v32, %v2881_v39 }
 0x8e6   :  { %5617 = vmatmul.mubr.bf16.vlgmr.msra.gmra.mrb[80].mxu1 %v2898_v52 }
 0x8e7   :  { %5627 = vmatpush3.bf16.xpose.msra.mxu1 %v2908_v54  ;;  %5628 = vmatprep.mubr.msk.bf16.mxu1 %vm6563_vm0, %v6562_v33 }
 0x8e8   :  { %5638 = vmatprep.subr.bf16.mxu1 %v6562_v33 }
 0x8ee   :  { %5629 = vmatmul.mubr.bf16.vlgmr.msra.gmra.mrb[84].mxu1 %v2900_v59 }
 0x8ef   :  { %5639 = vmatpush3.bf16.msra.mxu1 %v3391_v60  ;;  %5640 = vmatprep.mubr.msk.bf16.mxu1 %vm6563_vm0, %v6562_v33 }
 0x8f0   :  { %5650 = vmatprep.subr.bf16.mxu1 %v6562_v33 }
 0x999   :  { %v2943_v62 = vpop.f32.mrb[64].mxu1 }
 0x99a   :  { %v3229_v1 = vmul.f32 0.125, %v2943_v62  ;;  %v5588_v6 = vpop.f32.mrb[65].mxu1 }
 0x99b   :  { %v2946_v0 = vpop.f32.mrb[66].mxu1 }
 0x99c   :  { %v5589_v7 = vpop.f32.mrb[67].mxu1  ;;  %v3237_v55 = vsel %vm1979_vm10, %v3229_v1, -inf }
 0x99d   :  { %3238 = vmax.xlane.f32.xlu0 %v3237_v55 }
 0x9a1   :  { %v2983_v9 = vpop.f32.mrb[68].mxu1 }
 0x9a2   :  { %v3230_v10 = vmul.f32 0.125, %v2983_v9  ;;  %v5594_v11 = vpop.f32.mrb[69].mxu1 }
 0x9a3   :  { %v2986_v12 = vpop.f32.mrb[70].mxu1 }
 0x9a4   :  { %v5595_v8 = vpop.f32.mrb[71].mxu1  ;;  %v3240_v14 = vsel %vm1979_vm10, %v3230_v10, -inf }
 0x9a5   :  { %3241 = vmax.xlane.f32.xlu1 %v3240_v14 }
 0x9a9   :  { %v3023_v15 = vpop.f32.mrb[72].mxu1  ;;  %v3103_v16 = vpop.f32.mrb[76].mxu0 }
 0x9aa   :  { %v3231_v18 = vmul.f32 0.125, %v3023_v15  ;;  %v5600_v19 = vpop.f32.mrb[73].mxu1  ;;  %v5612_v21 = vpop.f32.mrb[77].mxu0  ;;  %v3233_v25 = vmul.f32 0.125, %v3103_v16 }
 0x9ab   :  { %v3026_v24 = vpop.f32.mrb[74].mxu1  ;;  %v3106_v17 = vpop.f32.mrb[78].mxu0 }
 0x9ac   :  { %v5601_v28 = vpop.f32.mrb[75].mxu1  ;;  %v5613_v45 = vpop.f32.mrb[79].mxu0  ;;  %v3243_v31 = vsel %vm1979_vm10, %v3231_v18, -inf  ;;  %v3249_v32 = vsel %vm1979_vm10, %v3233_v25, -inf }
 0x9ad   :  { %3244 = vmax.xlane.f32.xlu0 %v3243_v31 }
 0x9b1   :  { %v3183_v61 = vpop.f32.mrb[80].mxu0  ;;  %3250 = vmax.xlane.f32.xlu0 %v3249_v32  ;;  %v3063_v34 = vpop.f32.mrb[76].mxu1 }
 0x9b2   :  { %v3235_v35 = vmul.f32 0.125, %v3183_v61  ;;  %v3232_v36 = vmul.f32 0.125, %v3063_v34  ;;  %v5606_v23 = vpop.f32.mrb[77].mxu1  ;;  %v5624_v63 = vpop.f32.mrb[81].mxu0 }
 0x9b3   :  { %v3066_v56 = vpop.f32.mrb[78].mxu1  ;;  %v3186_v38 = vpop.f32.mrb[82].mxu0 }
 0x9b4   :  { %v5607_v27 = vpop.f32.mrb[79].mxu1  ;;  %v5625_v26 = vpop.f32.mrb[83].mxu0  ;;  %v3255_v41 = vsel %vm1979_vm10, %v3235_v35, -inf  ;;  %v3246_v42 = vsel %vm1979_vm10, %v3232_v36, -inf }
 0x9b5   :  { %3256 = vmax.xlane.f32.xlu0 %v3255_v41  ;;  %3247 = vmax.xlane.f32.xlu1 %v3246_v42 }
 0x9b9   :  { %v3143_v20 = vpop.f32.mrb[80].mxu1 }
 0x9ba   :  { %v3234_v43 = vmul.f32 0.125, %v3143_v20  ;;  %v5618_v44 = vpop.f32.mrb[81].mxu1 }
 0x9bb   :  { %v3146_v47 = vpop.f32.mrb[82].mxu1 }
 0x9bc   :  { %v5619_v49 = vpop.f32.mrb[83].mxu1  ;;  %v3252_v51 = vsel %vm1979_vm10, %v3234_v43, -inf }
 0x9bd   :  { %3253 = vmax.xlane.f32.xlu1 %v3252_v51  ;;  %v3335_v51 = vpack.c.bf16 %v7309_v13, %v7309_v13 }
 0x9c1   :  { %v3223_v52 = vpop.f32.mrb[84].mxu1 }
 0x9c2   :  { %v3236_v39 = vmul.f32 0.125, %v3223_v52  ;;  %v5630_v54 = vpop.f32.mrb[85].mxu1 }
 0x9c3   :  { %v3226_v46 = vpop.f32.mrb[86].mxu1  ;;  %v3437_v54 = vsel %vm2087_vm8, %v3335_v51, 0  ;;  %v5855_v51 = vld [vmem:[#allocation32 + $0x8c] ss:$16 sps:$4 sm:$0xff]  }
 0x9c4   :  { %v5631_v58 = vpop.f32.mrb[87].mxu1  ;;  %v3258_v30 = vsel %vm1979_vm10, %v3236_v39, -inf }
 0x9c5   :  { %3259 = vmax.xlane.f32.xlu1 %v3258_v30  ;;  %v3336_v30 = vpack.c.bf16 %v7311_v40, %v7311_v40  ;;  %v3337_v40 = vpack.c.bf16 %v7324_v50, %v7324_v50  ;;  %v3339_v50 = vpack.c.bf16 %v7322_v48, %v7322_v48 }
 0xa2a   :  { %v3239_v59 = vpop.xlane.xlu0 %3238 }
 0xa2b   :  { %v3261_v60 = vsub.f32 %v3229_v1, %v3239_v59 }
 0xa2d   :  { %v3269_v62 = vmul.f32 1.442695, %v3261_v60 }
 0xa2f   :  { %5970 = vpow2.f32 %v3269_v62  ;;  %v3483_v62 = vsel %vm2087_vm8, %v3336_v30, 0  ;;  %v5859_v30 = vld [vmem:[#allocation32 + $0xa8] ss:$16 sps:$4 sm:$0xff]  }
 0xa32   :  { %v3242_v6 = vpop.xlane.xlu1 %3241 }
 0xa33   :  { %v3262_v0 = vsub.f32 %v3230_v10, %v3242_v6 }
 0xa35   :  { %v3271_v7 = vmul.f32 1.442695, %v3262_v0 }
 0xa37   :  { %5972 = vpow2.f32 %v3271_v7 }
 0xa39   :  { %v5971_v55 = vpop.eup %5970 }
 0xa3a   :  { %v3245_v9 = vpop.xlane.xlu0 %3244  ;;  %v3285_v11 = vsel %vm1979_vm10, %v5971_v55, 0.0 }
 0xa3b   :  { %v3263_v12 = vsub.f32 %v3231_v18, %v3245_v9  ;;  %3286 = vadd.xlane.f32.xlu0 %v3285_v11 }
 0xa3d   :  { %v3273_v8 = vmul.f32 1.442695, %v3263_v12  ;;  %v3529_v12 = vsel %vm2087_vm8, %v3337_v40, 0  ;;  %v5873_v40 = vld [vmem:[#allocation32 + $0xec] ss:$16 sps:$4 sm:$0xff]  }
 0xa3e   :  { %v3251_v14 = vpop.xlane.xlu0 %3250 }
 0xa3f   :  { %5974 = vpow2.f32 %v3273_v8  ;;  %v3265_v15 = vsub.f32 %v3233_v25, %v3251_v14 }
 0xa41   :  { %v5973_v16 = vpop.eup %5972  ;;  %v3277_v19 = vmul.f32 1.442695, %v3265_v15 }
 0xa42   :  { %v3257_v21 = vpop.xlane.xlu0 %3256  ;;  %v3248_v1 = vpop.xlane.xlu1 %3247  ;;  %v3288_v24 = vsel %vm1979_vm10, %v5973_v16, 0.0 }
 0xa43   :  { %5976 = vpow2.f32 %v3277_v19  ;;  %v3267_v10 = vsub.f32 %v3235_v35, %v3257_v21  ;;  %v3264_v17 = vsub.f32 %v3232_v36, %v3248_v1  ;;  %3289 = vadd.xlane.f32.xlu1 %v3288_v24 }
 0xa45   :  { %v3281_v28 = vmul.f32 1.442695, %v3267_v10  ;;  %v3275_v45 = vmul.f32 1.442695, %v3264_v17  ;;  %v3621_v10 = vsel %vm2087_vm8, %v3339_v50, 0 }
 0xa47   :  { %5978 = vpow2.f32 %v3281_v28 }
 0xa48   :  { %5980 = vpow2.f32 %v3275_v45 }
 0xa49   :  { %v5975_v18 = vpop.eup %5974 }
 0xa4a   :  { %v3254_v31 = vpop.xlane.xlu1 %3253  ;;  %v3291_v32 = vsel %vm1979_vm10, %v5975_v18, 0.0 }
 0xa4b   :  { %v3266_v61 = vsub.f32 %v3234_v43, %v3254_v31  ;;  %3292 = vadd.xlane.f32.xlu0 %v3291_v32 }
 0xa4d   :  { %v5977_v25 = vpop.eup %5976  ;;  %v3279_v34 = vmul.f32 1.442695, %v3266_v61 }
 0xa4e   :  { %v3297_v23 = vsel %vm1979_vm10, %v5977_v25, 0.0 }
 0xa4f   :  { %5982 = vpow2.f32 %v3279_v34  ;;  %3298 = vadd.xlane.f32.xlu0 %v3297_v23 }
 0xa51   :  { %v7351_v63 = vpop.eup %5978 }
 0xa52   :  { %v5981_v35 = vpop.eup %5980  ;;  %v3260_v36 = vpop.xlane.xlu1 %3259  ;;  %v3303_v56 = vsel %vm1979_vm10, %v7351_v63, 0.0 }
 0xa53   :  { %v3268_v38 = vsub.f32 %v3236_v39, %v3260_v36  ;;  %3304 = vadd.xlane.f32.xlu0 %v3303_v56  ;;  %v3294_v27 = vsel %vm1979_vm10, %v5981_v35, 0.0  ;;  %v5829_v36 = vld [vmem:[#allocation32 + $0x8] ss:$16 sps:$4 sm:$0xff]   ;;  %v5834_v56 = vld [vmem:[#allocation32 + $0x24] ss:$16 sps:$4 sm:$0xff]  }
 0xa54   :  { %3295 = vadd.xlane.f32.xlu1 %v3294_v27  ;;  %v5832_v27 = vld [vmem:[#allocation32 + $0x20] ss:$16 sps:$4 sm:$0xff]  }
 0xa55   :  { %v3283_v26 = vmul.f32 1.442695, %v3268_v38  ;;  %v5837_v38 = vld [vmem:[#allocation32 + $0x2c] ss:$16 sps:$4 sm:$0xff]  }
 0xa57   :  { %5984 = vpow2.f32 %v3283_v26  ;;  %v5840_v26 = vld [vmem:[#allocation32 + $0x44] ss:$16 sps:$4 sm:$0xff]  }
 0xa59   :  { %v7356_v41 = vpop.eup %5982 }
 0xa5a   :  { %v3300_v42 = vsel %vm1979_vm10, %v7356_v41, 0.0 }
 0xa5b   :  { %3301 = vadd.xlane.f32.xlu1 %v3300_v42  ;;  %v5838_v42 = vld [vmem:[#allocation32 + $0x40] ss:$16 sps:$4 sm:$0xff]  }
 0xa61   :  { %v7360_v20 = vpop.eup %5984 }
 0xa62   :  { %v3306_v43 = vsel %vm1979_vm10, %v7360_v20, 0.0 }
 0xa63   :  { %3307 = vadd.xlane.f32.xlu1 %v3306_v43  ;;  %v5849_v43 = vld [vmem:[#allocation32 + $0x6c] ss:$16 sps:$4 sm:$0xff]  }
 0xac8   :  { %v3287_v44 = vpop.xlane.xlu0 %3286 }
 0xac9   :  { %5986 = vrcp.f32 %v3287_v44  ;;  %v5844_v44 = vld [vmem:[#allocation32 + $0x60] ss:$16 sps:$4 sm:$0xff]  }
 0xad0   :  { %v3290_v47 = vpop.xlane.xlu1 %3289 }
 0xad1   :  { %5988 = vrcp.f32 %v3290_v47  ;;  %v5847_v47 = vld [vmem:[#allocation32 + $0x68] ss:$16 sps:$4 sm:$0xff]  }
 0xad3   :  { %v5987_v49 = vpop.eup %5986 }
 0xad4   :  { %v3317_v52 = vmul.f32 %v5987_v49, %v5971_v55  ;;  %v5852_v49 = vld [vmem:[#allocation32 + $0x84] ss:$16 sps:$4 sm:$0xff]  }
 0xad6   :  { %v3325_v39 = vpack.c.bf16 %v3317_v52, %v3317_v52  ;;  %v5850_v52 = vld [vmem:[#allocation32 + $0x80] ss:$16 sps:$4 sm:$0xff]  }
 0xad8   :  { %5635 = vmatmul.mubr.msk.bf16.vlgmr.msra.gmra.mrb[84].mxu0 %vm1979_vm10, %v3325_v39  ;;  %v3293_v46 = vpop.xlane.xlu0 %3292  ;;  %v5853_v39 = vld [vmem:[#allocation32 + $0x88] ss:$16 sps:$4 sm:$0xff]  }
 0xad9   :  { %5645 = vmatpush3.bf16.msra.mxu0 %v3437_v54  ;;  %5990 = vrcp.f32 %v3293_v46  ;;  %5646 = vmatprep.mubr.msk.bf16.mxu0 %vm6563_vm0, %v6562_v33  ;;  %v5858_v54 = vld [vmem:[#allocation32 + $0xa4] ss:$16 sps:$4 sm:$0xff]   ;;  %v5861_v46 = vld [vmem:[#allocation32 + $0xac] ss:$16 sps:$4 sm:$0xff]  }
 0xada   :  { %5656 = vmatprep.subr.bf16.mxu0 %v6562_v33 }
 0xadb   :  { %v5989_v58 = vpop.eup %5988 }
 0xadc   :  { %v3318_v59 = vmul.f32 %v5989_v58, %v5973_v16  ;;  %v3299_v13 = vpop.xlane.xlu0 %3298  ;;  %v3338_v16 = vpack.c.bf16 %v7328_v57, %v7328_v57  ;;  %v5856_v58 = vld [vmem:[#allocation32 + $0xa0] ss:$16 sps:$4 sm:$0xff]  }
 0xadd   :  { %5992 = vrcp.f32 %v3299_v13  ;;  %v5867_v13 = vld [vmem:[#allocation32 + $0xcc] ss:$16 sps:$4 sm:$0xff]  }
 0xade   :  { %v3326_v60 = vpack.c.bf16 %v3318_v59, %v3318_v59  ;;  %v3575_v28 = vsel %vm2087_vm8, %v3338_v16, 0  ;;  %v5864_v59 = vld [vmem:[#allocation32 + $0xc4] ss:$16 sps:$4 sm:$0xff]  }
 0xae0   :  { %5641 = vmatmul.mubr.msk.bf16.vlgmr.msra.gmra.mrb[88].mxu1 %vm1979_vm10, %v3326_v60  ;;  %v3305_v0 = vpop.xlane.xlu0 %3304  ;;  %v5862_v60 = vld [vmem:[#allocation32 + $0xc0] ss:$16 sps:$4 sm:$0xff]  }
 0xae1   :  { %5651 = vmatpush3.bf16.msra.mxu1 %v3483_v62  ;;  %v3296_v6 = vpop.xlane.xlu1 %3295  ;;  %5652 = vmatprep.mubr.msk.bf16.mxu1 %vm6563_vm0, %v6562_v33  ;;  %v5865_v62 = vld [vmem:[#allocation32 + $0xc8] ss:$16 sps:$4 sm:$0xff]  }
 0xae2   :  { %5994 = vrcp.f32 %v3296_v6  ;;  %5662 = vmatprep.subr.bf16.mxu1 %v6562_v33  ;;  %v5868_v6 = vld [vmem:[#allocation32 + $0xe0] ss:$16 sps:$4 sm:$0xff]  }
 0xae3   :  { %v5991_v7 = vpop.eup %5990  ;;  %5996 = vrcp.f32 %v3305_v0  ;;  %v5870_v0 = vld [vmem:[#allocation32 + $0xe4] ss:$16 sps:$4 sm:$0xff]  }
 0xae4   :  { %v3319_v55 = vmul.f32 %v5991_v7, %v5975_v18  ;;  %v3340_v18 = vpack.c.bf16 %v7326_v53, %v7326_v53  ;;  %v5828_v53 = vld [vmem:[#allocation32 + $0x4] ss:$16 sps:$4 sm:$0xff]   ;;  %v5871_v7 = vld [vmem:[#allocation32 + $0xe8] ss:$16 sps:$4 sm:$0xff]  }
 0xae6   :  { %v3327_v9 = vpack.c.bf16 %v3319_v55, %v3319_v55  ;;  %v3667_v61 = vsel %vm2087_vm8, %v3340_v18, 0  ;;  %v5874_v55 = vld [vmem:[#allocation35 + $0x40] sm:$0xff]  }
 0xae7   :  { %v5993_v11 = vpop.eup %5992 }
 0xae8   :  { %5647 = vmatmul.mubr.msk.bf16.vlgmr.msra.gmra.mrb[88].mxu0 %vm1979_vm10, %v3327_v9  ;;  %v3302_v8 = vpop.xlane.xlu1 %3301  ;;  %v3321_v14 = vmul.f32 %v5993_v11, %v5977_v25  ;;  %v5875_v9 = vld [vmem:[#allocation35 + $0xc0] sm:$0xff]  }
 0xae9   :  { %5657 = vmatpush3.bf16.msra.mxu0 %v3529_v12  ;;  %5998 = vrcp.f32 %v3302_v8  ;;  %5658 = vmatprep.mubr.msk.bf16.mxu0 %vm6563_vm0, %v6562_v33 }
 0xaea   :  { %5668 = vmatprep.subr.bf16.mxu0 %v6562_v33  ;;  %v3329_v21 = vpack.c.bf16 %v3321_v14, %v3321_v14 }
 0xaec   :  { %v5995_v15 = vpop.eup %5994 }
 0xaed   :  { %v3320_v19 = vmul.f32 %v5995_v15, %v5981_v35  ;;  %v5997_v1 = vpop.eup %5996  ;;  %v5826_v35 = vld [vmem:[#allocation32] ss:$16 sps:$4 sm:$0xff]  }
 0xaee   :  { %v3323_v48 = vmul.f32 %v5997_v1, %v7351_v63  ;;  %v5831_v63 = vld [vmem:[#allocation32 + $0xc] ss:$16 sps:$4 sm:$0xff]  }
 0xaef   :  { %v3328_v24 = vpack.c.bf16 %v3320_v19, %v3320_v19 }
 0xaf0   :  { %5659 = vmatmul.mubr.msk.bf16.vlgmr.msra.gmra.mrb[92].mxu0 %vm1979_vm10, %v3329_v21  ;;  %v3308_v17 = vpop.xlane.xlu1 %3307  ;;  %v3331_v31 = vpack.c.bf16 %v3323_v48, %v3323_v48 }
 0xaf1   :  { %5653 = vmatmul.mubr.msk.bf16.vlgmr.msra.gmra.mrb[92].mxu1 %vm1979_vm10, %v3328_v24  ;;  %5669 = vmatpush3.bf16.msra.mxu0 %v3621_v10  ;;  %6000 = vrcp.f32 %v3308_v17 }
 0xaf2   :  { %5663 = vmatpush3.bf16.msra.mxu1 %v3575_v28  ;;  %5664 = vmatprep.mubr.msk.bf16.mxu1 %vm6563_vm0, %v6562_v33 }
 0xaf3   :  { %v5999_v57 = vpop.eup %5998  ;;  %5670 = vmatprep.mubr.msk.bf16.mxu0 %vm6563_vm0, %v6562_v33  ;;  %5674 = vmatprep.subr.bf16.mxu1 %v6562_v33 }
 0xaf4   :  { %v3322_v45 = vmul.f32 %v5999_v57, %v7356_v41  ;;  %4013 = vmatprep.subr.bf16.mxu0 %v5828_v53  ;;  %v5843_v41 = vld [vmem:[#allocation32 + $0x4c] ss:$16 sps:$4 sm:$0xff]  }
 0xaf6   :  { %v3330_v32 = vpack.c.bf16 %v3322_v45, %v3322_v45 }
 0xaf8   :  { %5671 = vmatmul.mubr.msk.bf16.vlgmr.msra.gmra.mrb[96].mxu0 %vm1979_vm10, %v3331_v31 }
 0xaf9   :  { %5665 = vmatmul.mubr.msk.bf16.vlgmr.msra.gmra.mrb[96].mxu1 %vm1979_vm10, %v3330_v32  ;;  %4045 = vmatprep.mubr.bf16.mxu0 %v6564_v22 }
 0xafa   :  { %5675 = vmatpush3.bf16.msra.mxu1 %v3667_v61  ;;  %5676 = vmatprep.mubr.msk.bf16.mxu1 %vm6563_vm0, %v6562_v33  ;;  %v5835_v33 = vld [vmem:[#allocation32 + $0x28] ss:$16 sps:$4 sm:$0xff]  }
 0xafb   :  { %v6001_v25 = vpop.eup %6000  ;;  %4054 = vmatprep.subr.bf16.mxu1 %v5831_v63  ;;  %4014 = vmatpush1.bf16.msra.mxu0 %v5826_v35 }
 0xafc   :  { %v3324_v34 = vmul.f32 %v6001_v25, %v7360_v20  ;;  %4015 = vmatprep.subr.bf16.mxu0 %v5834_v56  ;;  %v5846_v20 = vld [vmem:[#allocation32 + $0x64] ss:$16 sps:$4 sm:$0xff]  }
 0xafe   :  { %v3332_v23 = vpack.c.bf16 %v3324_v34, %v3324_v34 }
 0xaff   :  { %4016 = vmatpush1.bf16.msra.mxu0 %v5832_v27 }
 0xb00   :  { %4017 = vmatprep.subr.bf16.mxu0 %v5840_v26 }
 0xb01   :  { %5677 = vmatmul.mubr.msk.bf16.vlgmr.msra.gmra.mrb[100].mxu1 %vm1979_vm10, %v3332_v23 }
 0xb02   :  { %4086 = vmatprep.mubr.bf16.mxu1 %v6564_v22  ;;  %4055 = vmatpush1.bf16.msra.mxu1 %v5829_v36  ;;  %v5841_v22 = vld [vmem:[#allocation32 + $0x48] ss:$16 sps:$4 sm:$0xff]  }
 0xb03   :  { %4056 = vmatprep.subr.bf16.mxu1 %v5837_v38  ;;  %4018 = vmatpush1.bf16.msra.mxu0 %v5838_v42 }
 0xb04   :  { %4019 = vmatprep.subr.bf16.mxu0 %v5846_v20 }
 0xb06   :  { %4057 = vmatpush1.bf16.msra.mxu1 %v5835_v33 }
 0xb07   :  { %4058 = vmatprep.subr.bf16.mxu1 %v5843_v41  ;;  %4020 = vmatpush1.bf16.msra.mxu0 %v5844_v44 }
 0xb08   :  { %4021 = vmatprep.subr.bf16.mxu0 %v5852_v49 }
 0xb0a   :  { %4059 = vmatpush1.bf16.msra.mxu1 %v5841_v22 }
 0xb0b   :  { %4060 = vmatprep.subr.bf16.mxu1 %v5849_v43  ;;  %4022 = vmatpush1.bf16.msra.mxu0 %v5850_v52 }
 0xb0c   :  { %4023 = vmatprep.subr.bf16.mxu0 %v5858_v54 }
 0xb0e   :  { %4061 = vmatpush1.bf16.msra.mxu1 %v5847_v47 }
 0xb0f   :  { %4062 = vmatprep.subr.bf16.mxu1 %v5855_v51  ;;  %4024 = vmatpush1.bf16.msra.mxu0 %v5856_v58 }
 0xb10   :  { %4025 = vmatprep.subr.bf16.mxu0 %v5864_v59 }
 0xb12   :  { %4063 = vmatpush1.bf16.msra.mxu1 %v5853_v39 }
 0xb13   :  { %4064 = vmatprep.subr.bf16.mxu1 %v5861_v46  ;;  %4026 = vmatpush1.bf16.msra.mxu0 %v5862_v60 }
 0xb14   :  { %4027 = vmatprep.subr.bf16.mxu0 %v5870_v0 }
 0xb16   :  { %4065 = vmatpush1.bf16.msra.mxu1 %v5859_v30 }
 0xb17   :  { %4066 = vmatprep.subr.bf16.mxu1 %v5867_v13  ;;  %4028 = vmatpush1.bf16.msra.mxu0 %v5868_v6 }
 0xb18   :  { %5204 = vmatprep.subr.bf16.mxu0 %v5874_v55 }
 0xb1a   :  { %4067 = vmatpush1.bf16.msra.mxu1 %v5865_v62 }
 0xb1b   :  { %4068 = vmatprep.subr.bf16.mxu1 %v5873_v40 }
 0xb1e   :  { %4069 = vmatpush1.bf16.msra.mxu1 %v5871_v7 }
 0xb1f   :  { %5226 = vmatprep.subr.bf16.mxu1 %v5875_v9 }
 0xbab   :  { %v3381_v11 = vpop.f32.mrb[84].mxu0 }
 0xbac   :  { %v3709_v12 = vrot.slane %v3381_v11, 4  ;;  %v5636_v8 = vpop.f32.mrb[85].mxu0 }
 0xbad   :  { %v3384_v14 = vpop.f32.mrb[86].mxu0 }
 0xbae   :  { %v3710_v15 = vadd.f32 %v3709_v12, %v3381_v11  ;;  %v5637_v50 = vpop.f32.mrb[87].mxu0 }
 0xbb0   :  { %v3711_v16 = vrot.slane %v3710_v15, 2 }
 0xbb2   :  { %v3712_v19 = vadd.f32 %v3711_v16, %v3710_v15 }
 0xbb3   :  { %v3427_v21 = vpop.f32.mrb[88].mxu1 }
 0xbb4   :  { %v3713_v1 = vrot.slane %v3712_v19, 1  ;;  %v3715_v24 = vrot.slane %v3427_v21, 4  ;;  %v5642_v10 = vpop.f32.mrb[89].mxu1 }
 0xbb5   :  { %v3430_v17 = vpop.f32.mrb[90].mxu1 }
 0xbb6   :  { %v3716_v28 = vadd.f32 %v3715_v24, %v3427_v21  ;;  %v5643_v48 = vpop.f32.mrb[91].mxu1  ;;  %v3714_v57 = vadd.f32 %v3713_v1, %v3712_v19 }
 0xbb8   :  { %v3717_v45 = vrot.slane %v3716_v28, 2  ;;  %v3758_v32 = vmul.f32 0.125, %v3714_v57 }
 0xbba   :  { %v3718_v18 = vadd.f32 %v3717_v45, %v3716_v28  ;;  %v3766_v36 = vpack.c.bf16 %v3758_v32, %v3758_v32 }
 0xbbb   :  { %v3473_v31 = vpop.f32.mrb[88].mxu0 }
 0xbbc   :  { %v3719_v61 = vrot.slane %v3718_v18, 1  ;;  %v3721_v25 = vrot.slane %v3473_v31, 4  ;;  %v5648_v34 = vpop.f32.mrb[89].mxu0  ;;  %v3836_v41 = vunpack.c.l.b16 %v3766_v36 }
 0xbbd   :  { %v3476_v23 = vpop.f32.mrb[90].mxu0 }
 0xbbe   :  { %v3720_v53 = vadd.f32 %v3719_v61, %v3718_v18  ;;  %v3722_v63 = vadd.f32 %v3721_v25, %v3473_v31  ;;  %v5649_v35 = vpop.f32.mrb[91].mxu0 }
 0xbc0   :  { %v3759_v56 = vmul.f32 0.125, %v3720_v53  ;;  %v3723_v38 = vrot.slane %v3722_v63, 2 }
 0xbc2   :  { %v3767_v27 = vpack.c.bf16 %v3759_v56, %v3759_v56  ;;  %v3724_v33 = vadd.f32 %v3723_v38, %v3722_v63 }
 0xbc3   :  { %v3565_v26 = vpop.f32.mrb[92].mxu0 }
 0xbc4   :  { %v3837_v42 = vunpack.c.l.b16 %v3767_v27  ;;  %v3725_v22 = vrot.slane %v3724_v33, 1  ;;  %v3519_v20 = vpop.f32.mrb[92].mxu1  ;;  %v3733_v43 = vrot.slane %v3565_v26, 4  ;;  %v5660_v44 = vpop.f32.mrb[93].mxu0 }
 0xbc5   :  { %v3727_v47 = vrot.slane %v3519_v20, 4  ;;  %v5654_v49 = vpop.f32.mrb[93].mxu1  ;;  %v3568_v51 = vpop.f32.mrb[94].mxu0 }
 0xbc6   :  { %v3844_v52 = vsel %vm685_vm1, %v3837_v42, %v3836_v41  ;;  %v3726_v39 = vadd.f32 %v3725_v22, %v3724_v33  ;;  %v3734_v54 = vadd.f32 %v3733_v43, %v3565_v26  ;;  %v3522_v46 = vpop.f32.mrb[94].mxu1  ;;  %v5661_v58 = vpop.f32.mrb[95].mxu0 }
 0xbc7   :  { %v3728_v30 = vadd.f32 %v3727_v47, %v3519_v20  ;;  %v5655_v59 = vpop.f32.mrb[95].mxu1 }
 0xbc8   :  { %v3760_v13 = vmul.f32 0.125, %v3726_v39  ;;  %v3735_v60 = vrot.slane %v3734_v54, 2 }
 0xbc9   :  { %v3729_v62 = vrot.slane %v3728_v30, 2 }
 0xbca   :  { %v3768_v6 = vpack.c.bf16 %v3760_v13, %v3760_v13  ;;  %v3736_v0 = vadd.f32 %v3735_v60, %v3734_v54 }
 0xbcb   :  { %v3730_v7 = vadd.f32 %v3729_v62, %v3728_v30  ;;  %v3657_v40 = vpop.f32.mrb[96].mxu0 }
 0xbcc   :  { %v3838_v55 = vunpack.c.l.b16 %v3768_v6  ;;  %v3737_v9 = vrot.slane %v3736_v0, 1  ;;  %v3611_v11 = vpop.f32.mrb[96].mxu1  ;;  %v3745_v12 = vrot.slane %v3657_v40, 4  ;;  %v5672_v8 = vpop.f32.mrb[97].mxu0 }
 0xbcd   :  { %v3731_v14 = vrot.slane %v3730_v7, 1  ;;  %v3739_v15 = vrot.slane %v3611_v11, 4  ;;  %v5666_v50 = vpop.f32.mrb[97].mxu1  ;;  %v3660_v16 = vpop.f32.mrb[98].mxu0  ;;  %v5882_v8 = vld [vmem:[#allocation35 + $0x50] sm:$0xff]  }
 0xbce   :  { %v3845_v19 = vsel %vm687_vm2, %v3838_v55, %v3844_v52  ;;  %v3738_v21 = vadd.f32 %v3737_v9, %v3736_v0  ;;  %v3746_v1 = vadd.f32 %v3745_v12, %v3657_v40  ;;  %v3614_v24 = vpop.f32.mrb[98].mxu1  ;;  %v5673_v10 = vpop.f32.mrb[99].mxu0  ;;  %v5876_v0 = vld [vmem:[#allocation35] sm:$0xff]   ;;  %v5878_v55 = vld [vmem:[#allocation35 + $0x48] sm:$0xff]   ;;  %v5885_v50 = vld [vmem:[#allocation35 + $0x90] sm:$0xff]  }
 0xbcf   :  { %v3732_v17 = vadd.f32 %v3731_v14, %v3730_v7  ;;  %v3740_v28 = vadd.f32 %v3739_v15, %v3611_v11  ;;  %v5667_v48 = vpop.f32.mrb[99].mxu1  ;;  %v5877_v7 = vld [vmem:[#allocation35 + $0x80] sm:$0xff]   ;;  %v5879_v9 = vld [vmem:[#allocation35 + $0xc8] sm:$0xff]   ;;  %v5883_v14 = vld [vmem:[#allocation35 + $0xd0] sm:$0xff]  }
 0xbd0   :  { %v3762_v57 = vmul.f32 0.125, %v3738_v21  ;;  %v3747_v45 = vrot.slane %v3746_v1, 2  ;;  %v5880_v11 = vld [vmem:[#allocation35 + $0x8] sm:$0xff]   ;;  %v5884_v15 = vld [vmem:[#allocation35 + $0x10] sm:$0xff]   ;;  %v5886_v16 = vld [vmem:[#allocation35 + $0x58] sm:$0xff]  }
 0xbd1   :  { %v3761_v18 = vmul.f32 0.125, %v3732_v17  ;;  %v3741_v31 = vrot.slane %v3740_v28, 2  ;;  %v5881_v12 = vld [vmem:[#allocation35 + $0x88] sm:$0xff]   ;;  %v5888_v21 = vld [vmem:[#allocation35 + $0x18] sm:$0xff]   ;;  %v5890_v24 = vld [vmem:[#allocation35 + $0x60] sm:$0xff]  }
 0xbd2   :  { %v3770_v32 = vpack.c.bf16 %v3762_v57, %v3762_v57  ;;  %v3748_v61 = vadd.f32 %v3747_v45, %v3746_v1  ;;  %v5889_v1 = vld [vmem:[#allocation35 + $0x98] sm:$0xff]   ;;  %v5891_v10 = vld [vmem:[#allocation35 + $0xe0] sm:$0xff]   ;;  %v5894_v48 = vld [vmem:[#allocation35 + $0x68] sm:$0xff]  }
 0xbd3   :  { %v3769_v25 = vpack.c.bf16 %v3761_v18, %v3761_v18  ;;  %v3742_v34 = vadd.f32 %v3741_v31, %v3740_v28  ;;  %v5892_v17 = vld [vmem:[#allocation35 + $0x20] sm:$0xff]   ;;  %v5895_v57 = vld [vmem:[#allocation35 + $0xe8] sm:$0xff]   ;;  %v5898_v31 = vld [vmem:[#allocation35 + $0x70] sm:$0xff]  }
 0xbd4   :  { %v3840_v23 = vunpack.c.l.b16 %v3770_v32  ;;  %v3749_v53 = vrot.slane %v3748_v61, 1  ;;  %v3703_v63 = vpop.f32.mrb[100].mxu1  ;;  %v5893_v28 = vld [vmem:[#allocation35 + $0xa0] sm:$0xff]   ;;  %v5896_v45 = vld [vmem:[#allocation35 + $0x28] sm:$0xff]   ;;  %v5899_v32 = vld [vmem:[#allocation35 + $0xf0] sm:$0xff]  }
 0xbd5   :  { %v3839_v35 = vunpack.c.l.b16 %v3769_v25  ;;  %v3743_v36 = vrot.slane %v3742_v34, 1  ;;  %v3751_v56 = vrot.slane %v3703_v63, 4  ;;  %v5678_v38 = vpop.f32.mrb[101].mxu1  ;;  %v5897_v18 = vld [vmem:[#allocation35 + $0xa8] sm:$0xff]   ;;  %v5901_v25 = vld [vmem:[#allocation35 + $0xb0] sm:$0xff]  }
 0xbd6   :  { %v3750_v27 = vadd.f32 %v3749_v53, %v3748_v61  ;;  %v3706_v33 = vpop.f32.mrb[102].mxu1  ;;  %v5900_v61 = vld [vmem:[#allocation35 + $0x30] sm:$0xff]   ;;  %v5904_v53 = vld [vmem:[#allocation35 + $0x38] sm:$0xff]   ;;  %v834_v38 = vsub.s32 2, %v7162_v29 }
 0xbd7   :  { %v3846_v26 = vsel %vm689_vm3, %v3839_v35, %v3845_v19  ;;  %v3744_v41 = vadd.f32 %v3743_v36, %v3742_v34  ;;  %v3752_v42 = vadd.f32 %v3751_v56, %v3703_v63  ;;  %v5679_v22 = vpop.f32.mrb[103].mxu1  ;;  %v5887_v19 = vld [vmem:[#allocation35 + $0xd8] sm:$0xff]   ;;  %v5906_v35 = vld [vmem:[#allocation34 + $0x40] sm:$0xff]   ;;  %v3806_v56 = vld [vmem:[%s7480_s22] sm:$0xf]  ;;  %v838_v33 = vsub.s32 3, %v7162_v29 }
 0xbd8   :  { %v3847_v20 = vsel %vm691_vm4, %v3840_v23, %v3846_v26  ;;  %v3764_v43 = vmul.f32 0.125, %v3750_v27  ;;  %v5902_v34 = vld [vmem:[#allocation35 + $0x78] sm:$0xff]   ;;  %v5907_v36 = vld [vmem:[#allocation34 + $0xc0] sm:$0xff]   ;;  %v830_v27 = vsub.s32 1, %v7162_v29  ;;  %v7427_v26 = vld [vmem:[%s7526_s10] sm:$0xf] }
 0xbd9   :  { %v3763_v44 = vmul.f32 0.125, %v3744_v41  ;;  %v3753_v47 = vrot.slane %v3752_v42, 2  ;;  %v5903_v23 = vld [vmem:[#allocation35 + $0xf8] sm:$0xff]   ;;  %v3811_v41 = vrot.slane %v3806_v56, %v7170_v37 }
 0xbda   :  { %v3772_v49 = vpack.c.bf16 %v3764_v43, %v3764_v43  ;;  %v5905_v63 = vld [vmem:[#allocation35 + $0xb8] sm:$0xff]   ;;  %v3815_v22 = vrot.slane %v3806_v56, %v830_v27  ;;  %v831_v43 = vrot.slane %v7427_v26, %v830_v27 }
 0xbdb   :  { %v3771_v51 = vpack.c.bf16 %v3763_v44, %v3763_v44  ;;  %v3754_v52 = vadd.f32 %v3753_v47, %v3752_v42  ;;  %v3819_v42 = vrot.slane %v3806_v56, %v834_v38  ;;  %v839_v44 = vrot.slane %v7427_v26, %v838_v33  ;;  %v5936_v27 = vld [vmem:[#allocation34 + $0x38] sm:$0xff]  }
 0xbdc   :  { %v3842_v39 = vunpack.c.l.b16 %v3772_v49 }
 0xbdd   :  { %v3841_v54 = vunpack.c.l.b16 %v3771_v51  ;;  %v3755_v46 = vrot.slane %v3754_v52, 1 }
 0xbdf   :  { %v3848_v58 = vsel %vm693_vm5, %v3841_v54, %v3847_v20  ;;  %v3756_v30 = vadd.f32 %v3755_v46, %v3754_v52  ;;  %v3823_v20 = vrot.slane %v3806_v56, %v838_v33  ;;  %v5935_v56 = vld [vmem:[#allocation34 + $0xf8] sm:$0xff]  }
 0xbe0   :  { %v3849_v59 = vsel %vm695_vm6, %v3842_v39, %v3848_v58  ;;  %v5937_v33 = vld [vmem:[#allocation34 + $0xb8] sm:$0xff]  }
 0xbe1   :  { %v3765_v13 = vmul.f32 0.125, %v3756_v30 }
 0xbe3   :  { %v3773_v60 = vpack.c.bf16 %v3765_v13, %v3765_v13  ;;  %v1041_v13 = vadd.f32 %v7098_v4, %v831_v43  ;;  %v5912_v4 = vld [vmem:[#allocation34 + $0x8] sm:$0xff]  }
 0xbe5   :  { %v3843_v62 = vunpack.c.l.b16 %v3773_v60  ;;  %v1082_v60 = vadd.f32 %v7100_v5, %v839_v44  ;;  %v5913_v5 = vld [vmem:[#allocation34 + $0x88] sm:$0xff]  }
 0xbe7   :  { %v3850_v6 = vsel %vm697_vm7, %v3843_v62, %v3849_v59 }
 0xbe8   :  { %v3851_v40 = vpack.c.b16 %v3850_v6, %v3850_v6 }
 0xbea   :  { %4046 = vmatmul.mubr.bf16.vlgmr.msra.gmra.mrb[100].mxu0 %v3851_v40  ;;  %4087 = vmatmul.mubr.bf16.vlgmr.msra.gmra.mrb[104].mxu1 %v3851_v40  ;;  %v5908_v40 = vld [vmem:[#allocation34] sm:$0xff]  }
 0xbeb   :  { %5205 = vmatpush3.bf16.msra.mxu0 %v5876_v0  ;;  %5227 = vmatpush3.bf16.msra.mxu1 %v5877_v7 }
 0xbec   :  { %5206 = vmatprep.subr.bf16.mxu0 %v5878_v55  ;;  %5228 = vmatprep.subr.bf16.mxu1 %v5879_v9  ;;  %v5909_v55 = vld [vmem:[#allocation34 + $0x80] sm:$0xff]  }
 0xbef   :  { %5207 = vmatpush3.bf16.msra.mxu0 %v5880_v11  ;;  %5229 = vmatpush3.bf16.msra.mxu1 %v5881_v12  ;;  %v5910_v12 = vld [vmem:[#allocation34 + $0x48] sm:$0xff]  }
 0xbf0   :  { %5208 = vmatprep.subr.bf16.mxu0 %v5882_v8  ;;  %5230 = vmatprep.subr.bf16.mxu1 %v5883_v14  ;;  %v5911_v8 = vld [vmem:[#allocation34 + $0xc8] sm:$0xff]   ;;  %v4096_v14 = vpack.c.bf16 %v1041_v13, %v1041_v13 }
 0xbf3   :  { %5209 = vmatpush3.bf16.msra.mxu0 %v5884_v15  ;;  %5231 = vmatpush3.bf16.msra.mxu1 %v5885_v50  ;;  %v4098_v15 = vpack.c.bf16 %v1082_v60, %v1082_v60  ;;  %v5914_v50 = vld [vmem:[#allocation34 + $0x50] sm:$0xff]  }
 0xbf4   :  { %5210 = vmatprep.subr.bf16.mxu0 %v5886_v16  ;;  %5232 = vmatprep.subr.bf16.mxu1 %v5887_v19  ;;  %v5915_v16 = vld [vmem:[#allocation34 + $0xd0] sm:$0xff]  }
 0xbf5   :  { %v5916_v19 = vld [vmem:[#allocation34 + $0x10] sm:$0xff]  }
 0xbf7   :  { %5211 = vmatpush3.bf16.msra.mxu0 %v5888_v21  ;;  %5233 = vmatpush3.bf16.msra.mxu1 %v5889_v1  ;;  %v5917_v21 = vld [vmem:[#allocation34 + $0x90] sm:$0xff]   ;;  %v5918_v1 = vld [vmem:[#allocation34 + $0x58] sm:$0xff]  }
 0xbf8   :  { %5212 = vmatprep.subr.bf16.mxu0 %v5890_v24  ;;  %5234 = vmatprep.subr.bf16.mxu1 %v5891_v10  ;;  %v5919_v24 = vld [vmem:[#allocation34 + $0xd8] sm:$0xff]  }
 0xbf9   :  { %v5920_v10 = vld [vmem:[#allocation34 + $0x18] sm:$0xff]  }
 0xbfb   :  { %5213 = vmatpush3.bf16.msra.mxu0 %v5892_v17  ;;  %5235 = vmatpush3.bf16.msra.mxu1 %v5893_v28  ;;  %v5921_v17 = vld [vmem:[#allocation34 + $0x98] sm:$0xff]   ;;  %v5922_v28 = vld [vmem:[#allocation34 + $0x60] sm:$0xff]  }
 0xbfc   :  { %5214 = vmatprep.subr.bf16.mxu0 %v5894_v48  ;;  %5236 = vmatprep.subr.bf16.mxu1 %v5895_v57  ;;  %v5923_v48 = vld [vmem:[#allocation34 + $0xe0] sm:$0xff]  }
 0xbfd   :  { %v5924_v57 = vld [vmem:[#allocation34 + $0x20] sm:$0xff]  }
 0xbff   :  { %5215 = vmatpush3.bf16.msra.mxu0 %v5896_v45  ;;  %5237 = vmatpush3.bf16.msra.mxu1 %v5897_v18  ;;  %v5925_v45 = vld [vmem:[#allocation34 + $0xa0] sm:$0xff]   ;;  %v5926_v18 = vld [vmem:[#allocation34 + $0x68] sm:$0xff]  }
 0xc00   :  { %5216 = vmatprep.subr.bf16.mxu0 %v5898_v31  ;;  %5238 = vmatprep.subr.bf16.mxu1 %v5899_v32  ;;  %v5927_v31 = vld [vmem:[#allocation34 + $0xe8] sm:$0xff]  }
 0xc01   :  { %v5928_v32 = vld [vmem:[#allocation34 + $0x28] sm:$0xff]  }
 0xc03   :  { %5217 = vmatpush3.bf16.msra.mxu0 %v5900_v61  ;;  %5239 = vmatpush3.bf16.msra.mxu1 %v5901_v25  ;;  %v5929_v61 = vld [vmem:[#allocation34 + $0xa8] sm:$0xff]   ;;  %v5930_v25 = vld [vmem:[#allocation34 + $0x70] sm:$0xff]  }
 0xc04   :  { %5218 = vmatprep.subr.bf16.mxu0 %v5902_v34  ;;  %5240 = vmatprep.subr.bf16.mxu1 %v5903_v23  ;;  %v5931_v34 = vld [vmem:[#allocation34 + $0xf0] sm:$0xff]  }
 0xc05   :  { %v5932_v23 = vld [vmem:[#allocation34 + $0x30] sm:$0xff]  }
 0xc07   :  { %5219 = vmatpush3.bf16.msra.mxu0 %v5904_v53  ;;  %5241 = vmatpush3.bf16.msra.mxu1 %v5905_v63  ;;  %v5933_v53 = vld [vmem:[#allocation34 + $0xb0] sm:$0xff]   ;;  %v827_v63 = vrot.slane %v7427_v26, %v7170_v37 }
 0xc08   :  { %5248 = vmatprep.subr.bf16.mxu0 %v5906_v35  ;;  %5270 = vmatprep.subr.bf16.mxu1 %v5907_v36  ;;  %v835_v35 = vrot.slane %v7427_v26, %v834_v38  ;;  %v5934_v36 = vld [vmem:[#allocation34 + $0x78] sm:$0xff]  }
 0xcbd   :  { %v4047_v47 = vpop.f32.mrb[100].mxu0  ;;  %v4088_v49 = vpop.f32.mrb[104].mxu1 }
 0xcbe   :  { %v4048_v51 = vadd.f32 %v4047_v47, %v3811_v41  ;;  %v4089_v52 = vadd.f32 %v4088_v49, %v3819_v42  ;;  %v4049_v39 = vpop.f32.mrb[101].mxu0  ;;  %v4090_v54 = vpop.f32.mrb[105].mxu1  ;;  %v1039_v41 = vadd.f32 %v7094_v2, %v827_v63  ;;  %v1080_v42 = vadd.f32 %v7096_v3, %v835_v35 }
 0xcbf   :  { %v4050_v46 = vadd.f32 %v4049_v39, %v3815_v22  ;;  %v4091_v58 = vadd.f32 %v4090_v54, %v3823_v20  ;;  %v4051_v30 = vpop.f32.mrb[102].mxu0  ;;  %v4092_v59 = vpop.f32.mrb[106].mxu1 }
 0xcc0   :  { %v4052_v62 = vpop.f32.mrb[103].mxu0  ;;  %v4093_v6 = vpop.f32.mrb[107].mxu1  ;;  %v4163_v9 = vpack.c.bf16 %v4048_v51, %v4048_v51  ;;  %v4165_v11 = vpack.c.bf16 %v4089_v52, %v4089_v52  ;;  %v4095_v37 = vpack.c.bf16 %v1039_v41, %v1039_v41  ;;  %v4097_v29 = vpack.c.bf16 %v1080_v42, %v1080_v42 }
 0xcc1   :  { %v4164_v0 = vpack.c.bf16 %v4050_v46, %v4050_v46  ;;  %v4166_v7 = vpack.c.bf16 %v4091_v58, %v4091_v58 }
 0xcc3   :  { %4455 = vmatprep.mubr.bf16.mxu0 %v4164_v0  ;;  %4495 = vmatprep.mubr.bf16.mxu1 %v4166_v7  ;;  %v5034_v0 = vld [vmem:[%s7527_s21] ss:$0 sm:$0xff] }
 0xcc4   :  { %4456 = vmatmul.mubr.bf16.vlgmr.msra.gmra.mrb[104].mxu0 %v4163_v9  ;;  %4496 = vmatmul.mubr.bf16.vlgmr.msra.gmra.mrb[108].mxu1 %v4165_v11 }
 0xcc5   :  { %5249 = vmatpush3.bf16.msra.mxu0 %v5908_v40  ;;  %5271 = vmatpush3.bf16.msra.mxu1 %v5909_v55 }
 0xcc6   :  { %4727 = vmatprep.mubr.bf16.mxu0 %v4096_v14  ;;  %4767 = vmatprep.mubr.bf16.mxu1 %v4098_v15 }
 0xcc7   :  { %5250 = vmatprep.subr.bf16.mxu0 %v5910_v12  ;;  %5272 = vmatprep.subr.bf16.mxu1 %v5911_v8 }
 0xcc9   :  { %5251 = vmatpush3.bf16.msra.mxu0 %v5912_v4  ;;  %5273 = vmatpush3.bf16.msra.mxu1 %v5913_v5 }
 0xcca   :  { %5252 = vmatprep.subr.bf16.mxu0 %v5914_v50  ;;  %5274 = vmatprep.subr.bf16.mxu1 %v5915_v16 }
 0xccd   :  { %5253 = vmatpush3.bf16.msra.mxu0 %v5916_v19  ;;  %5275 = vmatpush3.bf16.msra.mxu1 %v5917_v21 }
 0xcce   :  { %5254 = vmatprep.subr.bf16.mxu0 %v5918_v1  ;;  %5276 = vmatprep.subr.bf16.mxu1 %v5919_v24 }
 0xcd1   :  { %5255 = vmatpush3.bf16.msra.mxu0 %v5920_v10  ;;  %5277 = vmatpush3.bf16.msra.mxu1 %v5921_v17 }
 0xcd2   :  { %5256 = vmatprep.subr.bf16.mxu0 %v5922_v28  ;;  %5278 = vmatprep.subr.bf16.mxu1 %v5923_v48 }
 0xcd5   :  { %5257 = vmatpush3.bf16.msra.mxu0 %v5924_v57  ;;  %5279 = vmatpush3.bf16.msra.mxu1 %v5925_v45 }
 0xcd6   :  { %5258 = vmatprep.subr.bf16.mxu0 %v5926_v18  ;;  %5280 = vmatprep.subr.bf16.mxu1 %v5927_v31 }
 0xcd9   :  { %5259 = vmatpush3.bf16.msra.mxu0 %v5928_v32  ;;  %5281 = vmatpush3.bf16.msra.mxu1 %v5929_v61 }
 0xcda   :  { %5260 = vmatprep.subr.bf16.mxu0 %v5930_v25  ;;  %5282 = vmatprep.subr.bf16.mxu1 %v5931_v34 }
 0xcdd   :  { %5261 = vmatpush3.bf16.msra.mxu0 %v5932_v23  ;;  %5283 = vmatpush3.bf16.msra.mxu1 %v5933_v53 }
 0xcde   :  { %5262 = vmatprep.subr.bf16.mxu0 %v5934_v36  ;;  %5284 = vmatprep.subr.bf16.mxu1 %v5935_v56 }
 0xce1   :  { %5263 = vmatpush3.bf16.msra.mxu0 %v5936_v27  ;;  %5285 = vmatpush3.bf16.msra.mxu1 %v5937_v33 }
 0xce4   :  { %4728 = vmatmul.mubr.bf16.vlgmr.msra.gmra.mrb[108].mxu0 %v4095_v37  ;;  %4768 = vmatmul.mubr.bf16.vlgmr.msra.gmra.mrb[112].mxu1 %v4097_v29 }
 0xd97   :  { %v5220_v38 = vpop.f32.mrb[104].mxu0  ;;  %v5242_v26 = vpop.f32.mrb[108].mxu1 }
 0xd98   :  { %v5221_v22 = vpop.f32.mrb[105].mxu0  ;;  %v5243_v20 = vpop.f32.mrb[109].mxu1 }
 0xd99   :  { %v5222_v43 = vadd.f32 %v5221_v22, %v5220_v38  ;;  %v5244_v44 = vadd.f32 %v5243_v20, %v5242_v26  ;;  %v5223_v47 = vpop.f32.mrb[106].mxu0  ;;  %v5245_v49 = vpop.f32.mrb[110].mxu1 }
 0xd9a   :  { %v5224_v51 = vpop.f32.mrb[107].mxu0  ;;  %v5246_v2 = vpop.f32.mrb[111].mxu1 }
 0xd9b   :  { %v4498_v52 = vadd.f32 %v5244_v44, %v5222_v43 }
 0xdb7   :  { %v5264_v3 = vpop.f32.mrb[108].mxu0  ;;  %v5286_v39 = vpop.f32.mrb[112].mxu1 }
 0xdb8   :  { %v5265_v54 = vpop.f32.mrb[109].mxu0  ;;  %v5287_v46 = vpop.f32.mrb[113].mxu1 }
 0xdb9   :  { %v5266_v58 = vadd.f32 %v5265_v54, %v5264_v3  ;;  %v5288_v30 = vadd.f32 %v5287_v46, %v5286_v39  ;;  %v5267_v59 = vpop.f32.mrb[110].mxu0  ;;  %v5289_v13 = vpop.f32.mrb[114].mxu1 }
 0xdba   :  { %v5268_v60 = vpop.f32.mrb[111].mxu0  ;;  %v5290_v62 = vpop.f32.mrb[115].mxu1 }
 0xdbb   :  { %v4730_v6 = vadd.f32 %v5266_v58, %v4498_v52 }
 0xdbd   :  { %v4770_v7 = vadd.f32 %v5288_v30, %v4730_v6 }
 0xdbf   :  { %v4782_v40 = vadd.f32 %v5034_v0, %v4770_v7 }
 0xdc1   :  { %4783 = vst [vmem:[#allocation37] sm:$0xff] %v4782_v40 }
 0xdc2   :  { %6497 = shalt.err (!%p6494_p12)
}
 0xdc3   :  { %s7528_s23 = sld [smem:[#allocation64_spill]] }
 0xdc9   :  { %s6498_s13 = scalar_lea.hbm %s7528_s23, 128 }
 0xdca   :  { %p6499_p13 = scmp.ne.s32.totalorder %s7528_s23, %s6498_s13  ;;  %p6502_p0 = scmp.lt.u32.totalorder %s6498_s13, %s7528_s23 }
 0xdcc   :  { %p6504_p1 = pnand %p6502_p0, %p6499_p13 }
 0xdce   :  { %6507 = shalt.err (!%p6504_p1)
}
 0xdcf   :  { %4793 = dma.vmem_to_hbm [thread:$0]  %s4791_s28, 128, %s7528_s23, [#allocation4]  }
 0xdd0   :  { %6532 = dma.done.wait [#allocation4], 128  }
 0xdd1   :  { %6533 = vsyncadd [#allocation4], 4294967168 }
 0xdd2   :  { %4797 = vsyncpa [#allocation3], 1 }
 0xdd3   :  { %4798 = vsyncpa [#allocation6], 1 }
 0xdd4   :  { %4799 = vsyncpa [#allocation9], 1 }
 0xdd5   :  { %4800 = vsyncpa [#allocation12], 1 }
 0xdd6   :  { %4801 = vsyncpa [#allocation15], 1 }
 0xdd7   :  { %4802 = vsyncpa [#allocation18], 1 }
 0xdd8   :  { %4803 = vsyncpa [#allocation21], 1 }
 0xdd9   :  { %4804 = vsyncpa [#allocation24], 1 }
 0xdda   :  { %4805 = vsyncpa [#allocation27], 1 }
 0xddb   :  { %4806 = vsyncpa [#allocation30], 1 }
 0xddc   :  { %4807 = vsyncpa [#allocation33], 1 }
 0xddd   :  { %4808 = vsyncpa [#allocation36], 1 }
 0xdde   :  { %4809 = vsyncpa [#allocation4], 1 }

</bundles_post_ra>
